<compile_context>
chip_gen: v6e
topology: v6e:2x2x1
jax: 0.10.0
libtpu: 0.0.40
codegen_flags: <defaults>
</compile_context>

<pallas_src>
import functools
import math

import jax
import jax.numpy as jnp
from jax import lax
from jax.experimental import pallas as pl
from jax.experimental.pallas import tpu as pltpu

MEXICAN_HAT_C = 2.0 / (math.sqrt(3.0) * (math.pi ** 0.25))


def _default_wavelet_dtype():
    """bf16 wavelet math on v6e/v7x (bf16 VPU/EUP paths); f32 elsewhere."""
    try:
        kind = jax.devices()[0].device_kind.lower()
    except Exception:
        return jnp.float32
    if ("v6" in kind) or ("v7" in kind) or ("7x" in kind):
        return jnp.bfloat16
    return jnp.float32


def _round_up(x, m):
    return ((x + m - 1) // m) * m


# ----------------------------- Pallas kernel -------------------------------
def _wavkan_kernel(x_ref, r_ref, t_ref, w_ref, out_ref, stats_ref, *,
                   l_total, compute_dtype):
    """One (batch element, L-tile) block.  O on sublanes, L on lanes.

    x_ref     : (In, TL)   unfolded patch columns for this batch / L tile
    r_ref     : (TO, In)   1/scale
    t_ref     : (TO, In)   translation
    w_ref     : (TO, In)   wavelet weights * MEXICAN_HAT_C
    out_ref   : (TO, TL)   f32 output tile (L lane-dense)
    stats_ref : (TO, 128)  lane 0: masked row sums, lane 1: masked sum-squares
    """
    n_in, tile_l = x_ref.shape
    tile_o = r_ref.shape[0]
    cd = compute_dtype

    # Register accumulator; out_ref is written exactly once at the end
    # (no per-step read-modify-write through VMEM).
    acc = jnp.zeros((tile_o, tile_l), jnp.float32)

    # Fully unrolled In reduction: every slice below is static, so the LLO
    # scheduler sees the whole VPU/EUP chain at once and can overlap it.
    # TODO(synk): for very large In (> a few hundred) switch to lax.fori_loop
    # with a modest unroll factor to bound generated code size.
    for i in range(n_in):
        # Row i of x broadcast across the TO sublanes (pure vld + sublane
        # broadcast -- no MXU / one-hot matmul involved).
        x_row = x_ref[pl.ds(i, 1), :].astype(cd)          # (1, TL)
        # Per-step parameters broadcast across the TL lanes.
        r = r_ref[:, pl.ds(i, 1)].astype(cd)              # (TO, 1)
        t = t_ref[:, pl.ds(i, 1)].astype(cd)
        w = w_ref[:, pl.ds(i, 1)].astype(cd)

        z = (x_row - t) * r                               # (TO, TL) in cd
        z2 = z * z
        psi = (z2 - 1.0) * jnp.exp(-0.5 * z2)             # mexican hat (C in w)
        acc = acc + (psi * w).astype(jnp.float32)

    out_ref[...] = acc

    # Fused BatchNorm statistics: masked per-feature sums over the valid L
    # columns so the (B, O, L) activation never has to be re-read from HBM.
    col = (pl.program_id(1) * tile_l
           + lax.broadcasted_iota(jnp.int32, (1, tile_l), 1))
    acc_m = jnp.where(col < l_total, acc, 0.0)
    s1 = jnp.sum(acc_m, axis=1, keepdims=True)            # (TO, 1)
    s2 = jnp.sum(acc_m * acc_m, axis=1, keepdims=True)
    lane = lax.broadcasted_iota(jnp.int32, (tile_o, 128), 1)
    stats_ref[...] = (jnp.where(lane == 0, s1, 0.0)
                      + jnp.where(lane == 1, s2, 0.0))


# ------------------------------ Pallas wrapper ------------------------------
def wavkan_layer_unfolded(x_unf, scale, translation, wavelet_weights, *,
                          tile_l=2048, wavelet_dtype=None):
    """WavKAN (mexican_hat) layer applied to an unfolded (B, In, L) tensor.

    Returns (wav, col_sum, col_sumsq): wav is (B, O, L) f32, and the sums are
    per-output-feature reductions over all B*L positions (for BatchNorm1d).
    """
    b, n_in, l_total = x_unf.shape
    n_out = scale.shape[0]
    if wavelet_dtype is None:
        wavelet_dtype = _default_wavelet_dtype()

    # O lives on the sublane axis -> pad only to a multiple of 8 (not 128).
    o_pad = _round_up(max(n_out, 1), 8)

    def _prep(p):
        return jnp.pad(p.astype(jnp.float32), ((0, o_pad - n_out), (0, 0)))

    # Parameter prep (once per call): reciprocal scale, wavelet constant folded
    # into the weights.  Padded rows have r = w = 0 -> finite, zero output.
    # NOTE: like the PyTorch reference, no guard against scale == 0.
    r_p = _prep(1.0 / scale)
    t_p = _prep(translation)
    w_p = _prep(MEXICAN_HAT_C * wavelet_weights)

    # L tile: as large as possible (amortizes grid-step overhead) while keeping
    # the register accumulator (o_pad, tile_l) f32 within ~64 KiB (16 vregs).
    max_acc_elems = 16 * 1024
    cap = max(128, (max_acc_elems // o_pad) // 128 * 128)
    tile_l = min(tile_l, cap)
    if tile_l >= l_total:
        tile_l = l_total             # single, full-width block per batch elem
        num_l = 1
    else:                            # here tile_l is a multiple of 128
        num_l = pl.cdiv(l_total, tile_l)

    kernel = functools.partial(_wavkan_kernel, l_total=l_total,
                               compute_dtype=wavelet_dtype)

    # Explicit VMEM budget (double-buffered blocks + slack), capped at 48 MiB
    # so it stays within v7x's 64 MiB physical VMEM per TensorCore.
    block_bytes = 4 * (2 * n_in * tile_l + 3 * 2 * o_pad * n_in
                       + 2 * o_pad * tile_l + 2 * o_pad * 128)
    vmem_limit = int(min(max(4 * block_bytes, 16 * 2 ** 20), 48 * 2 ** 20))

    out, stats = pl.pallas_call(
        kernel,
        out_shape=(
            jax.ShapeDtypeStruct((b, o_pad, l_total), jnp.float32),
            jax.ShapeDtypeStruct((b * num_l, o_pad, 128), jnp.float32),
        ),
        grid_spec=pltpu.PrefetchScalarGridSpec(
            num_scalar_prefetch=0,
            grid=(b, num_l),
            in_specs=[
                pl.BlockSpec((None, n_in, tile_l), lambda bi, li: (bi, 0, li)),
                pl.BlockSpec((o_pad, n_in), lambda bi, li: (0, 0)),
                pl.BlockSpec((o_pad, n_in), lambda bi, li: (0, 0)),
                pl.BlockSpec((o_pad, n_in), lambda bi, li: (0, 0)),
            ],
            out_specs=(
                pl.BlockSpec((None, o_pad, tile_l), lambda bi, li: (bi, 0, li)),
                pl.BlockSpec((None, o_pad, 128),
                             lambda bi, li: (bi * num_l + li, 0, 0)),
            ),
        ),
        compiler_params=pltpu.CompilerParams(
            dimension_semantics=("parallel", "parallel"),
            vmem_limit_bytes=vmem_limit),
    )(x_unf.astype(jnp.float32), r_p, t_p, w_p)

    wav = out[:, :n_out, :]                                    # (B, O, L)
    col_sum = jnp.sum(stats[:, :n_out, 0], axis=0)             # (O,)
    col_sumsq = jnp.sum(stats[:, :n_out, 1], axis=0)
    return wav, col_sum, col_sumsq


# ------------------------------- JAX glue -----------------------------------
def unfold_nchw(x, kernel_size, stride, padding):
    """F.unfold equivalent: (B, C, H, W) -> (B, C*k*k, L), PyTorch row order."""
    b, c, h, w = x.shape
    k = kernel_size
    xp = jnp.pad(x, ((0, 0), (0, 0), (padding, padding), (padding, padding)))
    out_h = (h + 2 * padding - k) // stride + 1
    out_w = (w + 2 * padding - k) // stride + 1
    patches = []
    for kh in range(k):
        for kw in range(k):
            patch = xp[:, :,
                       kh:kh + stride * out_h:stride,
                       kw:kw + stride * out_w:stride]          # (B, C, oh, ow)
            patches.append(patch)
    col = jnp.stack(patches, axis=2)                           # (B, C, k*k, oh, ow)
    return col.reshape(b, c * k * k, out_h * out_w), out_h, out_w
    # TODO(synk): fuse the im2col into the kernel via an index_map over
    # (b, oh, ow) so the k^2-expanded matrix is never materialized in HBM.


class WavKANConv2d:
    """JAX/Pallas reimplementation of the PyTorch WavKANConv2d forward pass."""

    def __init__(self, in_channels, out_channels, kernel_size, stride=1,
                 padding=0, wavelet_type="mexican_hat", key=None,
                 wavelet_dtype=None):
        assert wavelet_type == "mexican_hat"
        self.in_channels = in_channels
        self.out_channels = out_channels
        self.kernel_size = kernel_size
        self.stride = stride
        self.padding = padding
        self.wavelet_dtype = wavelet_dtype

        in_features = in_channels * kernel_size * kernel_size
        # WavKANLayer init: scale = ones, translation = zeros,
        # wavelet_weights ~ kaiming_uniform(a=sqrt(5)) == U(+-1/sqrt(fan_in)).
        self.scale = jnp.ones((out_channels, in_features), jnp.float32)
        self.translation = jnp.zeros((out_channels, in_features), jnp.float32)
        bound = 1.0 / math.sqrt(in_features)
        key = jax.random.PRNGKey(42) if key is None else key
        self.wavelet_weights = jax.random.uniform(
            key, (out_channels, in_features), jnp.float32, -bound, bound)
        # TODO(synk): the reference also allocates `weight1` + a SiLU base path,
        # but its forward discards base_output, so it is omitted here.
        # TODO(synk): when scale/translation are broadcast along O (as at
        # default init), psi depends only on (i, n) and the layer reduces to a
        # single (TO, In) x (In, TL) MXU matmul per block -- a dispatchable
        # fast path that is not implemented here.

    def __call__(self, x):
        b, c, h, w = x.shape
        assert c == self.in_channels
        x_unf, out_h, out_w = unfold_nchw(x, self.kernel_size, self.stride,
                                          self.padding)        # (B, Ckk, L)
        # The (In, L)-oriented kernel consumes the unfold output directly and
        # produces (B, O, L) directly -- no wrapper-side HBM transposes.
        wav, s1, s2 = wavkan_layer_unfolded(
            x_unf, self.scale, self.translation, self.wavelet_weights,
            wavelet_dtype=self.wavelet_dtype)                  # (B, O, L)

        # BatchNorm1d (training mode: biased batch stats, gamma=1, beta=0,
        # eps=1e-5) from the fused per-feature sums.  E[x^2]-E[x]^2 can lose
        # precision when |mean| >> std; acceptable for this activation range.
        n = b * out_h * out_w
        mean = s1 / n
        var = jnp.maximum(s2 / n - mean * mean, 0.0)
        y = (wav - mean[None, :, None]) * lax.rsqrt(var[None, :, None] + 1e-5)
        return y.reshape(b, self.out_channels, out_h, out_w)


def _reference_forward(module, x):
    """Pure-JAX reference of the PyTorch forward (for verification only)."""
    x_unf, oh, ow = unfold_nchw(x, module.kernel_size, module.stride,
                                module.padding)
    b = x.shape[0]
    xr = jnp.transpose(x_unf, (0, 2, 1)).reshape(b * oh * ow, -1)
    z = (xr[:, None, :] - module.translation[None]) / module.scale[None]
    psi = MEXICAN_HAT_C * (z * z - 1.0) * jnp.exp(-0.5 * z * z)
    wav = jnp.sum(psi * module.wavelet_weights[None], axis=-1)
    mean = jnp.mean(wav, axis=0, keepdims=True)
    var = jnp.mean((wav - mean) ** 2, axis=0, keepdims=True)
    y = (wav - mean) / jnp.sqrt(var + 1e-5)
    y = y.reshape(b, oh * ow, module.out_channels)
    y = jnp.transpose(y, (0, 2, 1))
    return y.reshape(b, module.out_channels, oh, ow)


if __name__ == "__main__":
    key = jax.random.PRNGKey(0)
    k_x, k_w, k_s, k_t, k_r = jax.random.split(key, 5)

    B, C, H, W = 2, 4, 16, 16
    out_channels, kernel_size = 8, 3

    x = jax.random.normal(k_x, (B, C, H, W), jnp.float32)
    oh = ow = H - kernel_size + 1

    # 1) f32 wavelet math, checked tightly against the pure-JAX reference.
    module_f32 = WavKANConv2d(C, out_channels, kernel_size, stride=1,
                              padding=0, key=k_w, wavelet_dtype=jnp.float32)
    out_f32 = jax.block_until_ready(module_f32(x))
    assert out_f32.shape == (B, out_channels, oh, ow), out_f32.shape
    ref = _reference_forward(module_f32, x)
    assert bool(jnp.allclose(out_f32, ref, atol=2e-3, rtol=2e-3)), \
        float(jnp.max(jnp.abs(out_f32 - ref)))

    # 2) Hardware-default wavelet dtype (bf16 on v6e/v7x, f32 elsewhere):
    #    finite and loosely consistent with the f32 path.
    module = WavKANConv2d(C, out_channels, kernel_size, stride=1, padding=0,
                          key=k_w)
    out_hw = jax.block_until_ready(module(x))
    assert out_hw.shape == (B, out_channels, oh, ow)
    assert bool(jnp.all(jnp.isfinite(out_hw)))
    assert bool(jnp.allclose(out_hw, out_f32, atol=0.3, rtol=0.05))

    # 3) Direct layer test with non-degenerate scale/translation, plus a
    #    consistency check of the fused BatchNorm statistics.
    n_pos, in_f, out_f = 200, 36, 8
    xr = jax.random.normal(k_r, (n_pos, in_f), jnp.float32)
    scale = 0.5 + jax.random.uniform(k_s, (out_f, in_f), jnp.float32)
    trans = jax.random.normal(k_t, (out_f, in_f), jnp.float32)
    wts = module.wavelet_weights
    wav, s1, s2 = wavkan_layer_unfolded(xr.T[None], scale, trans, wts,
                                        wavelet_dtype=jnp.float32)
    wav = jax.block_until_ready(wav)                          # (1, O, N)
    z = (xr[:, None, :] - trans[None]) / scale[None]
    psi = MEXICAN_HAT_C * (z * z - 1.0) * jnp.exp(-0.5 * z * z)
    wav_ref = jnp.sum(psi * wts[None], axis=-1)               # (N, O)
    assert bool(jnp.allclose(wav[0].T, wav_ref, atol=2e-3, rtol=2e-3))
    assert bool(jnp.allclose(s1, jnp.sum(wav[0], axis=1), atol=1e-2, rtol=1e-4))
    assert bool(jnp.allclose(s2, jnp.sum(wav[0] * wav[0], axis=1),
                             atol=1e-2, rtol=1e-4))

    print("KERNEL_OK")
</pallas_src>

<mosaic_0001>
module attributes {stable_mosaic.version = 11 : i64} {
  func.func @_wavkan_kernel(%arg0: i32, %arg1: i32, %arg2: memref<1x36x196xf32, #tpu.memory_space<vmem>>, %arg3: memref<8x36xf32, #tpu.memory_space<vmem>>, %arg4: memref<8x36xf32, #tpu.memory_space<vmem>>, %arg5: memref<8x36xf32, #tpu.memory_space<vmem>>, %arg6: memref<1x8x196xf32, #tpu.memory_space<vmem>>, %arg7: memref<1x8x128xf32, #tpu.memory_space<vmem>>) attributes {dimension_semantics = [#tpu.dimension_semantics<parallel>, #tpu.dimension_semantics<parallel>], iteration_bounds = array<i64: 2, 1>, scalar_prefetch = 0 : i64, scratch_operands = 0 : i64, tpu.core_type = #tpu.core_type<tc>, window_params = [{transform_indices = @transform_0, window_bounds = array<i64: 1, 36, 196>}, {pipeline_mode = #tpu.pipeline_mode<synchronous>, transform_indices = @transform_1, window_bounds = array<i64: 8, 36>}, {pipeline_mode = #tpu.pipeline_mode<synchronous>, transform_indices = @transform_2, window_bounds = array<i64: 8, 36>}, {pipeline_mode = #tpu.pipeline_mode<synchronous>, transform_indices = @transform_3, window_bounds = array<i64: 8, 36>}, {transform_indices = @transform_4, window_bounds = array<i64: 1, 8, 196>}, {transform_indices = @transform_5, window_bounds = array<i64: 1, 8, 128>}]} {
    %cst = arith.constant 0.000000e+00 : f32
    %0 = vector.broadcast %cst : f32 to vector<8x196xf32>
    %c0 = arith.constant 0 : index
    %c0_0 = arith.constant 0 : index
    %c0_1 = arith.constant 0 : index
    %1 = vector.load %arg2[%c0, %c0_0, %c0_1] : memref<1x36x196xf32, #tpu.memory_space<vmem>>, vector<1x1x196xf32>
    %2 = vector.shape_cast %1 : vector<1x1x196xf32> to vector<1x196xf32>
    %c0_2 = arith.constant 0 : index
    %c0_3 = arith.constant 0 : index
    %3 = vector.load %arg3[%c0_2, %c0_3] : memref<8x36xf32, #tpu.memory_space<vmem>>, vector<8x1xf32>
    %c0_4 = arith.constant 0 : index
    %c0_5 = arith.constant 0 : index
    %4 = vector.load %arg4[%c0_4, %c0_5] : memref<8x36xf32, #tpu.memory_space<vmem>>, vector<8x1xf32>
    %c0_6 = arith.constant 0 : index
    %c0_7 = arith.constant 0 : index
    %5 = vector.load %arg5[%c0_6, %c0_7] : memref<8x36xf32, #tpu.memory_space<vmem>>, vector<8x1xf32>
    %6 = vector.broadcast %2 : vector<1x196xf32> to vector<8x196xf32>
    %7 = vector.broadcast %4 : vector<8x1xf32> to vector<8x196xf32>
    %8 = arith.subf %6, %7 : vector<8x196xf32>
    %9 = vector.broadcast %3 : vector<8x1xf32> to vector<8x196xf32>
    %10 = arith.mulf %8, %9 : vector<8x196xf32>
    %11 = arith.mulf %10, %10 : vector<8x196xf32>
    %cst_8 = arith.constant 1.000000e+00 : f32
    %12 = vector.broadcast %cst_8 : f32 to vector<8x196xf32>
    %13 = arith.subf %11, %12 : vector<8x196xf32>
    %cst_9 = arith.constant -5.000000e-01 : f32
    %14 = vector.broadcast %cst_9 : f32 to vector<8x196xf32>
    %15 = arith.mulf %14, %11 : vector<8x196xf32>
    %16 = math.exp %15 : vector<8x196xf32>
    %17 = arith.mulf %13, %16 : vector<8x196xf32>
    %18 = vector.broadcast %5 : vector<8x1xf32> to vector<8x196xf32>
    %19 = arith.mulf %17, %18 : vector<8x196xf32>
    %20 = arith.addf %0, %19 : vector<8x196xf32>
    %c0_10 = arith.constant 0 : index
    %c1 = arith.constant 1 : index
    %c0_11 = arith.constant 0 : index
    %21 = vector.load %arg2[%c0_10, %c1, %c0_11] : memref<1x36x196xf32, #tpu.memory_space<vmem>>, vector<1x1x196xf32>
    %22 = vector.shape_cast %21 : vector<1x1x196xf32> to vector<1x196xf32>
    %c0_12 = arith.constant 0 : index
    %c1_13 = arith.constant 1 : index
    %23 = vector.load %arg3[%c0_12, %c1_13] : memref<8x36xf32, #tpu.memory_space<vmem>>, vector<8x1xf32>
    %c0_14 = arith.constant 0 : index
    %c1_15 = arith.constant 1 : index
    %24 = vector.load %arg4[%c0_14, %c1_15] : memref<8x36xf32, #tpu.memory_space<vmem>>, vector<8x1xf32>
    %c0_16 = arith.constant 0 : index
    %c1_17 = arith.constant 1 : index
    %25 = vector.load %arg5[%c0_16, %c1_17] : memref<8x36xf32, #tpu.memory_space<vmem>>, vector<8x1xf32>
    %26 = vector.broadcast %22 : vector<1x196xf32> to vector<8x196xf32>
    %27 = vector.broadcast %24 : vector<8x1xf32> to vector<8x196xf32>
    %28 = arith.subf %26, %27 : vector<8x196xf32>
    %29 = vector.broadcast %23 : vector<8x1xf32> to vector<8x196xf32>
    %30 = arith.mulf %28, %29 : vector<8x196xf32>
    %31 = arith.mulf %30, %30 : vector<8x196xf32>
    %cst_18 = arith.constant 1.000000e+00 : f32
    %32 = vector.broadcast %cst_18 : f32 to vector<8x196xf32>
    %33 = arith.subf %31, %32 : vector<8x196xf32>
    %cst_19 = arith.constant -5.000000e-01 : f32
    %34 = vector.broadcast %cst_19 : f32 to vector<8x196xf32>
    %35 = arith.mulf %34, %31 : vector<8x196xf32>
    %36 = math.exp %35 : vector<8x196xf32>
    %37 = arith.mulf %33, %36 : vector<8x196xf32>
    %38 = vector.broadcast %25 : vector<8x1xf32> to vector<8x196xf32>
    %39 = arith.mulf %37, %38 : vector<8x196xf32>
    %40 = arith.addf %20, %39 : vector<8x196xf32>
    %c0_20 = arith.constant 0 : index
    %c2 = arith.constant 2 : index
    %c0_21 = arith.constant 0 : index
    %41 = vector.load %arg2[%c0_20, %c2, %c0_21] : memref<1x36x196xf32, #tpu.memory_space<vmem>>, vector<1x1x196xf32>
    %42 = vector.shape_cast %41 : vector<1x1x196xf32> to vector<1x196xf32>
    %c0_22 = arith.constant 0 : index
    %c2_23 = arith.constant 2 : index
    %43 = vector.load %arg3[%c0_22, %c2_23] : memref<8x36xf32, #tpu.memory_space<vmem>>, vector<8x1xf32>
    %c0_24 = arith.constant 0 : index
    %c2_25 = arith.constant 2 : index
    %44 = vector.load %arg4[%c0_24, %c2_25] : memref<8x36xf32, #tpu.memory_space<vmem>>, vector<8x1xf32>
    %c0_26 = arith.constant 0 : index
    %c2_27 = arith.constant 2 : index
    %45 = vector.load %arg5[%c0_26, %c2_27] : memref<8x36xf32, #tpu.memory_space<vmem>>, vector<8x1xf32>
    %46 = vector.broadcast %42 : vector<1x196xf32> to vector<8x196xf32>
    %47 = vector.broadcast %44 : vector<8x1xf32> to vector<8x196xf32>
    %48 = arith.subf %46, %47 : vector<8x196xf32>
    %49 = vector.broadcast %43 : vector<8x1xf32> to vector<8x196xf32>
    %50 = arith.mulf %48, %49 : vector<8x196xf32>
    %51 = arith.mulf %50, %50 : vector<8x196xf32>
    %cst_28 = arith.constant 1.000000e+00 : f32
    %52 = vector.broadcast %cst_28 : f32 to vector<8x196xf32>
    %53 = arith.subf %51, %52 : vector<8x196xf32>
    %cst_29 = arith.constant -5.000000e-01 : f32
    %54 = vector.broadcast %cst_29 : f32 to vector<8x196xf32>
    %55 = arith.mulf %54, %51 : vector<8x196xf32>
    %56 = math.exp %55 : vector<8x196xf32>
    %57 = arith.mulf %53, %56 : vector<8x196xf32>
    %58 = vector.broadcast %45 : vector<8x1xf32> to vector<8x196xf32>
    %59 = arith.mulf %57, %58 : vector<8x196xf32>
    %60 = arith.addf %40, %59 : vector<8x196xf32>
    %c0_30 = arith.constant 0 : index
    %c3 = arith.constant 3 : index
    %c0_31 = arith.constant 0 : index
    %61 = vector.load %arg2[%c0_30, %c3, %c0_31] : memref<1x36x196xf32, #tpu.memory_space<vmem>>, vector<1x1x196xf32>
    %62 = vector.shape_cast %61 : vector<1x1x196xf32> to vector<1x196xf32>
    %c0_32 = arith.constant 0 : index
    %c3_33 = arith.constant 3 : index
    %63 = vector.load %arg3[%c0_32, %c3_33] : memref<8x36xf32, #tpu.memory_space<vmem>>, vector<8x1xf32>
    %c0_34 = arith.constant 0 : index
    %c3_35 = arith.constant 3 : index
    %64 = vector.load %arg4[%c0_34, %c3_35] : memref<8x36xf32, #tpu.memory_space<vmem>>, vector<8x1xf32>
    %c0_36 = arith.constant 0 : index
    %c3_37 = arith.constant 3 : index
    %65 = vector.load %arg5[%c0_36, %c3_37] : memref<8x36xf32, #tpu.memory_space<vmem>>, vector<8x1xf32>
    %66 = vector.broadcast %62 : vector<1x196xf32> to vector<8x196xf32>
    %67 = vector.broadcast %64 : vector<8x1xf32> to vector<8x196xf32>
    %68 = arith.subf %66, %67 : vector<8x196xf32>
    %69 = vector.broadcast %63 : vector<8x1xf32> to vector<8x196xf32>
    %70 = arith.mulf %68, %69 : vector<8x196xf32>
    %71 = arith.mulf %70, %70 : vector<8x196xf32>
    %cst_38 = arith.constant 1.000000e+00 : f32
    %72 = vector.broadcast %cst_38 : f32 to vector<8x196xf32>
    %73 = arith.subf %71, %72 : vector<8x196xf32>
    %cst_39 = arith.constant -5.000000e-01 : f32
    %74 = vector.broadcast %cst_39 : f32 to vector<8x196xf32>
    %75 = arith.mulf %74, %71 : vector<8x196xf32>
    %76 = math.exp %75 : vector<8x196xf32>
    %77 = arith.mulf %73, %76 : vector<8x196xf32>
    %78 = vector.broadcast %65 : vector<8x1xf32> to vector<8x196xf32>
    %79 = arith.mulf %77, %78 : vector<8x196xf32>
    %80 = arith.addf %60, %79 : vector<8x196xf32>
    %c0_40 = arith.constant 0 : index
    %c4 = arith.constant 4 : index
    %c0_41 = arith.constant 0 : index
    %81 = vector.load %arg2[%c0_40, %c4, %c0_41] : memref<1x36x196xf32, #tpu.memory_space<vmem>>, vector<1x1x196xf32>
    %82 = vector.shape_cast %81 : vector<1x1x196xf32> to vector<1x196xf32>
    %c0_42 = arith.constant 0 : index
    %c4_43 = arith.constant 4 : index
    %83 = vector.load %arg3[%c0_42, %c4_43] : memref<8x36xf32, #tpu.memory_space<vmem>>, vector<8x1xf32>
    %c0_44 = arith.constant 0 : index
    %c4_45 = arith.constant 4 : index
    %84 = vector.load %arg4[%c0_44, %c4_45] : memref<8x36xf32, #tpu.memory_space<vmem>>, vector<8x1xf32>
    %c0_46 = arith.constant 0 : index
    %c4_47 = arith.constant 4 : index
    %85 = vector.load %arg5[%c0_46, %c4_47] : memref<8x36xf32, #tpu.memory_space<vmem>>, vector<8x1xf32>
    %86 = vector.broadcast %82 : vector<1x196xf32> to vector<8x196xf32>
    %87 = vector.broadcast %84 : vector<8x1xf32> to vector<8x196xf32>
    %88 = arith.subf %86, %87 : vector<8x196xf32>
    %89 = vector.broadcast %83 : vector<8x1xf32> to vector<8x196xf32>
    %90 = arith.mulf %88, %89 : vector<8x196xf32>
    %91 = arith.mulf %90, %90 : vector<8x196xf32>
    %cst_48 = arith.constant 1.000000e+00 : f32
    %92 = vector.broadcast %cst_48 : f32 to vector<8x196xf32>
    %93 = arith.subf %91, %92 : vector<8x196xf32>
    %cst_49 = arith.constant -5.000000e-01 : f32
    %94 = vector.broadcast %cst_49 : f32 to vector<8x196xf32>
    %95 = arith.mulf %94, %91 : vector<8x196xf32>
    %96 = math.exp %95 : vector<8x196xf32>
    %97 = arith.mulf %93, %96 : vector<8x196xf32>
    %98 = vector.broadcast %85 : vector<8x1xf32> to vector<8x196xf32>
    %99 = arith.mulf %97, %98 : vector<8x196xf32>
    %100 = arith.addf %80, %99 : vector<8x196xf32>
    %c0_50 = arith.constant 0 : index
    %c5 = arith.constant 5 : index
    %c0_51 = arith.constant 0 : index
    %101 = vector.load %arg2[%c0_50, %c5, %c0_51] : memref<1x36x196xf32, #tpu.memory_space<vmem>>, vector<1x1x196xf32>
    %102 = vector.shape_cast %101 : vector<1x1x196xf32> to vector<1x196xf32>
    %c0_52 = arith.constant 0 : index
    %c5_53 = arith.constant 5 : index
    %103 = vector.load %arg3[%c0_52, %c5_53] : memref<8x36xf32, #tpu.memory_space<vmem>>, vector<8x1xf32>
    %c0_54 = arith.constant 0 : index
    %c5_55 = arith.constant 5 : index
    %104 = vector.load %arg4[%c0_54, %c5_55] : memref<8x36xf32, #tpu.memory_space<vmem>>, vector<8x1xf32>
    %c0_56 = arith.constant 0 : index
    %c5_57 = arith.constant 5 : index
    %105 = vector.load %arg5[%c0_56, %c5_57] : memref<8x36xf32, #tpu.memory_space<vmem>>, vector<8x1xf32>
    %106 = vector.broadcast %102 : vector<1x196xf32> to vector<8x196xf32>
    %107 = vector.broadcast %104 : vector<8x1xf32> to vector<8x196xf32>
    %108 = arith.subf %106, %107 : vector<8x196xf32>
    %109 = vector.broadcast %103 : vector<8x1xf32> to vector<8x196xf32>
    %110 = arith.mulf %108, %109 : vector<8x196xf32>
    %111 = arith.mulf %110, %110 : vector<8x196xf32>
    %cst_58 = arith.constant 1.000000e+00 : f32
    %112 = vector.broadcast %cst_58 : f32 to vector<8x196xf32>
    %113 = arith.subf %111, %112 : vector<8x196xf32>
    %cst_59 = arith.constant -5.000000e-01 : f32
    %114 = vector.broadcast %cst_59 : f32 to vector<8x196xf32>
    %115 = arith.mulf %114, %111 : vector<8x196xf32>
    %116 = math.exp %115 : vector<8x196xf32>
    %117 = arith.mulf %113, %116 : vector<8x196xf32>
    %118 = vector.broadcast %105 : vector<8x1xf32> to vector<8x196xf32>
    %119 = arith.mulf %117, %118 : vector<8x196xf32>
    %120 = arith.addf %100, %119 : vector<8x196xf32>
    %c0_60 = arith.constant 0 : index
    %c6 = arith.constant 6 : index
    %c0_61 = arith.constant 0 : index
    %121 = vector.load %arg2[%c0_60, %c6, %c0_61] : memref<1x36x196xf32, #tpu.memory_space<vmem>>, vector<1x1x196xf32>
    %122 = vector.shape_cast %121 : vector<1x1x196xf32> to vector<1x196xf32>
    %c0_62 = arith.constant 0 : index
    %c6_63 = arith.constant 6 : index
    %123 = vector.load %arg3[%c0_62, %c6_63] : memref<8x36xf32, #tpu.memory_space<vmem>>, vector<8x1xf32>
    %c0_64 = arith.constant 0 : index
    %c6_65 = arith.constant 6 : index
    %124 = vector.load %arg4[%c0_64, %c6_65] : memref<8x36xf32, #tpu.memory_space<vmem>>, vector<8x1xf32>
    %c0_66 = arith.constant 0 : index
    %c6_67 = arith.constant 6 : index
    %125 = vector.load %arg5[%c0_66, %c6_67] : memref<8x36xf32, #tpu.memory_space<vmem>>, vector<8x1xf32>
    %126 = vector.broadcast %122 : vector<1x196xf32> to vector<8x196xf32>
    %127 = vector.broadcast %124 : vector<8x1xf32> to vector<8x196xf32>
    %128 = arith.subf %126, %127 : vector<8x196xf32>
    %129 = vector.broadcast %123 : vector<8x1xf32> to vector<8x196xf32>
    %130 = arith.mulf %128, %129 : vector<8x196xf32>
    %131 = arith.mulf %130, %130 : vector<8x196xf32>
    %cst_68 = arith.constant 1.000000e+00 : f32
    %132 = vector.broadcast %cst_68 : f32 to vector<8x196xf32>
    %133 = arith.subf %131, %132 : vector<8x196xf32>
    %cst_69 = arith.constant -5.000000e-01 : f32
    %134 = vector.broadcast %cst_69 : f32 to vector<8x196xf32>
    %135 = arith.mulf %134, %131 : vector<8x196xf32>
    %136 = math.exp %135 : vector<8x196xf32>
    %137 = arith.mulf %133, %136 : vector<8x196xf32>
    %138 = vector.broadcast %125 : vector<8x1xf32> to vector<8x196xf32>
    %139 = arith.mulf %137, %138 : vector<8x196xf32>
    %140 = arith.addf %120, %139 : vector<8x196xf32>
    %c0_70 = arith.constant 0 : index
    %c7 = arith.constant 7 : index
    %c0_71 = arith.constant 0 : index
    %141 = vector.load %arg2[%c0_70, %c7, %c0_71] : memref<1x36x196xf32, #tpu.memory_space<vmem>>, vector<1x1x196xf32>
    %142 = vector.shape_cast %141 : vector<1x1x196xf32> to vector<1x196xf32>
    %c0_72 = arith.constant 0 : index
    %c7_73 = arith.constant 7 : index
    %143 = vector.load %arg3[%c0_72, %c7_73] : memref<8x36xf32, #tpu.memory_space<vmem>>, vector<8x1xf32>
    %c0_74 = arith.constant 0 : index
    %c7_75 = arith.constant 7 : index
    %144 = vector.load %arg4[%c0_74, %c7_75] : memref<8x36xf32, #tpu.memory_space<vmem>>, vector<8x1xf32>
    %c0_76 = arith.constant 0 : index
    %c7_77 = arith.constant 7 : index
    %145 = vector.load %arg5[%c0_76, %c7_77] : memref<8x36xf32, #tpu.memory_space<vmem>>, vector<8x1xf32>
    %146 = vector.broadcast %142 : vector<1x196xf32> to vector<8x196xf32>
    %147 = vector.broadcast %144 : vector<8x1xf32> to vector<8x196xf32>
    %148 = arith.subf %146, %147 : vector<8x196xf32>
    %149 = vector.broadcast %143 : vector<8x1xf32> to vector<8x196xf32>
    %150 = arith.mulf %148, %149 : vector<8x196xf32>
    %151 = arith.mulf %150, %150 : vector<8x196xf32>
    %cst_78 = arith.constant 1.000000e+00 : f32
    %152 = vector.broadcast %cst_78 : f32 to vector<8x196xf32>
    %153 = arith.subf %151, %152 : vector<8x196xf32>
    %cst_79 = arith.constant -5.000000e-01 : f32
    %154 = vector.broadcast %cst_79 : f32 to vector<8x196xf32>
    %155 = arith.mulf %154, %151 : vector<8x196xf32>
    %156 = math.exp %155 : vector<8x196xf32>
    %157 = arith.mulf %153, %156 : vector<8x196xf32>
    %158 = vector.broadcast %145 : vector<8x1xf32> to vector<8x196xf32>
    %159 = arith.mulf %157, %158 : vector<8x196xf32>
    %160 = arith.addf %140, %159 : vector<8x196xf32>
    %c0_80 = arith.constant 0 : index
    %c8 = arith.constant 8 : index
    %c0_81 = arith.constant 0 : index
    %161 = vector.load %arg2[%c0_80, %c8, %c0_81] : memref<1x36x196xf32, #tpu.memory_space<vmem>>, vector<1x1x196xf32>
    %162 = vector.shape_cast %161 : vector<1x1x196xf32> to vector<1x196xf32>
    %c0_82 = arith.constant 0 : index
    %c8_83 = arith.constant 8 : index
    %163 = vector.load %arg3[%c0_82, %c8_83] : memref<8x36xf32, #tpu.memory_space<vmem>>, vector<8x1xf32>
    %c0_84 = arith.constant 0 : index
    %c8_85 = arith.constant 8 : index
    %164 = vector.load %arg4[%c0_84, %c8_85] : memref<8x36xf32, #tpu.memory_space<vmem>>, vector<8x1xf32>
    %c0_86 = arith.constant 0 : index
    %c8_87 = arith.constant 8 : index
    %165 = vector.load %arg5[%c0_86, %c8_87] : memref<8x36xf32, #tpu.memory_space<vmem>>, vector<8x1xf32>
    %166 = vector.broadcast %162 : vector<1x196xf32> to vector<8x196xf32>
    %167 = vector.broadcast %164 : vector<8x1xf32> to vector<8x196xf32>
    %168 = arith.subf %166, %167 : vector<8x196xf32>
    %169 = vector.broadcast %163 : vector<8x1xf32> to vector<8x196xf32>
    %170 = arith.mulf %168, %169 : vector<8x196xf32>
    %171 = arith.mulf %170, %170 : vector<8x196xf32>
    %cst_88 = arith.constant 1.000000e+00 : f32
    %172 = vector.broadcast %cst_88 : f32 to vector<8x196xf32>
    %173 = arith.subf %171, %172 : vector<8x196xf32>
    %cst_89 = arith.constant -5.000000e-01 : f32
    %174 = vector.broadcast %cst_89 : f32 to vector<8x196xf32>
    %175 = arith.mulf %174, %171 : vector<8x196xf32>
    %176 = math.exp %175 : vector<8x196xf32>
    %177 = arith.mulf %173, %176 : vector<8x196xf32>
    %178 = vector.broadcast %165 : vector<8x1xf32> to vector<8x196xf32>
    %179 = arith.mulf %177, %178 : vector<8x196xf32>
    %180 = arith.addf %160, %179 : vector<8x196xf32>
    %c0_90 = arith.constant 0 : index
    %c9 = arith.constant 9 : index
    %c0_91 = arith.constant 0 : index
    %181 = vector.load %arg2[%c0_90, %c9, %c0_91] : memref<1x36x196xf32, #tpu.memory_space<vmem>>, vector<1x1x196xf32>
    %182 = vector.shape_cast %181 : vector<1x1x196xf32> to vector<1x196xf32>
    %c0_92 = arith.constant 0 : index
    %c9_93 = arith.constant 9 : index
    %183 = vector.load %arg3[%c0_92, %c9_93] : memref<8x36xf32, #tpu.memory_space<vmem>>, vector<8x1xf32>
    %c0_94 = arith.constant 0 : index
    %c9_95 = arith.constant 9 : index
    %184 = vector.load %arg4[%c0_94, %c9_95] : memref<8x36xf32, #tpu.memory_space<vmem>>, vector<8x1xf32>
    %c0_96 = arith.constant 0 : index
    %c9_97 = arith.constant 9 : index
    %185 = vector.load %arg5[%c0_96, %c9_97] : memref<8x36xf32, #tpu.memory_space<vmem>>, vector<8x1xf32>
    %186 = vector.broadcast %182 : vector<1x196xf32> to vector<8x196xf32>
    %187 = vector.broadcast %184 : vector<8x1xf32> to vector<8x196xf32>
    %188 = arith.subf %186, %187 : vector<8x196xf32>
    %189 = vector.broadcast %183 : vector<8x1xf32> to vector<8x196xf32>
    %190 = arith.mulf %188, %189 : vector<8x196xf32>
    %191 = arith.mulf %190, %190 : vector<8x196xf32>
    %cst_98 = arith.constant 1.000000e+00 : f32
    %192 = vector.broadcast %cst_98 : f32 to vector<8x196xf32>
    %193 = arith.subf %191, %192 : vector<8x196xf32>
    %cst_99 = arith.constant -5.000000e-01 : f32
    %194 = vector.broadcast %cst_99 : f32 to vector<8x196xf32>
    %195 = arith.mulf %194, %191 : vector<8x196xf32>
    %196 = math.exp %195 : vector<8x196xf32>
    %197 = arith.mulf %193, %196 : vector<8x196xf32>
    %198 = vector.broadcast %185 : vector<8x1xf32> to vector<8x196xf32>
    %199 = arith.mulf %197, %198 : vector<8x196xf32>
    %200 = arith.addf %180, %199 : vector<8x196xf32>
    %c0_100 = arith.constant 0 : index
    %c10 = arith.constant 10 : index
    %c0_101 = arith.constant 0 : index
    %201 = vector.load %arg2[%c0_100, %c10, %c0_101] : memref<1x36x196xf32, #tpu.memory_space<vmem>>, vector<1x1x196xf32>
    %202 = vector.shape_cast %201 : vector<1x1x196xf32> to vector<1x196xf32>
    %c0_102 = arith.constant 0 : index
    %c10_103 = arith.constant 10 : index
    %203 = vector.load %arg3[%c0_102, %c10_103] : memref<8x36xf32, #tpu.memory_space<vmem>>, vector<8x1xf32>
    %c0_104 = arith.constant 0 : index
    %c10_105 = arith.constant 10 : index
    %204 = vector.load %arg4[%c0_104, %c10_105] : memref<8x36xf32, #tpu.memory_space<vmem>>, vector<8x1xf32>
    %c0_106 = arith.constant 0 : index
    %c10_107 = arith.constant 10 : index
    %205 = vector.load %arg5[%c0_106, %c10_107] : memref<8x36xf32, #tpu.memory_space<vmem>>, vector<8x1xf32>
    %206 = vector.broadcast %202 : vector<1x196xf32> to vector<8x196xf32>
    %207 = vector.broadcast %204 : vector<8x1xf32> to vector<8x196xf32>
    %208 = arith.subf %206, %207 : vector<8x196xf32>
    %209 = vector.broadcast %203 : vector<8x1xf32> to vector<8x196xf32>
    %210 = arith.mulf %208, %209 : vector<8x196xf32>
    %211 = arith.mulf %210, %210 : vector<8x196xf32>
    %cst_108 = arith.constant 1.000000e+00 : f32
    %212 = vector.broadcast %cst_108 : f32 to vector<8x196xf32>
    %213 = arith.subf %211, %212 : vector<8x196xf32>
    %cst_109 = arith.constant -5.000000e-01 : f32
    %214 = vector.broadcast %cst_109 : f32 to vector<8x196xf32>
    %215 = arith.mulf %214, %211 : vector<8x196xf32>
    %216 = math.exp %215 : vector<8x196xf32>
    %217 = arith.mulf %213, %216 : vector<8x196xf32>
    %218 = vector.broadcast %205 : vector<8x1xf32> to vector<8x196xf32>
    %219 = arith.mulf %217, %218 : vector<8x196xf32>
    %220 = arith.addf %200, %219 : vector<8x196xf32>
    %c0_110 = arith.constant 0 : index
    %c11 = arith.constant 11 : index
    %c0_111 = arith.constant 0 : index
    %221 = vector.load %arg2[%c0_110, %c11, %c0_111] : memref<1x36x196xf32, #tpu.memory_space<vmem>>, vector<1x1x196xf32>
    %222 = vector.shape_cast %221 : vector<1x1x196xf32> to vector<1x196xf32>
    %c0_112 = arith.constant 0 : index
    %c11_113 = arith.constant 11 : index
    %223 = vector.load %arg3[%c0_112, %c11_113] : memref<8x36xf32, #tpu.memory_space<vmem>>, vector<8x1xf32>
    %c0_114 = arith.constant 0 : index
    %c11_115 = arith.constant 11 : index
    %224 = vector.load %arg4[%c0_114, %c11_115] : memref<8x36xf32, #tpu.memory_space<vmem>>, vector<8x1xf32>
    %c0_116 = arith.constant 0 : index
    %c11_117 = arith.constant 11 : index
    %225 = vector.load %arg5[%c0_116, %c11_117] : memref<8x36xf32, #tpu.memory_space<vmem>>, vector<8x1xf32>
    %226 = vector.broadcast %222 : vector<1x196xf32> to vector<8x196xf32>
    %227 = vector.broadcast %224 : vector<8x1xf32> to vector<8x196xf32>
    %228 = arith.subf %226, %227 : vector<8x196xf32>
    %229 = vector.broadcast %223 : vector<8x1xf32> to vector<8x196xf32>
    %230 = arith.mulf %228, %229 : vector<8x196xf32>
    %231 = arith.mulf %230, %230 : vector<8x196xf32>
    %cst_118 = arith.constant 1.000000e+00 : f32
    %232 = vector.broadcast %cst_118 : f32 to vector<8x196xf32>
    %233 = arith.subf %231, %232 : vector<8x196xf32>
    %cst_119 = arith.constant -5.000000e-01 : f32
    %234 = vector.broadcast %cst_119 : f32 to vector<8x196xf32>
    %235 = arith.mulf %234, %231 : vector<8x196xf32>
    %236 = math.exp %235 : vector<8x196xf32>
    %237 = arith.mulf %233, %236 : vector<8x196xf32>
    %238 = vector.broadcast %225 : vector<8x1xf32> to vector<8x196xf32>
    %239 = arith.mulf %237, %238 : vector<8x196xf32>
    %240 = arith.addf %220, %239 : vector<8x196xf32>
    %c0_120 = arith.constant 0 : index
    %c12 = arith.constant 12 : index
    %c0_121 = arith.constant 0 : index
    %241 = vector.load %arg2[%c0_120, %c12, %c0_121] : memref<1x36x196xf32, #tpu.memory_space<vmem>>, vector<1x1x196xf32>
    %242 = vector.shape_cast %241 : vector<1x1x196xf32> to vector<1x196xf32>
    %c0_122 = arith.constant 0 : index
    %c12_123 = arith.constant 12 : index
    %243 = vector.load %arg3[%c0_122, %c12_123] : memref<8x36xf32, #tpu.memory_space<vmem>>, vector<8x1xf32>
    %c0_124 = arith.constant 0 : index
    %c12_125 = arith.constant 12 : index
    %244 = vector.load %arg4[%c0_124, %c12_125] : memref<8x36xf32, #tpu.memory_space<vmem>>, vector<8x1xf32>
    %c0_126 = arith.constant 0 : index
    %c12_127 = arith.constant 12 : index
    %245 = vector.load %arg5[%c0_126, %c12_127] : memref<8x36xf32, #tpu.memory_space<vmem>>, vector<8x1xf32>
    %246 = vector.broadcast %242 : vector<1x196xf32> to vector<8x196xf32>
    %247 = vector.broadcast %244 : vector<8x1xf32> to vector<8x196xf32>
    %248 = arith.subf %246, %247 : vector<8x196xf32>
    %249 = vector.broadcast %243 : vector<8x1xf32> to vector<8x196xf32>
    %250 = arith.mulf %248, %249 : vector<8x196xf32>
    %251 = arith.mulf %250, %250 : vector<8x196xf32>
    %cst_128 = arith.constant 1.000000e+00 : f32
    %252 = vector.broadcast %cst_128 : f32 to vector<8x196xf32>
    %253 = arith.subf %251, %252 : vector<8x196xf32>
    %cst_129 = arith.constant -5.000000e-01 : f32
    %254 = vector.broadcast %cst_129 : f32 to vector<8x196xf32>
    %255 = arith.mulf %254, %251 : vector<8x196xf32>
    %256 = math.exp %255 : vector<8x196xf32>
    %257 = arith.mulf %253, %256 : vector<8x196xf32>
    %258 = vector.broadcast %245 : vector<8x1xf32> to vector<8x196xf32>
    %259 = arith.mulf %257, %258 : vector<8x196xf32>
    %260 = arith.addf %240, %259 : vector<8x196xf32>
    %c0_130 = arith.constant 0 : index
    %c13 = arith.constant 13 : index
    %c0_131 = arith.constant 0 : index
    %261 = vector.load %arg2[%c0_130, %c13, %c0_131] : memref<1x36x196xf32, #tpu.memory_space<vmem>>, vector<1x1x196xf32>
    %262 = vector.shape_cast %261 : vector<1x1x196xf32> to vector<1x196xf32>
    %c0_132 = arith.constant 0 : index
    %c13_133 = arith.constant 13 : index
    %263 = vector.load %arg3[%c0_132, %c13_133] : memref<8x36xf32, #tpu.memory_space<vmem>>, vector<8x1xf32>
    %c0_134 = arith.constant 0 : index
    %c13_135 = arith.constant 13 : index
    %264 = vector.load %arg4[%c0_134, %c13_135] : memref<8x36xf32, #tpu.memory_space<vmem>>, vector<8x1xf32>
    %c0_136 = arith.constant 0 : index
    %c13_137 = arith.constant 13 : index
    %265 = vector.load %arg5[%c0_136, %c13_137] : memref<8x36xf32, #tpu.memory_space<vmem>>, vector<8x1xf32>
    %266 = vector.broadcast %262 : vector<1x196xf32> to vector<8x196xf32>
    %267 = vector.broadcast %264 : vector<8x1xf32> to vector<8x196xf32>
    %268 = arith.subf %266, %267 : vector<8x196xf32>
    %269 = vector.broadcast %263 : vector<8x1xf32> to vector<8x196xf32>
    %270 = arith.mulf %268, %269 : vector<8x196xf32>
    %271 = arith.mulf %270, %270 : vector<8x196xf32>
    %cst_138 = arith.constant 1.000000e+00 : f32
    %272 = vector.broadcast %cst_138 : f32 to vector<8x196xf32>
    %273 = arith.subf %271, %272 : vector<8x196xf32>
    %cst_139 = arith.constant -5.000000e-01 : f32
    %274 = vector.broadcast %cst_139 : f32 to vector<8x196xf32>
    %275 = arith.mulf %274, %271 : vector<8x196xf32>
    %276 = math.exp %275 : vector<8x196xf32>
    %277 = arith.mulf %273, %276 : vector<8x196xf32>
    %278 = vector.broadcast %265 : vector<8x1xf32> to vector<8x196xf32>
    %279 = arith.mulf %277, %278 : vector<8x196xf32>
    %280 = arith.addf %260, %279 : vector<8x196xf32>
    %c0_140 = arith.constant 0 : index
    %c14 = arith.constant 14 : index
    %c0_141 = arith.constant 0 : index
    %281 = vector.load %arg2[%c0_140, %c14, %c0_141] : memref<1x36x196xf32, #tpu.memory_space<vmem>>, vector<1x1x196xf32>
    %282 = vector.shape_cast %281 : vector<1x1x196xf32> to vector<1x196xf32>
    %c0_142 = arith.constant 0 : index
    %c14_143 = arith.constant 14 : index
    %283 = vector.load %arg3[%c0_142, %c14_143] : memref<8x36xf32, #tpu.memory_space<vmem>>, vector<8x1xf32>
    %c0_144 = arith.constant 0 : index
    %c14_145 = arith.constant 14 : index
    %284 = vector.load %arg4[%c0_144, %c14_145] : memref<8x36xf32, #tpu.memory_space<vmem>>, vector<8x1xf32>
    %c0_146 = arith.constant 0 : index
    %c14_147 = arith.constant 14 : index
    %285 = vector.load %arg5[%c0_146, %c14_147] : memref<8x36xf32, #tpu.memory_space<vmem>>, vector<8x1xf32>
    %286 = vector.broadcast %282 : vector<1x196xf32> to vector<8x196xf32>
    %287 = vector.broadcast %284 : vector<8x1xf32> to vector<8x196xf32>
    %288 = arith.subf %286, %287 : vector<8x196xf32>
    %289 = vector.broadcast %283 : vector<8x1xf32> to vector<8x196xf32>
    %290 = arith.mulf %288, %289 : vector<8x196xf32>
    %291 = arith.mulf %290, %290 : vector<8x196xf32>
    %cst_148 = arith.constant 1.000000e+00 : f32
    %292 = vector.broadcast %cst_148 : f32 to vector<8x196xf32>
    %293 = arith.subf %291, %292 : vector<8x196xf32>
    %cst_149 = arith.constant -5.000000e-01 : f32
    %294 = vector.broadcast %cst_149 : f32 to vector<8x196xf32>
    %295 = arith.mulf %294, %291 : vector<8x196xf32>
    %296 = math.exp %295 : vector<8x196xf32>
    %297 = arith.mulf %293, %296 : vector<8x196xf32>
    %298 = vector.broadcast %285 : vector<8x1xf32> to vector<8x196xf32>
    %299 = arith.mulf %297, %298 : vector<8x196xf32>
    %300 = arith.addf %280, %299 : vector<8x196xf32>
    %c0_150 = arith.constant 0 : index
    %c15 = arith.constant 15 : index
    %c0_151 = arith.constant 0 : index
    %301 = vector.load %arg2[%c0_150, %c15, %c0_151] : memref<1x36x196xf32, #tpu.memory_space<vmem>>, vector<1x1x196xf32>
    %302 = vector.shape_cast %301 : vector<1x1x196xf32> to vector<1x196xf32>
    %c0_152 = arith.constant 0 : index
    %c15_153 = arith.constant 15 : index
    %303 = vector.load %arg3[%c0_152, %c15_153] : memref<8x36xf32, #tpu.memory_space<vmem>>, vector<8x1xf32>
    %c0_154 = arith.constant 0 : index
    %c15_155 = arith.constant 15 : index
    %304 = vector.load %arg4[%c0_154, %c15_155] : memref<8x36xf32, #tpu.memory_space<vmem>>, vector<8x1xf32>
    %c0_156 = arith.constant 0 : index
    %c15_157 = arith.constant 15 : index
    %305 = vector.load %arg5[%c0_156, %c15_157] : memref<8x36xf32, #tpu.memory_space<vmem>>, vector<8x1xf32>
    %306 = vector.broadcast %302 : vector<1x196xf32> to vector<8x196xf32>
    %307 = vector.broadcast %304 : vector<8x1xf32> to vector<8x196xf32>
    %308 = arith.subf %306, %307 : vector<8x196xf32>
    %309 = vector.broadcast %303 : vector<8x1xf32> to vector<8x196xf32>
    %310 = arith.mulf %308, %309 : vector<8x196xf32>
    %311 = arith.mulf %310, %310 : vector<8x196xf32>
    %cst_158 = arith.constant 1.000000e+00 : f32
    %312 = vector.broadcast %cst_158 : f32 to vector<8x196xf32>
    %313 = arith.subf %311, %312 : vector<8x196xf32>
    %cst_159 = arith.constant -5.000000e-01 : f32
    %314 = vector.broadcast %cst_159 : f32 to vector<8x196xf32>
    %315 = arith.mulf %314, %311 : vector<8x196xf32>
    %316 = math.exp %315 : vector<8x196xf32>
    %317 = arith.mulf %313, %316 : vector<8x196xf32>
    %318 = vector.broadcast %305 : vector<8x1xf32> to vector<8x196xf32>
    %319 = arith.mulf %317, %318 : vector<8x196xf32>
    %320 = arith.addf %300, %319 : vector<8x196xf32>
    %c0_160 = arith.constant 0 : index
    %c16 = arith.constant 16 : index
    %c0_161 = arith.constant 0 : index
    %321 = vector.load %arg2[%c0_160, %c16, %c0_161] : memref<1x36x196xf32, #tpu.memory_space<vmem>>, vector<1x1x196xf32>
    %322 = vector.shape_cast %321 : vector<1x1x196xf32> to vector<1x196xf32>
    %c0_162 = arith.constant 0 : index
    %c16_163 = arith.constant 16 : index
    %323 = vector.load %arg3[%c0_162, %c16_163] : memref<8x36xf32, #tpu.memory_space<vmem>>, vector<8x1xf32>
    %c0_164 = arith.constant 0 : index
    %c16_165 = arith.constant 16 : index
    %324 = vector.load %arg4[%c0_164, %c16_165] : memref<8x36xf32, #tpu.memory_space<vmem>>, vector<8x1xf32>
    %c0_166 = arith.constant 0 : index
    %c16_167 = arith.constant 16 : index
    %325 = vector.load %arg5[%c0_166, %c16_167] : memref<8x36xf32, #tpu.memory_space<vmem>>, vector<8x1xf32>
    %326 = vector.broadcast %322 : vector<1x196xf32> to vector<8x196xf32>
    %327 = vector.broadcast %324 : vector<8x1xf32> to vector<8x196xf32>
    %328 = arith.subf %326, %327 : vector<8x196xf32>
    %329 = vector.broadcast %323 : vector<8x1xf32> to vector<8x196xf32>
    %330 = arith.mulf %328, %329 : vector<8x196xf32>
    %331 = arith.mulf %330, %330 : vector<8x196xf32>
    %cst_168 = arith.constant 1.000000e+00 : f32
    %332 = vector.broadcast %cst_168 : f32 to vector<8x196xf32>
    %333 = arith.subf %331, %332 : vector<8x196xf32>
    %cst_169 = arith.constant -5.000000e-01 : f32
    %334 = vector.broadcast %cst_169 : f32 to vector<8x196xf32>
    %335 = arith.mulf %334, %331 : vector<8x196xf32>
    %336 = math.exp %335 : vector<8x196xf32>
    %337 = arith.mulf %333, %336 : vector<8x196xf32>
    %338 = vector.broadcast %325 : vector<8x1xf32> to vector<8x196xf32>
    %339 = arith.mulf %337, %338 : vector<8x196xf32>
    %340 = arith.addf %320, %339 : vector<8x196xf32>
    %c0_170 = arith.constant 0 : index
    %c17 = arith.constant 17 : index
    %c0_171 = arith.constant 0 : index
    %341 = vector.load %arg2[%c0_170, %c17, %c0_171] : memref<1x36x196xf32, #tpu.memory_space<vmem>>, vector<1x1x196xf32>
    %342 = vector.shape_cast %341 : vector<1x1x196xf32> to vector<1x196xf32>
    %c0_172 = arith.constant 0 : index
    %c17_173 = arith.constant 17 : index
    %343 = vector.load %arg3[%c0_172, %c17_173] : memref<8x36xf32, #tpu.memory_space<vmem>>, vector<8x1xf32>
    %c0_174 = arith.constant 0 : index
    %c17_175 = arith.constant 17 : index
    %344 = vector.load %arg4[%c0_174, %c17_175] : memref<8x36xf32, #tpu.memory_space<vmem>>, vector<8x1xf32>
    %c0_176 = arith.constant 0 : index
    %c17_177 = arith.constant 17 : index
    %345 = vector.load %arg5[%c0_176, %c17_177] : memref<8x36xf32, #tpu.memory_space<vmem>>, vector<8x1xf32>
    %346 = vector.broadcast %342 : vector<1x196xf32> to vector<8x196xf32>
    %347 = vector.broadcast %344 : vector<8x1xf32> to vector<8x196xf32>
    %348 = arith.subf %346, %347 : vector<8x196xf32>
    %349 = vector.broadcast %343 : vector<8x1xf32> to vector<8x196xf32>
    %350 = arith.mulf %348, %349 : vector<8x196xf32>
    %351 = arith.mulf %350, %350 : vector<8x196xf32>
    %cst_178 = arith.constant 1.000000e+00 : f32
    %352 = vector.broadcast %cst_178 : f32 to vector<8x196xf32>
    %353 = arith.subf %351, %352 : vector<8x196xf32>
    %cst_179 = arith.constant -5.000000e-01 : f32
    %354 = vector.broadcast %cst_179 : f32 to vector<8x196xf32>
    %355 = arith.mulf %354, %351 : vector<8x196xf32>
    %356 = math.exp %355 : vector<8x196xf32>
    %357 = arith.mulf %353, %356 : vector<8x196xf32>
    %358 = vector.broadcast %345 : vector<8x1xf32> to vector<8x196xf32>
    %359 = arith.mulf %357, %358 : vector<8x196xf32>
    %360 = arith.addf %340, %359 : vector<8x196xf32>
    %c0_180 = arith.constant 0 : index
    %c18 = arith.constant 18 : index
    %c0_181 = arith.constant 0 : index
    %361 = vector.load %arg2[%c0_180, %c18, %c0_181] : memref<1x36x196xf32, #tpu.memory_space<vmem>>, vector<1x1x196xf32>
    %362 = vector.shape_cast %361 : vector<1x1x196xf32> to vector<1x196xf32>
    %c0_182 = arith.constant 0 : index
    %c18_183 = arith.constant 18 : index
    %363 = vector.load %arg3[%c0_182, %c18_183] : memref<8x36xf32, #tpu.memory_space<vmem>>, vector<8x1xf32>
    %c0_184 = arith.constant 0 : index
    %c18_185 = arith.constant 18 : index
    %364 = vector.load %arg4[%c0_184, %c18_185] : memref<8x36xf32, #tpu.memory_space<vmem>>, vector<8x1xf32>
    %c0_186 = arith.constant 0 : index
    %c18_187 = arith.constant 18 : index
    %365 = vector.load %arg5[%c0_186, %c18_187] : memref<8x36xf32, #tpu.memory_space<vmem>>, vector<8x1xf32>
    %366 = vector.broadcast %362 : vector<1x196xf32> to vector<8x196xf32>
    %367 = vector.broadcast %364 : vector<8x1xf32> to vector<8x196xf32>
    %368 = arith.subf %366, %367 : vector<8x196xf32>
    %369 = vector.broadcast %363 : vector<8x1xf32> to vector<8x196xf32>
    %370 = arith.mulf %368, %369 : vector<8x196xf32>
    %371 = arith.mulf %370, %370 : vector<8x196xf32>
    %cst_188 = arith.constant 1.000000e+00 : f32
    %372 = vector.broadcast %cst_188 : f32 to vector<8x196xf32>
    %373 = arith.subf %371, %372 : vector<8x196xf32>
    %cst_189 = arith.constant -5.000000e-01 : f32
    %374 = vector.broadcast %cst_189 : f32 to vector<8x196xf32>
    %375 = arith.mulf %374, %371 : vector<8x196xf32>
    %376 = math.exp %375 : vector<8x196xf32>
    %377 = arith.mulf %373, %376 : vector<8x196xf32>
    %378 = vector.broadcast %365 : vector<8x1xf32> to vector<8x196xf32>
    %379 = arith.mulf %377, %378 : vector<8x196xf32>
    %380 = arith.addf %360, %379 : vector<8x196xf32>
    %c0_190 = arith.constant 0 : index
    %c19 = arith.constant 19 : index
    %c0_191 = arith.constant 0 : index
    %381 = vector.load %arg2[%c0_190, %c19, %c0_191] : memref<1x36x196xf32, #tpu.memory_space<vmem>>, vector<1x1x196xf32>
    %382 = vector.shape_cast %381 : vector<1x1x196xf32> to vector<1x196xf32>
    %c0_192 = arith.constant 0 : index
    %c19_193 = arith.constant 19 : index
    %383 = vector.load %arg3[%c0_192, %c19_193] : memref<8x36xf32, #tpu.memory_space<vmem>>, vector<8x1xf32>
    %c0_194 = arith.constant 0 : index
    %c19_195 = arith.constant 19 : index
    %384 = vector.load %arg4[%c0_194, %c19_195] : memref<8x36xf32, #tpu.memory_space<vmem>>, vector<8x1xf32>
    %c0_196 = arith.constant 0 : index
    %c19_197 = arith.constant 19 : index
    %385 = vector.load %arg5[%c0_196, %c19_197] : memref<8x36xf32, #tpu.memory_space<vmem>>, vector<8x1xf32>
    %386 = vector.broadcast %382 : vector<1x196xf32> to vector<8x196xf32>
    %387 = vector.broadcast %384 : vector<8x1xf32> to vector<8x196xf32>
    %388 = arith.subf %386, %387 : vector<8x196xf32>
    %389 = vector.broadcast %383 : vector<8x1xf32> to vector<8x196xf32>
    %390 = arith.mulf %388, %389 : vector<8x196xf32>
    %391 = arith.mulf %390, %390 : vector<8x196xf32>
    %cst_198 = arith.constant 1.000000e+00 : f32
    %392 = vector.broadcast %cst_198 : f32 to vector<8x196xf32>
    %393 = arith.subf %391, %392 : vector<8x196xf32>
    %cst_199 = arith.constant -5.000000e-01 : f32
    %394 = vector.broadcast %cst_199 : f32 to vector<8x196xf32>
    %395 = arith.mulf %394, %391 : vector<8x196xf32>
    %396 = math.exp %395 : vector<8x196xf32>
    %397 = arith.mulf %393, %396 : vector<8x196xf32>
    %398 = vector.broadcast %385 : vector<8x1xf32> to vector<8x196xf32>
    %399 = arith.mulf %397, %398 : vector<8x196xf32>
    %400 = arith.addf %380, %399 : vector<8x196xf32>
    %c0_200 = arith.constant 0 : index
    %c20 = arith.constant 20 : index
    %c0_201 = arith.constant 0 : index
    %401 = vector.load %arg2[%c0_200, %c20, %c0_201] : memref<1x36x196xf32, #tpu.memory_space<vmem>>, vector<1x1x196xf32>
    %402 = vector.shape_cast %401 : vector<1x1x196xf32> to vector<1x196xf32>
    %c0_202 = arith.constant 0 : index
    %c20_203 = arith.constant 20 : index
    %403 = vector.load %arg3[%c0_202, %c20_203] : memref<8x36xf32, #tpu.memory_space<vmem>>, vector<8x1xf32>
    %c0_204 = arith.constant 0 : index
    %c20_205 = arith.constant 20 : index
    %404 = vector.load %arg4[%c0_204, %c20_205] : memref<8x36xf32, #tpu.memory_space<vmem>>, vector<8x1xf32>
    %c0_206 = arith.constant 0 : index
    %c20_207 = arith.constant 20 : index
    %405 = vector.load %arg5[%c0_206, %c20_207] : memref<8x36xf32, #tpu.memory_space<vmem>>, vector<8x1xf32>
    %406 = vector.broadcast %402 : vector<1x196xf32> to vector<8x196xf32>
    %407 = vector.broadcast %404 : vector<8x1xf32> to vector<8x196xf32>
    %408 = arith.subf %406, %407 : vector<8x196xf32>
    %409 = vector.broadcast %403 : vector<8x1xf32> to vector<8x196xf32>
    %410 = arith.mulf %408, %409 : vector<8x196xf32>
    %411 = arith.mulf %410, %410 : vector<8x196xf32>
    %cst_208 = arith.constant 1.000000e+00 : f32
    %412 = vector.broadcast %cst_208 : f32 to vector<8x196xf32>
    %413 = arith.subf %411, %412 : vector<8x196xf32>
    %cst_209 = arith.constant -5.000000e-01 : f32
    %414 = vector.broadcast %cst_209 : f32 to vector<8x196xf32>
    %415 = arith.mulf %414, %411 : vector<8x196xf32>
    %416 = math.exp %415 : vector<8x196xf32>
    %417 = arith.mulf %413, %416 : vector<8x196xf32>
    %418 = vector.broadcast %405 : vector<8x1xf32> to vector<8x196xf32>
    %419 = arith.mulf %417, %418 : vector<8x196xf32>
    %420 = arith.addf %400, %419 : vector<8x196xf32>
    %c0_210 = arith.constant 0 : index
    %c21 = arith.constant 21 : index
    %c0_211 = arith.constant 0 : index
    %421 = vector.load %arg2[%c0_210, %c21, %c0_211] : memref<1x36x196xf32, #tpu.memory_space<vmem>>, vector<1x1x196xf32>
    %422 = vector.shape_cast %421 : vector<1x1x196xf32> to vector<1x196xf32>
    %c0_212 = arith.constant 0 : index
    %c21_213 = arith.constant 21 : index
    %423 = vector.load %arg3[%c0_212, %c21_213] : memref<8x36xf32, #tpu.memory_space<vmem>>, vector<8x1xf32>
    %c0_214 = arith.constant 0 : index
    %c21_215 = arith.constant 21 : index
    %424 = vector.load %arg4[%c0_214, %c21_215] : memref<8x36xf32, #tpu.memory_space<vmem>>, vector<8x1xf32>
    %c0_216 = arith.constant 0 : index
    %c21_217 = arith.constant 21 : index
    %425 = vector.load %arg5[%c0_216, %c21_217] : memref<8x36xf32, #tpu.memory_space<vmem>>, vector<8x1xf32>
    %426 = vector.broadcast %422 : vector<1x196xf32> to vector<8x196xf32>
    %427 = vector.broadcast %424 : vector<8x1xf32> to vector<8x196xf32>
    %428 = arith.subf %426, %427 : vector<8x196xf32>
    %429 = vector.broadcast %423 : vector<8x1xf32> to vector<8x196xf32>
    %430 = arith.mulf %428, %429 : vector<8x196xf32>
    %431 = arith.mulf %430, %430 : vector<8x196xf32>
    %cst_218 = arith.constant 1.000000e+00 : f32
    %432 = vector.broadcast %cst_218 : f32 to vector<8x196xf32>
    %433 = arith.subf %431, %432 : vector<8x196xf32>
    %cst_219 = arith.constant -5.000000e-01 : f32
    %434 = vector.broadcast %cst_219 : f32 to vector<8x196xf32>
    %435 = arith.mulf %434, %431 : vector<8x196xf32>
    %436 = math.exp %435 : vector<8x196xf32>
    %437 = arith.mulf %433, %436 : vector<8x196xf32>
    %438 = vector.broadcast %425 : vector<8x1xf32> to vector<8x196xf32>
    %439 = arith.mulf %437, %438 : vector<8x196xf32>
    %440 = arith.addf %420, %439 : vector<8x196xf32>
    %c0_220 = arith.constant 0 : index
    %c22 = arith.constant 22 : index
    %c0_221 = arith.constant 0 : index
    %441 = vector.load %arg2[%c0_220, %c22, %c0_221] : memref<1x36x196xf32, #tpu.memory_space<vmem>>, vector<1x1x196xf32>
    %442 = vector.shape_cast %441 : vector<1x1x196xf32> to vector<1x196xf32>
    %c0_222 = arith.constant 0 : index
    %c22_223 = arith.constant 22 : index
    %443 = vector.load %arg3[%c0_222, %c22_223] : memref<8x36xf32, #tpu.memory_space<vmem>>, vector<8x1xf32>
    %c0_224 = arith.constant 0 : index
    %c22_225 = arith.constant 22 : index
    %444 = vector.load %arg4[%c0_224, %c22_225] : memref<8x36xf32, #tpu.memory_space<vmem>>, vector<8x1xf32>
    %c0_226 = arith.constant 0 : index
    %c22_227 = arith.constant 22 : index
    %445 = vector.load %arg5[%c0_226, %c22_227] : memref<8x36xf32, #tpu.memory_space<vmem>>, vector<8x1xf32>
    %446 = vector.broadcast %442 : vector<1x196xf32> to vector<8x196xf32>
    %447 = vector.broadcast %444 : vector<8x1xf32> to vector<8x196xf32>
    %448 = arith.subf %446, %447 : vector<8x196xf32>
    %449 = vector.broadcast %443 : vector<8x1xf32> to vector<8x196xf32>
    %450 = arith.mulf %448, %449 : vector<8x196xf32>
    %451 = arith.mulf %450, %450 : vector<8x196xf32>
    %cst_228 = arith.constant 1.000000e+00 : f32
    %452 = vector.broadcast %cst_228 : f32 to vector<8x196xf32>
    %453 = arith.subf %451, %452 : vector<8x196xf32>
    %cst_229 = arith.constant -5.000000e-01 : f32
    %454 = vector.broadcast %cst_229 : f32 to vector<8x196xf32>
    %455 = arith.mulf %454, %451 : vector<8x196xf32>
    %456 = math.exp %455 : vector<8x196xf32>
    %457 = arith.mulf %453, %456 : vector<8x196xf32>
    %458 = vector.broadcast %445 : vector<8x1xf32> to vector<8x196xf32>
    %459 = arith.mulf %457, %458 : vector<8x196xf32>
    %460 = arith.addf %440, %459 : vector<8x196xf32>
    %c0_230 = arith.constant 0 : index
    %c23 = arith.constant 23 : index
    %c0_231 = arith.constant 0 : index
    %461 = vector.load %arg2[%c0_230, %c23, %c0_231] : memref<1x36x196xf32, #tpu.memory_space<vmem>>, vector<1x1x196xf32>
    %462 = vector.shape_cast %461 : vector<1x1x196xf32> to vector<1x196xf32>
    %c0_232 = arith.constant 0 : index
    %c23_233 = arith.constant 23 : index
    %463 = vector.load %arg3[%c0_232, %c23_233] : memref<8x36xf32, #tpu.memory_space<vmem>>, vector<8x1xf32>
    %c0_234 = arith.constant 0 : index
    %c23_235 = arith.constant 23 : index
    %464 = vector.load %arg4[%c0_234, %c23_235] : memref<8x36xf32, #tpu.memory_space<vmem>>, vector<8x1xf32>
    %c0_236 = arith.constant 0 : index
    %c23_237 = arith.constant 23 : index
    %465 = vector.load %arg5[%c0_236, %c23_237] : memref<8x36xf32, #tpu.memory_space<vmem>>, vector<8x1xf32>
    %466 = vector.broadcast %462 : vector<1x196xf32> to vector<8x196xf32>
    %467 = vector.broadcast %464 : vector<8x1xf32> to vector<8x196xf32>
    %468 = arith.subf %466, %467 : vector<8x196xf32>
    %469 = vector.broadcast %463 : vector<8x1xf32> to vector<8x196xf32>
    %470 = arith.mulf %468, %469 : vector<8x196xf32>
    %471 = arith.mulf %470, %470 : vector<8x196xf32>
    %cst_238 = arith.constant 1.000000e+00 : f32
    %472 = vector.broadcast %cst_238 : f32 to vector<8x196xf32>
    %473 = arith.subf %471, %472 : vector<8x196xf32>
    %cst_239 = arith.constant -5.000000e-01 : f32
    %474 = vector.broadcast %cst_239 : f32 to vector<8x196xf32>
    %475 = arith.mulf %474, %471 : vector<8x196xf32>
    %476 = math.exp %475 : vector<8x196xf32>
    %477 = arith.mulf %473, %476 : vector<8x196xf32>
    %478 = vector.broadcast %465 : vector<8x1xf32> to vector<8x196xf32>
    %479 = arith.mulf %477, %478 : vector<8x196xf32>
    %480 = arith.addf %460, %479 : vector<8x196xf32>
    %c0_240 = arith.constant 0 : index
    %c24 = arith.constant 24 : index
    %c0_241 = arith.constant 0 : index
    %481 = vector.load %arg2[%c0_240, %c24, %c0_241] : memref<1x36x196xf32, #tpu.memory_space<vmem>>, vector<1x1x196xf32>
    %482 = vector.shape_cast %481 : vector<1x1x196xf32> to vector<1x196xf32>
    %c0_242 = arith.constant 0 : index
    %c24_243 = arith.constant 24 : index
    %483 = vector.load %arg3[%c0_242, %c24_243] : memref<8x36xf32, #tpu.memory_space<vmem>>, vector<8x1xf32>
    %c0_244 = arith.constant 0 : index
    %c24_245 = arith.constant 24 : index
    %484 = vector.load %arg4[%c0_244, %c24_245] : memref<8x36xf32, #tpu.memory_space<vmem>>, vector<8x1xf32>
    %c0_246 = arith.constant 0 : index
    %c24_247 = arith.constant 24 : index
    %485 = vector.load %arg5[%c0_246, %c24_247] : memref<8x36xf32, #tpu.memory_space<vmem>>, vector<8x1xf32>
    %486 = vector.broadcast %482 : vector<1x196xf32> to vector<8x196xf32>
    %487 = vector.broadcast %484 : vector<8x1xf32> to vector<8x196xf32>
    %488 = arith.subf %486, %487 : vector<8x196xf32>
    %489 = vector.broadcast %483 : vector<8x1xf32> to vector<8x196xf32>
    %490 = arith.mulf %488, %489 : vector<8x196xf32>
    %491 = arith.mulf %490, %490 : vector<8x196xf32>
    %cst_248 = arith.constant 1.000000e+00 : f32
    %492 = vector.broadcast %cst_248 : f32 to vector<8x196xf32>
    %493 = arith.subf %491, %492 : vector<8x196xf32>
    %cst_249 = arith.constant -5.000000e-01 : f32
    %494 = vector.broadcast %cst_249 : f32 to vector<8x196xf32>
    %495 = arith.mulf %494, %491 : vector<8x196xf32>
    %496 = math.exp %495 : vector<8x196xf32>
    %497 = arith.mulf %493, %496 : vector<8x196xf32>
    %498 = vector.broadcast %485 : vector<8x1xf32> to vector<8x196xf32>
    %499 = arith.mulf %497, %498 : vector<8x196xf32>
    %500 = arith.addf %480, %499 : vector<8x196xf32>
    %c0_250 = arith.constant 0 : index
    %c25 = arith.constant 25 : index
    %c0_251 = arith.constant 0 : index
    %501 = vector.load %arg2[%c0_250, %c25, %c0_251] : memref<1x36x196xf32, #tpu.memory_space<vmem>>, vector<1x1x196xf32>
    %502 = vector.shape_cast %501 : vector<1x1x196xf32> to vector<1x196xf32>
    %c0_252 = arith.constant 0 : index
    %c25_253 = arith.constant 25 : index
    %503 = vector.load %arg3[%c0_252, %c25_253] : memref<8x36xf32, #tpu.memory_space<vmem>>, vector<8x1xf32>
    %c0_254 = arith.constant 0 : index
    %c25_255 = arith.constant 25 : index
    %504 = vector.load %arg4[%c0_254, %c25_255] : memref<8x36xf32, #tpu.memory_space<vmem>>, vector<8x1xf32>
    %c0_256 = arith.constant 0 : index
    %c25_257 = arith.constant 25 : index
    %505 = vector.load %arg5[%c0_256, %c25_257] : memref<8x36xf32, #tpu.memory_space<vmem>>, vector<8x1xf32>
    %506 = vector.broadcast %502 : vector<1x196xf32> to vector<8x196xf32>
    %507 = vector.broadcast %504 : vector<8x1xf32> to vector<8x196xf32>
    %508 = arith.subf %506, %507 : vector<8x196xf32>
    %509 = vector.broadcast %503 : vector<8x1xf32> to vector<8x196xf32>
    %510 = arith.mulf %508, %509 : vector<8x196xf32>
    %511 = arith.mulf %510, %510 : vector<8x196xf32>
    %cst_258 = arith.constant 1.000000e+00 : f32
    %512 = vector.broadcast %cst_258 : f32 to vector<8x196xf32>
    %513 = arith.subf %511, %512 : vector<8x196xf32>
    %cst_259 = arith.constant -5.000000e-01 : f32
    %514 = vector.broadcast %cst_259 : f32 to vector<8x196xf32>
    %515 = arith.mulf %514, %511 : vector<8x196xf32>
    %516 = math.exp %515 : vector<8x196xf32>
    %517 = arith.mulf %513, %516 : vector<8x196xf32>
    %518 = vector.broadcast %505 : vector<8x1xf32> to vector<8x196xf32>
    %519 = arith.mulf %517, %518 : vector<8x196xf32>
    %520 = arith.addf %500, %519 : vector<8x196xf32>
    %c0_260 = arith.constant 0 : index
    %c26 = arith.constant 26 : index
    %c0_261 = arith.constant 0 : index
    %521 = vector.load %arg2[%c0_260, %c26, %c0_261] : memref<1x36x196xf32, #tpu.memory_space<vmem>>, vector<1x1x196xf32>
    %522 = vector.shape_cast %521 : vector<1x1x196xf32> to vector<1x196xf32>
    %c0_262 = arith.constant 0 : index
    %c26_263 = arith.constant 26 : index
    %523 = vector.load %arg3[%c0_262, %c26_263] : memref<8x36xf32, #tpu.memory_space<vmem>>, vector<8x1xf32>
    %c0_264 = arith.constant 0 : index
    %c26_265 = arith.constant 26 : index
    %524 = vector.load %arg4[%c0_264, %c26_265] : memref<8x36xf32, #tpu.memory_space<vmem>>, vector<8x1xf32>
    %c0_266 = arith.constant 0 : index
    %c26_267 = arith.constant 26 : index
    %525 = vector.load %arg5[%c0_266, %c26_267] : memref<8x36xf32, #tpu.memory_space<vmem>>, vector<8x1xf32>
    %526 = vector.broadcast %522 : vector<1x196xf32> to vector<8x196xf32>
    %527 = vector.broadcast %524 : vector<8x1xf32> to vector<8x196xf32>
    %528 = arith.subf %526, %527 : vector<8x196xf32>
    %529 = vector.broadcast %523 : vector<8x1xf32> to vector<8x196xf32>
    %530 = arith.mulf %528, %529 : vector<8x196xf32>
    %531 = arith.mulf %530, %530 : vector<8x196xf32>
    %cst_268 = arith.constant 1.000000e+00 : f32
    %532 = vector.broadcast %cst_268 : f32 to vector<8x196xf32>
    %533 = arith.subf %531, %532 : vector<8x196xf32>
    %cst_269 = arith.constant -5.000000e-01 : f32
    %534 = vector.broadcast %cst_269 : f32 to vector<8x196xf32>
    %535 = arith.mulf %534, %531 : vector<8x196xf32>
    %536 = math.exp %535 : vector<8x196xf32>
    %537 = arith.mulf %533, %536 : vector<8x196xf32>
    %538 = vector.broadcast %525 : vector<8x1xf32> to vector<8x196xf32>
    %539 = arith.mulf %537, %538 : vector<8x196xf32>
    %540 = arith.addf %520, %539 : vector<8x196xf32>
    %c0_270 = arith.constant 0 : index
    %c27 = arith.constant 27 : index
    %c0_271 = arith.constant 0 : index
    %541 = vector.load %arg2[%c0_270, %c27, %c0_271] : memref<1x36x196xf32, #tpu.memory_space<vmem>>, vector<1x1x196xf32>
    %542 = vector.shape_cast %541 : vector<1x1x196xf32> to vector<1x196xf32>
    %c0_272 = arith.constant 0 : index
    %c27_273 = arith.constant 27 : index
    %543 = vector.load %arg3[%c0_272, %c27_273] : memref<8x36xf32, #tpu.memory_space<vmem>>, vector<8x1xf32>
    %c0_274 = arith.constant 0 : index
    %c27_275 = arith.constant 27 : index
    %544 = vector.load %arg4[%c0_274, %c27_275] : memref<8x36xf32, #tpu.memory_space<vmem>>, vector<8x1xf32>
    %c0_276 = arith.constant 0 : index
    %c27_277 = arith.constant 27 : index
    %545 = vector.load %arg5[%c0_276, %c27_277] : memref<8x36xf32, #tpu.memory_space<vmem>>, vector<8x1xf32>
    %546 = vector.broadcast %542 : vector<1x196xf32> to vector<8x196xf32>
    %547 = vector.broadcast %544 : vector<8x1xf32> to vector<8x196xf32>
    %548 = arith.subf %546, %547 : vector<8x196xf32>
    %549 = vector.broadcast %543 : vector<8x1xf32> to vector<8x196xf32>
    %550 = arith.mulf %548, %549 : vector<8x196xf32>
    %551 = arith.mulf %550, %550 : vector<8x196xf32>
    %cst_278 = arith.constant 1.000000e+00 : f32
    %552 = vector.broadcast %cst_278 : f32 to vector<8x196xf32>
    %553 = arith.subf %551, %552 : vector<8x196xf32>
    %cst_279 = arith.constant -5.000000e-01 : f32
    %554 = vector.broadcast %cst_279 : f32 to vector<8x196xf32>
    %555 = arith.mulf %554, %551 : vector<8x196xf32>
    %556 = math.exp %555 : vector<8x196xf32>
    %557 = arith.mulf %553, %556 : vector<8x196xf32>
    %558 = vector.broadcast %545 : vector<8x1xf32> to vector<8x196xf32>
    %559 = arith.mulf %557, %558 : vector<8x196xf32>
    %560 = arith.addf %540, %559 : vector<8x196xf32>
    %c0_280 = arith.constant 0 : index
    %c28 = arith.constant 28 : index
    %c0_281 = arith.constant 0 : index
    %561 = vector.load %arg2[%c0_280, %c28, %c0_281] : memref<1x36x196xf32, #tpu.memory_space<vmem>>, vector<1x1x196xf32>
    %562 = vector.shape_cast %561 : vector<1x1x196xf32> to vector<1x196xf32>
    %c0_282 = arith.constant 0 : index
    %c28_283 = arith.constant 28 : index
    %563 = vector.load %arg3[%c0_282, %c28_283] : memref<8x36xf32, #tpu.memory_space<vmem>>, vector<8x1xf32>
    %c0_284 = arith.constant 0 : index
    %c28_285 = arith.constant 28 : index
    %564 = vector.load %arg4[%c0_284, %c28_285] : memref<8x36xf32, #tpu.memory_space<vmem>>, vector<8x1xf32>
    %c0_286 = arith.constant 0 : index
    %c28_287 = arith.constant 28 : index
    %565 = vector.load %arg5[%c0_286, %c28_287] : memref<8x36xf32, #tpu.memory_space<vmem>>, vector<8x1xf32>
    %566 = vector.broadcast %562 : vector<1x196xf32> to vector<8x196xf32>
    %567 = vector.broadcast %564 : vector<8x1xf32> to vector<8x196xf32>
    %568 = arith.subf %566, %567 : vector<8x196xf32>
    %569 = vector.broadcast %563 : vector<8x1xf32> to vector<8x196xf32>
    %570 = arith.mulf %568, %569 : vector<8x196xf32>
    %571 = arith.mulf %570, %570 : vector<8x196xf32>
    %cst_288 = arith.constant 1.000000e+00 : f32
    %572 = vector.broadcast %cst_288 : f32 to vector<8x196xf32>
    %573 = arith.subf %571, %572 : vector<8x196xf32>
    %cst_289 = arith.constant -5.000000e-01 : f32
    %574 = vector.broadcast %cst_289 : f32 to vector<8x196xf32>
    %575 = arith.mulf %574, %571 : vector<8x196xf32>
    %576 = math.exp %575 : vector<8x196xf32>
    %577 = arith.mulf %573, %576 : vector<8x196xf32>
    %578 = vector.broadcast %565 : vector<8x1xf32> to vector<8x196xf32>
    %579 = arith.mulf %577, %578 : vector<8x196xf32>
    %580 = arith.addf %560, %579 : vector<8x196xf32>
    %c0_290 = arith.constant 0 : index
    %c29 = arith.constant 29 : index
    %c0_291 = arith.constant 0 : index
    %581 = vector.load %arg2[%c0_290, %c29, %c0_291] : memref<1x36x196xf32, #tpu.memory_space<vmem>>, vector<1x1x196xf32>
    %582 = vector.shape_cast %581 : vector<1x1x196xf32> to vector<1x196xf32>
    %c0_292 = arith.constant 0 : index
    %c29_293 = arith.constant 29 : index
    %583 = vector.load %arg3[%c0_292, %c29_293] : memref<8x36xf32, #tpu.memory_space<vmem>>, vector<8x1xf32>
    %c0_294 = arith.constant 0 : index
    %c29_295 = arith.constant 29 : index
    %584 = vector.load %arg4[%c0_294, %c29_295] : memref<8x36xf32, #tpu.memory_space<vmem>>, vector<8x1xf32>
    %c0_296 = arith.constant 0 : index
    %c29_297 = arith.constant 29 : index
    %585 = vector.load %arg5[%c0_296, %c29_297] : memref<8x36xf32, #tpu.memory_space<vmem>>, vector<8x1xf32>
    %586 = vector.broadcast %582 : vector<1x196xf32> to vector<8x196xf32>
    %587 = vector.broadcast %584 : vector<8x1xf32> to vector<8x196xf32>
    %588 = arith.subf %586, %587 : vector<8x196xf32>
    %589 = vector.broadcast %583 : vector<8x1xf32> to vector<8x196xf32>
    %590 = arith.mulf %588, %589 : vector<8x196xf32>
    %591 = arith.mulf %590, %590 : vector<8x196xf32>
    %cst_298 = arith.constant 1.000000e+00 : f32
    %592 = vector.broadcast %cst_298 : f32 to vector<8x196xf32>
    %593 = arith.subf %591, %592 : vector<8x196xf32>
    %cst_299 = arith.constant -5.000000e-01 : f32
    %594 = vector.broadcast %cst_299 : f32 to vector<8x196xf32>
    %595 = arith.mulf %594, %591 : vector<8x196xf32>
    %596 = math.exp %595 : vector<8x196xf32>
    %597 = arith.mulf %593, %596 : vector<8x196xf32>
    %598 = vector.broadcast %585 : vector<8x1xf32> to vector<8x196xf32>
    %599 = arith.mulf %597, %598 : vector<8x196xf32>
    %600 = arith.addf %580, %599 : vector<8x196xf32>
    %c0_300 = arith.constant 0 : index
    %c30 = arith.constant 30 : index
    %c0_301 = arith.constant 0 : index
    %601 = vector.load %arg2[%c0_300, %c30, %c0_301] : memref<1x36x196xf32, #tpu.memory_space<vmem>>, vector<1x1x196xf32>
    %602 = vector.shape_cast %601 : vector<1x1x196xf32> to vector<1x196xf32>
    %c0_302 = arith.constant 0 : index
    %c30_303 = arith.constant 30 : index
    %603 = vector.load %arg3[%c0_302, %c30_303] : memref<8x36xf32, #tpu.memory_space<vmem>>, vector<8x1xf32>
    %c0_304 = arith.constant 0 : index
    %c30_305 = arith.constant 30 : index
    %604 = vector.load %arg4[%c0_304, %c30_305] : memref<8x36xf32, #tpu.memory_space<vmem>>, vector<8x1xf32>
    %c0_306 = arith.constant 0 : index
    %c30_307 = arith.constant 30 : index
    %605 = vector.load %arg5[%c0_306, %c30_307] : memref<8x36xf32, #tpu.memory_space<vmem>>, vector<8x1xf32>
    %606 = vector.broadcast %602 : vector<1x196xf32> to vector<8x196xf32>
    %607 = vector.broadcast %604 : vector<8x1xf32> to vector<8x196xf32>
    %608 = arith.subf %606, %607 : vector<8x196xf32>
    %609 = vector.broadcast %603 : vector<8x1xf32> to vector<8x196xf32>
    %610 = arith.mulf %608, %609 : vector<8x196xf32>
    %611 = arith.mulf %610, %610 : vector<8x196xf32>
    %cst_308 = arith.constant 1.000000e+00 : f32
    %612 = vector.broadcast %cst_308 : f32 to vector<8x196xf32>
    %613 = arith.subf %611, %612 : vector<8x196xf32>
    %cst_309 = arith.constant -5.000000e-01 : f32
    %614 = vector.broadcast %cst_309 : f32 to vector<8x196xf32>
    %615 = arith.mulf %614, %611 : vector<8x196xf32>
    %616 = math.exp %615 : vector<8x196xf32>
    %617 = arith.mulf %613, %616 : vector<8x196xf32>
    %618 = vector.broadcast %605 : vector<8x1xf32> to vector<8x196xf32>
    %619 = arith.mulf %617, %618 : vector<8x196xf32>
    %620 = arith.addf %600, %619 : vector<8x196xf32>
    %c0_310 = arith.constant 0 : index
    %c31 = arith.constant 31 : index
    %c0_311 = arith.constant 0 : index
    %621 = vector.load %arg2[%c0_310, %c31, %c0_311] : memref<1x36x196xf32, #tpu.memory_space<vmem>>, vector<1x1x196xf32>
    %622 = vector.shape_cast %621 : vector<1x1x196xf32> to vector<1x196xf32>
    %c0_312 = arith.constant 0 : index
    %c31_313 = arith.constant 31 : index
    %623 = vector.load %arg3[%c0_312, %c31_313] : memref<8x36xf32, #tpu.memory_space<vmem>>, vector<8x1xf32>
    %c0_314 = arith.constant 0 : index
    %c31_315 = arith.constant 31 : index
    %624 = vector.load %arg4[%c0_314, %c31_315] : memref<8x36xf32, #tpu.memory_space<vmem>>, vector<8x1xf32>
    %c0_316 = arith.constant 0 : index
    %c31_317 = arith.constant 31 : index
    %625 = vector.load %arg5[%c0_316, %c31_317] : memref<8x36xf32, #tpu.memory_space<vmem>>, vector<8x1xf32>
    %626 = vector.broadcast %622 : vector<1x196xf32> to vector<8x196xf32>
    %627 = vector.broadcast %624 : vector<8x1xf32> to vector<8x196xf32>
    %628 = arith.subf %626, %627 : vector<8x196xf32>
    %629 = vector.broadcast %623 : vector<8x1xf32> to vector<8x196xf32>
    %630 = arith.mulf %628, %629 : vector<8x196xf32>
    %631 = arith.mulf %630, %630 : vector<8x196xf32>
    %cst_318 = arith.constant 1.000000e+00 : f32
    %632 = vector.broadcast %cst_318 : f32 to vector<8x196xf32>
    %633 = arith.subf %631, %632 : vector<8x196xf32>
    %cst_319 = arith.constant -5.000000e-01 : f32
    %634 = vector.broadcast %cst_319 : f32 to vector<8x196xf32>
    %635 = arith.mulf %634, %631 : vector<8x196xf32>
    %636 = math.exp %635 : vector<8x196xf32>
    %637 = arith.mulf %633, %636 : vector<8x196xf32>
    %638 = vector.broadcast %625 : vector<8x1xf32> to vector<8x196xf32>
    %639 = arith.mulf %637, %638 : vector<8x196xf32>
    %640 = arith.addf %620, %639 : vector<8x196xf32>
    %c0_320 = arith.constant 0 : index
    %c32 = arith.constant 32 : index
    %c0_321 = arith.constant 0 : index
    %641 = vector.load %arg2[%c0_320, %c32, %c0_321] : memref<1x36x196xf32, #tpu.memory_space<vmem>>, vector<1x1x196xf32>
    %642 = vector.shape_cast %641 : vector<1x1x196xf32> to vector<1x196xf32>
    %c0_322 = arith.constant 0 : index
    %c32_323 = arith.constant 32 : index
    %643 = vector.load %arg3[%c0_322, %c32_323] : memref<8x36xf32, #tpu.memory_space<vmem>>, vector<8x1xf32>
    %c0_324 = arith.constant 0 : index
    %c32_325 = arith.constant 32 : index
    %644 = vector.load %arg4[%c0_324, %c32_325] : memref<8x36xf32, #tpu.memory_space<vmem>>, vector<8x1xf32>
    %c0_326 = arith.constant 0 : index
    %c32_327 = arith.constant 32 : index
    %645 = vector.load %arg5[%c0_326, %c32_327] : memref<8x36xf32, #tpu.memory_space<vmem>>, vector<8x1xf32>
    %646 = vector.broadcast %642 : vector<1x196xf32> to vector<8x196xf32>
    %647 = vector.broadcast %644 : vector<8x1xf32> to vector<8x196xf32>
    %648 = arith.subf %646, %647 : vector<8x196xf32>
    %649 = vector.broadcast %643 : vector<8x1xf32> to vector<8x196xf32>
    %650 = arith.mulf %648, %649 : vector<8x196xf32>
    %651 = arith.mulf %650, %650 : vector<8x196xf32>
    %cst_328 = arith.constant 1.000000e+00 : f32
    %652 = vector.broadcast %cst_328 : f32 to vector<8x196xf32>
    %653 = arith.subf %651, %652 : vector<8x196xf32>
    %cst_329 = arith.constant -5.000000e-01 : f32
    %654 = vector.broadcast %cst_329 : f32 to vector<8x196xf32>
    %655 = arith.mulf %654, %651 : vector<8x196xf32>
    %656 = math.exp %655 : vector<8x196xf32>
    %657 = arith.mulf %653, %656 : vector<8x196xf32>
    %658 = vector.broadcast %645 : vector<8x1xf32> to vector<8x196xf32>
    %659 = arith.mulf %657, %658 : vector<8x196xf32>
    %660 = arith.addf %640, %659 : vector<8x196xf32>
    %c0_330 = arith.constant 0 : index
    %c33 = arith.constant 33 : index
    %c0_331 = arith.constant 0 : index
    %661 = vector.load %arg2[%c0_330, %c33, %c0_331] : memref<1x36x196xf32, #tpu.memory_space<vmem>>, vector<1x1x196xf32>
    %662 = vector.shape_cast %661 : vector<1x1x196xf32> to vector<1x196xf32>
    %c0_332 = arith.constant 0 : index
    %c33_333 = arith.constant 33 : index
    %663 = vector.load %arg3[%c0_332, %c33_333] : memref<8x36xf32, #tpu.memory_space<vmem>>, vector<8x1xf32>
    %c0_334 = arith.constant 0 : index
    %c33_335 = arith.constant 33 : index
    %664 = vector.load %arg4[%c0_334, %c33_335] : memref<8x36xf32, #tpu.memory_space<vmem>>, vector<8x1xf32>
    %c0_336 = arith.constant 0 : index
    %c33_337 = arith.constant 33 : index
    %665 = vector.load %arg5[%c0_336, %c33_337] : memref<8x36xf32, #tpu.memory_space<vmem>>, vector<8x1xf32>
    %666 = vector.broadcast %662 : vector<1x196xf32> to vector<8x196xf32>
    %667 = vector.broadcast %664 : vector<8x1xf32> to vector<8x196xf32>
    %668 = arith.subf %666, %667 : vector<8x196xf32>
    %669 = vector.broadcast %663 : vector<8x1xf32> to vector<8x196xf32>
    %670 = arith.mulf %668, %669 : vector<8x196xf32>
    %671 = arith.mulf %670, %670 : vector<8x196xf32>
    %cst_338 = arith.constant 1.000000e+00 : f32
    %672 = vector.broadcast %cst_338 : f32 to vector<8x196xf32>
    %673 = arith.subf %671, %672 : vector<8x196xf32>
    %cst_339 = arith.constant -5.000000e-01 : f32
    %674 = vector.broadcast %cst_339 : f32 to vector<8x196xf32>
    %675 = arith.mulf %674, %671 : vector<8x196xf32>
    %676 = math.exp %675 : vector<8x196xf32>
    %677 = arith.mulf %673, %676 : vector<8x196xf32>
    %678 = vector.broadcast %665 : vector<8x1xf32> to vector<8x196xf32>
    %679 = arith.mulf %677, %678 : vector<8x196xf32>
    %680 = arith.addf %660, %679 : vector<8x196xf32>
    %c0_340 = arith.constant 0 : index
    %c34 = arith.constant 34 : index
    %c0_341 = arith.constant 0 : index
    %681 = vector.load %arg2[%c0_340, %c34, %c0_341] : memref<1x36x196xf32, #tpu.memory_space<vmem>>, vector<1x1x196xf32>
    %682 = vector.shape_cast %681 : vector<1x1x196xf32> to vector<1x196xf32>
    %c0_342 = arith.constant 0 : index
    %c34_343 = arith.constant 34 : index
    %683 = vector.load %arg3[%c0_342, %c34_343] : memref<8x36xf32, #tpu.memory_space<vmem>>, vector<8x1xf32>
    %c0_344 = arith.constant 0 : index
    %c34_345 = arith.constant 34 : index
    %684 = vector.load %arg4[%c0_344, %c34_345] : memref<8x36xf32, #tpu.memory_space<vmem>>, vector<8x1xf32>
    %c0_346 = arith.constant 0 : index
    %c34_347 = arith.constant 34 : index
    %685 = vector.load %arg5[%c0_346, %c34_347] : memref<8x36xf32, #tpu.memory_space<vmem>>, vector<8x1xf32>
    %686 = vector.broadcast %682 : vector<1x196xf32> to vector<8x196xf32>
    %687 = vector.broadcast %684 : vector<8x1xf32> to vector<8x196xf32>
    %688 = arith.subf %686, %687 : vector<8x196xf32>
    %689 = vector.broadcast %683 : vector<8x1xf32> to vector<8x196xf32>
    %690 = arith.mulf %688, %689 : vector<8x196xf32>
    %691 = arith.mulf %690, %690 : vector<8x196xf32>
    %cst_348 = arith.constant 1.000000e+00 : f32
    %692 = vector.broadcast %cst_348 : f32 to vector<8x196xf32>
    %693 = arith.subf %691, %692 : vector<8x196xf32>
    %cst_349 = arith.constant -5.000000e-01 : f32
    %694 = vector.broadcast %cst_349 : f32 to vector<8x196xf32>
    %695 = arith.mulf %694, %691 : vector<8x196xf32>
    %696 = math.exp %695 : vector<8x196xf32>
    %697 = arith.mulf %693, %696 : vector<8x196xf32>
    %698 = vector.broadcast %685 : vector<8x1xf32> to vector<8x196xf32>
    %699 = arith.mulf %697, %698 : vector<8x196xf32>
    %700 = arith.addf %680, %699 : vector<8x196xf32>
    %c0_350 = arith.constant 0 : index
    %c35 = arith.constant 35 : index
    %c0_351 = arith.constant 0 : index
    %701 = vector.load %arg2[%c0_350, %c35, %c0_351] : memref<1x36x196xf32, #tpu.memory_space<vmem>>, vector<1x1x196xf32>
    %702 = vector.shape_cast %701 : vector<1x1x196xf32> to vector<1x196xf32>
    %c0_352 = arith.constant 0 : index
    %c35_353 = arith.constant 35 : index
    %703 = vector.load %arg3[%c0_352, %c35_353] : memref<8x36xf32, #tpu.memory_space<vmem>>, vector<8x1xf32>
    %c0_354 = arith.constant 0 : index
    %c35_355 = arith.constant 35 : index
    %704 = vector.load %arg4[%c0_354, %c35_355] : memref<8x36xf32, #tpu.memory_space<vmem>>, vector<8x1xf32>
    %c0_356 = arith.constant 0 : index
    %c35_357 = arith.constant 35 : index
    %705 = vector.load %arg5[%c0_356, %c35_357] : memref<8x36xf32, #tpu.memory_space<vmem>>, vector<8x1xf32>
    %706 = vector.broadcast %702 : vector<1x196xf32> to vector<8x196xf32>
    %707 = vector.broadcast %704 : vector<8x1xf32> to vector<8x196xf32>
    %708 = arith.subf %706, %707 : vector<8x196xf32>
    %709 = vector.broadcast %703 : vector<8x1xf32> to vector<8x196xf32>
    %710 = arith.mulf %708, %709 : vector<8x196xf32>
    %711 = arith.mulf %710, %710 : vector<8x196xf32>
    %cst_358 = arith.constant 1.000000e+00 : f32
    %712 = vector.broadcast %cst_358 : f32 to vector<8x196xf32>
    %713 = arith.subf %711, %712 : vector<8x196xf32>
    %cst_359 = arith.constant -5.000000e-01 : f32
    %714 = vector.broadcast %cst_359 : f32 to vector<8x196xf32>
    %715 = arith.mulf %714, %711 : vector<8x196xf32>
    %716 = math.exp %715 : vector<8x196xf32>
    %717 = arith.mulf %713, %716 : vector<8x196xf32>
    %718 = vector.broadcast %705 : vector<8x1xf32> to vector<8x196xf32>
    %719 = arith.mulf %717, %718 : vector<8x196xf32>
    %720 = arith.addf %700, %719 : vector<8x196xf32>
    %c0_360 = arith.constant 0 : index
    %c0_361 = arith.constant 0 : index
    %c0_362 = arith.constant 0 : index
    %721 = vector.load %arg6[%c0_360, %c0_361, %c0_362] : memref<1x8x196xf32, #tpu.memory_space<vmem>>, vector<1x8x196xf32>
    %722 = vector.shape_cast %721 : vector<1x8x196xf32> to vector<8x196xf32>
    %723 = vector.shape_cast %720 : vector<8x196xf32> to vector<1x8x196xf32>
    tpu.vector_store %arg6[%c0_360, %c0_361, %c0_362], %723 {strides = array<i32>} : memref<1x8x196xf32, #tpu.memory_space<vmem>>, vector<1x8x196xf32>,
    %c196_i32 = arith.constant 196 : i32
    %724 = arith.muli %arg1, %c196_i32 : i32
    %725 = tpu.iota {dimensions = array<i32: 1>} : vector<1x196xi32>
    %726 = vector.broadcast %724 : i32 to vector<1x196xi32>
    %727 = arith.addi %726, %725 : vector<1x196xi32>
    %c196_i32_363 = arith.constant 196 : i32
    %728 = vector.broadcast %c196_i32_363 : i32 to vector<1x196xi32>
    %729 = arith.cmpi slt, %727, %728 : vector<1x196xi32>
    %cst_364 = arith.constant 0.000000e+00 : f32
    %730 = vector.shape_cast %729 : vector<1x196xi1> to vector<1x196xi1>
    %731 = vector.broadcast %730 : vector<1x196xi1> to vector<8x196xi1>
    %732 = vector.broadcast %cst_364 : f32 to vector<8x196xf32>
    %733 = arith.select %731, %720, %732 : vector<8x196xi1>, vector<8x196xf32>
    %cst_365 = arith.constant dense<0.000000e+00> : vector<8xf32>
    %734 = vector.multi_reduction <add>, %733, %cst_365 [1] : vector<8x196xf32> to vector<8xf32>
    %735 = vector.shape_cast %734 : vector<8xf32> to vector<8x1xf32>
    %736 = arith.mulf %733, %733 : vector<8x196xf32>
    %cst_366 = arith.constant dense<0.000000e+00> : vector<8xf32>
    %737 = vector.multi_reduction <add>, %736, %cst_366 [1] : vector<8x196xf32> to vector<8xf32>
    %738 = vector.shape_cast %737 : vector<8xf32> to vector<8x1xf32>
    %739 = tpu.iota {dimensions = array<i32: 1>} : vector<8x128xi32>
    %c0_i32 = arith.constant 0 : i32
    %740 = vector.broadcast %c0_i32 : i32 to vector<8x128xi32>
    %741 = arith.cmpi eq, %739, %740 : vector<8x128xi32>
    %cst_367 = arith.constant 0.000000e+00 : f32
    %742 = vector.shape_cast %735 : vector<8x1xf32> to vector<8x1xf32>
    %743 = vector.broadcast %742 : vector<8x1xf32> to vector<8x128xf32>
    %744 = vector.broadcast %cst_367 : f32 to vector<8x128xf32>
    %745 = arith.select %741, %743, %744 : vector<8x128xi1>, vector<8x128xf32>
    %c1_i32 = arith.constant 1 : i32
    %746 = vector.broadcast %c1_i32 : i32 to vector<8x128xi32>
    %747 = arith.cmpi eq, %739, %746 : vector<8x128xi32>
    %cst_368 = arith.constant 0.000000e+00 : f32
    %748 = vector.shape_cast %738 : vector<8x1xf32> to vector<8x1xf32>
    %749 = vector.broadcast %748 : vector<8x1xf32> to vector<8x128xf32>
    %750 = vector.broadcast %cst_368 : f32 to vector<8x128xf32>
    %751 = arith.select %747, %749, %750 : vector<8x128xi1>, vector<8x128xf32>
    %752 = arith.addf %745, %751 : vector<8x128xf32>
    %c0_369 = arith.constant 0 : index
    %c0_370 = arith.constant 0 : index
    %c0_371 = arith.constant 0 : index
    %753 = vector.load %arg7[%c0_369, %c0_370, %c0_371] : memref<1x8x128xf32, #tpu.memory_space<vmem>>, vector<1x8x128xf32>
    %754 = vector.shape_cast %753 : vector<1x8x128xf32> to vector<8x128xf32>
    %755 = vector.shape_cast %752 : vector<8x128xf32> to vector<1x8x128xf32>
    tpu.vector_store %arg7[%c0_369, %c0_370, %c0_371], %755 {strides = array<i32>} : memref<1x8x128xf32, #tpu.memory_space<vmem>>, vector<1x8x128xf32>,
    return
  }
  func.func @transform_0(%arg0: i32, %arg1: i32) -> (i32, i32, i32) {
    %c0_i32 = arith.constant 0 : i32
    %c0_i32_0 = arith.constant 0 : i32
    return %arg0, %c0_i32, %arg1 : i32, i32, i32
  }
  func.func @transform_1(%arg0: i32, %arg1: i32) -> (i32, i32) {
    %c0_i32 = arith.constant 0 : i32
    %c0_i32_0 = arith.constant 0 : i32
    %c0_i32_1 = arith.constant 0 : i32
    return %c0_i32, %c0_i32_0 : i32, i32
  }
  func.func @transform_2(%arg0: i32, %arg1: i32) -> (i32, i32) {
    %c0_i32 = arith.constant 0 : i32
    %c0_i32_0 = arith.constant 0 : i32
    %c0_i32_1 = arith.constant 0 : i32
    return %c0_i32, %c0_i32_0 : i32, i32
  }
  func.func @transform_3(%arg0: i32, %arg1: i32) -> (i32, i32) {
    %c0_i32 = arith.constant 0 : i32
    %c0_i32_0 = arith.constant 0 : i32
    %c0_i32_1 = arith.constant 0 : i32
    return %c0_i32, %c0_i32_0 : i32, i32
  }
  func.func @transform_4(%arg0: i32, %arg1: i32) -> (i32, i32, i32) {
    %c0_i32 = arith.constant 0 : i32
    %c0_i32_0 = arith.constant 0 : i32
    return %arg0, %c0_i32, %arg1 : i32, i32, i32
  }
  func.func @transform_5(%arg0: i32, %arg1: i32) -> (i32, i32, i32) {
    %c1_i32 = arith.constant 1 : i32
    %0 = arith.muli %arg0, %c1_i32 : i32
    %1 = arith.addi %0, %arg1 : i32
    %c0_i32 = arith.constant 0 : i32
    %c0_i32_0 = arith.constant 0 : i32
    %c0_i32_1 = arith.constant 0 : i32
    return %1, %c0_i32, %c0_i32_0 : i32, i32, i32
  }
}

</mosaic_0001>

<bundles_post_ra>
// kernel: tpu_custom_call.1
= control target key start
LH: loop header
LB: loop body
LE: loop exit
PB: predicated region body
PF: predicated region fallthrough
CT: control target
= control target key end

     0   :  { %11 = vsyncpa [#allocation3], 0  ;;  %s3630_s0 = inlined_call_operand.vmem [shape: f32[2,36,196], index: 0, kind: input, shape index: {}]   ;;  %s3631_s1 = inlined_call_operand.vmem [shape: f32[8,36], index: 1, kind: input, shape index: {}]   ;;  %s3632_s2 = inlined_call_operand.vmem [shape: f32[8,36], index: 2, kind: input, shape index: {}]   ;;  %s3633_s3 = inlined_call_operand.vmem [shape: f32[8,36], index: 3, kind: input, shape index: {}]   ;;  %s3634_s4 = inlined_call_operand.hbm [shape: f32[2,8,196], index: 4, kind: output, shape index: {0}]   ;;  %s3635_s5 = inlined_call_operand.hbm [shape: f32[2,8,128], index: 5, kind: output, shape index: {1}]  }
   0x1   :  { %13 = vsyncpa [#allocation3 + $0x1], 0 }
   0x2   :  { %14 = vsyncpa [#allocation5], 0 }
   0x3   :  { %16 = vsyncpa [#allocation5 + $0x1], 0  ;;  %s2695_s18 = smov 0   ;;  %s2697_s19 = smov 0  }
   0x4   :  { %s2699_s20 = smov 0   ;;  %s2701_s21 = smov 0  }
   0x5   :  { %s2703_s22 = smov 0   ;;  %s2705_s23 = smov 0  }
   0x6 LB: > { %s2072_s24 = sadd.s32 4294967295, %s2625_s23   ;;  %s2073_s25 = sadd.s32 4294967294, %s2625_s23   ;;  %s2625_s23 = sphi %s2705_s23, %s22_s23   ;;  %s2621_s22 = sphi %s2703_s22, %s3648_s22   ;;  %s2617_s21 = sphi %s2701_s21, %s3647_s21   ;;  %s2613_s20 = sphi %s2699_s20, %s3646_s20   ;;  %s2609_s19 = sphi %s2697_s19, %s3645_s19   ;;  %s2605_s18 = sphi %s2695_s18, %s3644_s18  }
   0x7   : > { %s34_s26 = sadd.s32 1, %s2621_s22  ;;  %s134_s27 = sadd.s32 1, %s2613_s20 }
   0x8   : > { %p36_p0 = scmp.ge.s32.totalorder %s34_s26, 2  ;;  %p144_p1 = scmp.ne.s32.totalorder %s2613_s20, %s2609_s19 }
   0x9   : > { %p145_p2 = scmp.eq.s32.totalorder %s2072_s24, 1  ;;  %p150_p3 = scmp.ne.s32.totalorder %s2609_s19, %s2605_s18 }
   0xa   : > { %s3650_s26 = smov (%p36_p0, %s34_s26), 0  ;;  %p151_p5 = scmp.eq.s32.totalorder %s2073_s25, 1 }
   0xb   : > { %p2735_p4 = por %p145_p2, %p144_p1  ;;  %s129_s29 = ssub.s32 %s2621_s22, %s3650_s26 }
   0xc   : > { %p2076_p6 = scmp.ge.s32.totalorder %s2625_s23, 1  ;;  %p132_p7 = scmp.eq.s32.totalorder %s129_s29, 0 }
   0xd   : > { %p2742_p8 = por %p151_p5, %p150_p3  ;;  %p219_p9 = scmp.lt.s32.totalorder %s2625_s23, 3 }
   0xe   : > { %s2748_s6 = scalar_select %p132_p7, %s2613_s20, %s134_s27  }
   0xf   : > { %p220_p10 = pnand %p2076_p6, %p219_p9 }
  0x10   : > { %p257_p11 = scmp.lt.s32.totalorder (!%p220_p10), %s2617_s21, 1  ;;  %s3565_s9 = sand.u32 (!%p220_p10), 1, %s2609_s19  }
  0x11   : > { %223 = sbr.rel (%p220_p10) target bundleno = 635 (0x27b), region = 36  ;;  %s2077_s10 = sshll.u32 (!%p220_p10), %s3565_s9, 4 }
  0x12   : > { %s248_s11 = scalar_lea.vmem (!%p220_p10), [#allocation2], %s2077_s10  ;;  %s2194_s12 = sshll.u32 (!%p220_p10), %s2617_s21, 8 }
  0x13   : > { %s1947_s15 = scalar_lea.hbm (!%p220_p10), %s3634_s4, %s2194_s12  ;;  %s1949_s16 = sshll.u32 (!%p220_p10), %s248_s11, 4  ;;  %s1950_s16 = int_to_ptr.vmem [resolvable:$true] %s1949_s16 }
  0x14   : > { %s2519_s24 = scalar_lea.vmem (!%p220_p10), %s1950_s16, 256  ;;  %s2663_s25 = smov (!%p220_p10), [#allocation2]  }
  0x15   : > { %p2520_p12 = scmp.ne.s32.totalorder (!%p220_p10), %s1950_s16, %s2519_s24  ;;  %s2523_s27 = sshll.u32 (!%p220_p10), %s2663_s25, 4  ;;  %s2524_s27 = int_to_ptr.vmem [resolvable:$false] %s2523_s27 }
  0x16   : > { %v2753_v0 = vld [vmem:[%s3633_s3] sm:$0xff]  ;;  %v2627_v2 = vmov 0   ;;  %v2628_v4 = vmov 1   ;;  %v2629_v5 = vmov 2   ;;  %v2630_v6 = vmov 3   ;;  %s258_s13 = scalar_select %p257_p11, %s2617_s21, 1 }
  0x17   : > { %v2758_v1 = vld [vmem:[%s3632_s2] sm:$0xff]  ;;  %2293 = vset.pattern.permute.xlu1 %v2627_v2  ;;  %2292 = vset.pattern.permute.xlu0 %v2627_v2  ;;  %v2631_v7 = vmov 4   ;;  %v2632_v8 = vmov 5   ;;  %v2633_v9 = vmov 6   ;;  %v2634_v10 = vmov 7   ;;  %p2521_p13 = pnand %p2520_p12, %p2735_p4  ;;  %s2525_s29 = scalar_lea.vmem %s2524_s27, 512 }
  0x18   : > { %311 = vperm.xlu1 %2293, %v2753_v0   ;;  %285 = vperm.xlu0 %2292, %v2758_v1   ;;  %v2765_v3 = vld [vmem:[%s3631_s1] sm:$0xff]  ;;  %v2635_v11 = vmov 8   ;;  %v2636_v12 = vmov 9   ;;  %v2637_v13 = vmov 10   ;;  %v2638_v14 = vmov 11   ;;  %s2195_s14 = smul.u32 80, %s258_s13  ;;  %p2526_p1 = scmp.lt.s32.totalorder %s1950_s16, %s2524_s27 }
  0x19   : > { %v2639_v15 = vmov 12   ;;  %v2640_v16 = vmov 13   ;;  %v2641_v17 = vmov 14   ;;  %v2642_v18 = vmov 15   ;;  %p2522_p0 = pneg %p2521_p13  ;;  %p2527_p2 = scmp.lt.s32.totalorder %s2525_s29, %s2519_s24 }
  0x1a   : > { %v2643_v19 = vmov 16   ;;  %v2644_v20 = vmov 17   ;;  %v2645_v21 = vmov 18   ;;  %v2646_v22 = vmov 19   ;;  %s2828_s17 = scalar_lea.vmem %s3630_s0, %s2195_s14 }
  0x1b   : > { %v2647_v23 = vmov 20   ;;  %v3636_v24 = vlaneseq  ;;  %v2648_v25 = vmov 23   ;;  %v2649_v27 = vmov 24   ;;  %v268_v30 = vld [vmem:[%s2828_s17] ss:$8 sm:$0x3]  ;;  %p2528_p3 = por %p2527_p2, %p2526_p1 }
  0x1c   : > { %2294 = vset.pattern.permute.xlu1 %v2628_v4  ;;  %292 = vperm.xlu0 %2292, %v2765_v3   ;;  %v2650_v31 = vmov 26   ;;  %v2651_v36 = vmov 27   ;;  %v2082_v39 = vld [vmem:[%s2828_s17 + $0x1] ss:$8 sm:$0x3]  ;;  %v2652_v46 = vmov 29  }
  0x1d   : > { %332 = vperm.xlu1 %2294, %v2758_v1   ;;  %v274_v26 = vshrl.u32 %v3636_v24, 7  ;;  %v2085_v51 = vld [vmem:[%s2828_s17 + $0x2] ss:$8 sm:$0x3]  ;;  %v2653_v58 = vmov 30   ;;  %vm1894_vm1 = vcmask 556032   ;;  %p2529_p5 = pnand %p2528_p3, %p2522_p0 }
  0x1f   : > { %v2831_v28 = vsub.s32 0, %v274_v26  ;;  %v2833_v29 = vsub.s32 1, %v274_v26 }
  0x20   : > { %2295 = vset.pattern.permute.xlu0 %v2628_v4 }
  0x21   : > { %356 = vperm.xlu1 %2294, %v2753_v0   ;;  %338 = vperm.xlu0 %2295, %v2765_v3   ;;  %v276_v32 = vrot.slane %v268_v30, %v2831_v28  ;;  %v280_v33 = vrot.slane %v268_v30, %v2833_v29  ;;  %v324_v41 = vrot.slane %v2082_v39, %v2831_v28 }
  0x22   : > { %v328_v42 = vrot.slane %v2082_v39, %v2833_v29  ;;  %v369_v61 = vrot.slane %v2085_v51, %v2831_v28  ;;  %v373_v62 = vrot.slane %v2085_v51, %v2833_v29 }
  0x25   : > { %2296 = vset.pattern.permute.xlu1 %v2629_v5  ;;  %2297 = vset.pattern.permute.xlu0 %v2629_v5 }
  0x26   : > { %377 = vperm.xlu1 %2296, %v2758_v1   ;;  %383 = vperm.xlu0 %2297, %v2765_v3  }
  0x2a   : > { %401 = vperm.xlu1 %2296, %v2753_v0   ;;  %2299 = vset.pattern.permute.xlu0 %v2630_v6 }
  0x2b   : > { %428 = vperm.xlu0 %2299, %v2765_v3  }
  0x2e   : > { %2298 = vset.pattern.permute.xlu1 %v2630_v6 }
  0x2f   : > { %422 = vperm.xlu1 %2298, %v2758_v1   ;;  %2301 = vset.pattern.permute.xlu0 %v2631_v7 }
  0x30   : > { %473 = vperm.xlu0 %2301, %v2765_v3  }
  0x33   : > { %446 = vperm.xlu1 %2298, %v2753_v0  }
  0x34   : > { %2303 = vset.pattern.permute.xlu0 %v2632_v8 }
  0x35   : > { %518 = vperm.xlu0 %2303, %v2765_v3  }
  0x37   : > { %2300 = vset.pattern.permute.xlu1 %v2631_v7 }
  0x38   : > { %467 = vperm.xlu1 %2300, %v2758_v1  }
  0x39   : > { %2305 = vset.pattern.permute.xlu0 %v2633_v9 }
  0x3a   : > { %563 = vperm.xlu0 %2305, %v2765_v3  }
  0x3c   : > { %491 = vperm.xlu1 %2300, %v2753_v0  }
  0x3e   : > { %2307 = vset.pattern.permute.xlu0 %v2634_v10 }
  0x3f   : > { %608 = vperm.xlu0 %2307, %v2765_v3  }
  0x40   : > { %2302 = vset.pattern.permute.xlu1 %v2632_v8 }
  0x41   : > { %512 = vperm.xlu1 %2302, %v2758_v1  }
  0x43   : > { %2309 = vset.pattern.permute.xlu0 %v2635_v11 }
  0x44   : > { %653 = vperm.xlu0 %2309, %v2765_v3  }
  0x45   : > { %536 = vperm.xlu1 %2302, %v2753_v0  }
  0x48   : > { %2311 = vset.pattern.permute.xlu0 %v2636_v12 }
  0x49   : > { %2304 = vset.pattern.permute.xlu1 %v2633_v9  ;;  %698 = vperm.xlu0 %2311, %v2765_v3  }
  0x4a   : > { %557 = vperm.xlu1 %2304, %v2758_v1  }
  0x4d   : > { %2313 = vset.pattern.permute.xlu0 %v2637_v13 }
  0x4e   : > { %581 = vperm.xlu1 %2304, %v2753_v0   ;;  %743 = vperm.xlu0 %2313, %v2765_v3  }
  0x52   : > { %2306 = vset.pattern.permute.xlu1 %v2634_v10  ;;  %2315 = vset.pattern.permute.xlu0 %v2638_v14  ;;  %v2654_v10 = vmov 32  }
  0x53   : > { %602 = vperm.xlu1 %2306, %v2758_v1   ;;  %788 = vperm.xlu0 %2315, %v2765_v3  }
  0x57   : > { %626 = vperm.xlu1 %2306, %v2753_v0   ;;  %2317 = vset.pattern.permute.xlu0 %v2639_v15 }
  0x58   : > { %833 = vperm.xlu0 %2317, %v2765_v3  }
  0x5b   : > { %2308 = vset.pattern.permute.xlu1 %v2635_v11 }
  0x5c   : > { %647 = vperm.xlu1 %2308, %v2758_v1   ;;  %2319 = vset.pattern.permute.xlu0 %v2640_v16 }
  0x5d   : > { %878 = vperm.xlu0 %2319, %v2765_v3  }
  0x60   : > { %671 = vperm.xlu1 %2308, %v2753_v0  }
  0x61   : > { %2321 = vset.pattern.permute.xlu0 %v2641_v17 }
  0x62   : > { %923 = vperm.xlu0 %2321, %v2765_v3  }
  0x64   : > { %2310 = vset.pattern.permute.xlu1 %v2636_v12 }
  0x65   : > { %692 = vperm.xlu1 %2310, %v2758_v1  }
  0x66   : > { %2323 = vset.pattern.permute.xlu0 %v2642_v18 }
  0x67   : > { %968 = vperm.xlu0 %2323, %v2765_v3  }
  0x69   : > { %716 = vperm.xlu1 %2310, %v2753_v0  }
  0x6b   : > { %2325 = vset.pattern.permute.xlu0 %v2643_v19 }
  0x6c   : > { %1013 = vperm.xlu0 %2325, %v2765_v3  }
  0x6d   : > { %2312 = vset.pattern.permute.xlu1 %v2637_v13 }
  0x6e   : > { %737 = vperm.xlu1 %2312, %v2758_v1  }
  0x70   : > { %2327 = vset.pattern.permute.xlu0 %v2644_v20 }
  0x71   : > { %1058 = vperm.xlu0 %2327, %v2765_v3  }
  0x72   : > { %761 = vperm.xlu1 %2312, %v2753_v0  }
  0x75   : > { %2329 = vset.pattern.permute.xlu0 %v2645_v21 }
  0x76   : > { %2314 = vset.pattern.permute.xlu1 %v2638_v14  ;;  %1103 = vperm.xlu0 %2329, %v2765_v3  }
  0x77   : > { %782 = vperm.xlu1 %2314, %v2758_v1  }
  0x7a   : > { %2331 = vset.pattern.permute.xlu0 %v2646_v22 }
  0x7b   : > { %806 = vperm.xlu1 %2314, %v2753_v0   ;;  %1148 = vperm.xlu0 %2331, %v2765_v3  }
  0x7f   : > { %2316 = vset.pattern.permute.xlu1 %v2639_v15  ;;  %2333 = vset.pattern.permute.xlu0 %v2647_v23  ;;  %v2088_v15 = vld [vmem:[%s2828_s17 + $0x3] ss:$8 sm:$0x3] }
  0x80   : > { %827 = vperm.xlu1 %2316, %v2758_v1   ;;  %1193 = vperm.xlu0 %2333, %v2765_v3   ;;  %v414_v26 = vrot.slane %v2088_v15, %v2831_v28  ;;  %v418_v30 = vrot.slane %v2088_v15, %v2833_v29 }
  0x84   : > { %851 = vperm.xlu1 %2316, %v2753_v0   ;;  %2336 = vset.pattern.permute.xlu0 %v2648_v25 }
  0x85   : > { %1322 = vperm.xlu0 %2336, %v2758_v1  }
  0x88   : > { %2318 = vset.pattern.permute.xlu1 %v2640_v16 }
  0x89   : > { %872 = vperm.xlu1 %2318, %v2758_v1   ;;  %2339 = vset.pattern.permute.xlu0 %v2649_v27 }
  0x8a   : > { %1373 = vperm.xlu0 %2339, %v2765_v3  }
  0x8d   : > { %896 = vperm.xlu1 %2318, %v2753_v0  }
  0x8e   : > { %2341 = vset.pattern.permute.xlu0 %v2650_v31 }
  0x8f   : > { %1457 = vperm.xlu0 %2341, %v2758_v1  }
  0x91   : > { %2320 = vset.pattern.permute.xlu1 %v2641_v17 }
  0x92   : > { %917 = vperm.xlu1 %2320, %v2758_v1  }
  0x93   : > { %v2842_v34 = vpop.permute.xlu1 %311  ;;  %v286_v35 = vpop.permute.xlu0 %285  ;;  %2344 = vset.pattern.permute.xlu0 %v2651_v36 }
  0x94   : > { %v288_v37 = vsub.f32 %v276_v32, %v286_v35  ;;  %v289_v38 = vsub.f32 %v280_v33, %v286_v35  ;;  %1508 = vperm.xlu0 %2344, %v2765_v3   ;;  %v2655_v32 = vmov 21  }
  0x96   : > { %941 = vperm.xlu1 %2320, %v2753_v0  }
  0x97   : > { %v293_v40 = vpop.permute.xlu0 %292 }
  0x98   : > { %v295_v43 = vmul.f32 %v293_v40, %v288_v37  ;;  %v296_v44 = vmul.f32 %v293_v40, %v289_v38  ;;  %v333_v45 = vpop.permute.xlu1 %332  ;;  %2346 = vset.pattern.permute.xlu0 %v2652_v46 }
  0x99   : > { %1592 = vperm.xlu0 %2346, %v2758_v1   ;;  %v335_v49 = vsub.f32 %v324_v41, %v333_v45  ;;  %v336_v50 = vsub.f32 %v328_v42, %v333_v45 }
  0x9a   : > { %v297_v47 = vmul.f32 %v295_v43, %v295_v43  ;;  %v2852_v48 = vmul.f32 %v296_v44, %v296_v44  ;;  %2322 = vset.pattern.permute.xlu1 %v2642_v18 }
  0x9b   : > { %962 = vperm.xlu1 %2322, %v2758_v1  }
  0x9c   : > { %v301_v52 = vmul.f32 -0.5, %v297_v47  ;;  %v302_v53 = vmul.f32 -0.5, %v2852_v48  ;;  %v2858_v54 = vpop.permute.xlu1 %356  ;;  %v339_v55 = vpop.permute.xlu0 %338  ;;  %v2080_v42 = vadd.f32 -1.0, %v297_v47 }
  0x9d   : > { %v341_v56 = vmul.f32 %v339_v55, %v335_v49  ;;  %v342_v57 = vmul.f32 %v339_v55, %v336_v50  ;;  %2349 = vset.pattern.permute.xlu0 %v2653_v58  ;;  %v2081_v49 = vadd.f32 -1.0, %v2852_v48  ;;  %v2656_v55 = vmov 22  }
  0x9e   : > { %v303_v59 = vmul.f32 1.442695, %v301_v52  ;;  %v305_v60 = vmul.f32 1.442695, %v302_v53  ;;  %1643 = vperm.xlu0 %2349, %v2765_v3  }
  0x9f   : > { %v343_v63 = vmul.f32 %v341_v56, %v341_v56  ;;  %v344_v2 = vmul.f32 %v342_v57, %v342_v57  ;;  %986 = vperm.xlu1 %2322, %v2753_v0  }
  0xa0   : > { %2372 = vpow2.f32 %v303_v59 }
  0xa1   : > { %v347_v4 = vmul.f32 -0.5, %v343_v63  ;;  %v378_v5 = vpop.permute.xlu1 %377  ;;  %v384_v6 = vpop.permute.xlu0 %383  ;;  %2374 = vpow2.f32 %v305_v60  ;;  %v348_v7 = vmul.f32 -0.5, %v344_v2  ;;  %v2083_v56 = vadd.f32 -1.0, %v343_v63 }
  0xa2   : > { %v380_v8 = vsub.f32 %v369_v61, %v378_v5  ;;  %v381_v9 = vsub.f32 %v373_v62, %v378_v5  ;;  %2351 = vset.pattern.permute.xlu0 %v2654_v10  ;;  %v2084_v60 = vadd.f32 -1.0, %v344_v2 }
  0xa3   : > { %v349_v11 = vmul.f32 1.442695, %v347_v4  ;;  %2324 = vset.pattern.permute.xlu1 %v2643_v19  ;;  %1727 = vperm.xlu0 %2351, %v2758_v1   ;;  %v351_v12 = vmul.f32 1.442695, %v348_v7 }
  0xa4   : > { %v386_v13 = vmul.f32 %v384_v6, %v380_v8  ;;  %v387_v14 = vmul.f32 %v384_v6, %v381_v9  ;;  %1007 = vperm.xlu1 %2324, %v2758_v1  }
  0xa5   : > { %2376 = vpow2.f32 %v349_v11  ;;  %v2870_v16 = vpop.permute.xlu1 %401 }
  0xa6   : > { %2378 = vpow2.f32 %v351_v12  ;;  %v388_v17 = vmul.f32 %v386_v13, %v386_v13  ;;  %v389_v18 = vmul.f32 %v387_v14, %v387_v14  ;;  %v429_v39 = vpop.permute.xlu0 %428 }
  0xa7   : > { %2352 = vset.pattern.permute.xlu0 %v2655_v32 }
  0xa8   : > { %v392_v19 = vmul.f32 -0.5, %v388_v17  ;;  %v393_v33 = vmul.f32 -0.5, %v389_v18  ;;  %1031 = vperm.xlu1 %2324, %v2753_v0   ;;  %1238 = vperm.xlu0 %2352, %v2765_v3   ;;  %v2086_v13 = vadd.f32 -1.0, %v388_v17 }
  0xaa   : > { %v394_v35 = vmul.f32 1.442695, %v392_v19  ;;  %v396_v37 = vmul.f32 1.442695, %v393_v33  ;;  %v423_v38 = vpop.permute.xlu1 %422  ;;  %v2657_v19 = vmov 25  }
  0xab   : > { %v425_v40 = vsub.f32 %v414_v26, %v423_v38  ;;  %v426_v41 = vsub.f32 %v418_v30, %v423_v38  ;;  %v2087_v26 = vadd.f32 -1.0, %v389_v18  ;;  %v2658_v18 = vmov 28  }
  0xac   : > { %2380 = vpow2.f32 %v394_v35  ;;  %2326 = vset.pattern.permute.xlu1 %v2644_v20  ;;  %1256 = vperm.xlu0 %2352, %v2753_v0  }
  0xad   : > { %2382 = vpow2.f32 %v396_v37  ;;  %v431_v43 = vmul.f32 %v429_v39, %v425_v40  ;;  %v432_v44 = vmul.f32 %v429_v39, %v426_v41  ;;  %1052 = vperm.xlu1 %2326, %v2758_v1   ;;  %v2373_v45 = vpop.eup %2372 }
  0xae   : > { %v2881_v50 = vpop.permute.xlu1 %446  ;;  %v2375_v51 = vpop.eup %2374  ;;  %v307_v20 = vmul.f32 %v2373_v45, %v2080_v42 }
  0xaf   : > { %v433_v52 = vmul.f32 %v431_v43, %v431_v43  ;;  %v434_v53 = vmul.f32 %v432_v44, %v432_v44  ;;  %v308_v59 = vmul.f32 %v2375_v51, %v2081_v49 }
  0xb0   : > { %2356 = vset.pattern.permute.xlu0 %v2656_v55  ;;  %v314_v8 = vmul.f32 %v2842_v34, %v307_v20  ;;  %v2660_v20 = vmov 34  }
  0xb1   : > { %v437_v57 = vmul.f32 -0.5, %v433_v52  ;;  %1076 = vperm.xlu1 %2326, %v2753_v0   ;;  %1301 = vperm.xlu0 %2356, %v2753_v0   ;;  %v438_v61 = vmul.f32 -0.5, %v434_v53  ;;  %v315_v9 = vmul.f32 %v2842_v34, %v308_v59  ;;  %v2089_v39 = vadd.f32 -1.0, %v433_v52 }
  0xb2   : > { %v2377_v47 = vpop.eup %2376  ;;  %v2090_v41 = vadd.f32 -1.0, %v434_v53 }
  0xb3   : > { %v2379_v48 = vpop.eup %2378  ;;  %v353_v62 = vmul.f32 %v2377_v47, %v2083_v56  ;;  %v439_v4 = vmul.f32 1.442695, %v437_v57  ;;  %v2886_v5 = vpop.permute.xlu1 %467  ;;  %v441_v7 = vmul.f32 1.442695, %v438_v61  ;;  %v2661_v57 = vmov 35  }
  0xb4   : > { %v354_v6 = vmul.f32 %v2379_v48, %v2084_v60  ;;  %v2091_v56 = vld [vmem:[%s2828_s17 + $0x4] ss:$8 sm:$0x3]  ;;  %v2094_v47 = vld [vmem:[%s2828_s17 + $0x5] ss:$8 sm:$0x3]  ;;  %v474_v60 = vpop.permute.xlu0 %473 }
  0xb5   : > { %v359_v63 = vmul.f32 %v2858_v54, %v353_v62  ;;  %2384 = vpow2.f32 %v439_v4  ;;  %2328 = vset.pattern.permute.xlu1 %v2645_v21  ;;  %2358 = vset.pattern.permute.xlu0 %v2648_v25  ;;  %v463_v59 = vrot.slane %v2091_v56, %v2833_v29  ;;  %v2097_v62 = vld [vmem:[%s2828_s17 + $0x6] ss:$8 sm:$0x3] }
  0xb6   : > { %v360_v2 = vmul.f32 %v2858_v54, %v354_v6  ;;  %2386 = vpow2.f32 %v441_v7  ;;  %1097 = vperm.xlu1 %2328, %v2758_v1   ;;  %1346 = vperm.xlu0 %2358, %v2753_v0   ;;  %v508_v6 = vrot.slane %v2094_v47, %v2833_v29 }
  0xb7   : > { %v361_v11 = vadd.f32 %v359_v63, %v314_v8  ;;  %v2896_v12 = vpop.permute.xlu1 %491  ;;  %v471_v4 = vsub.f32 %v463_v59, %v2886_v5  ;;  %v549_v8 = vrot.slane %v2097_v62, %v2831_v28  ;;  %v553_v63 = vrot.slane %v2097_v62, %v2833_v29 }
  0xb8   : > { %v362_v14 = vadd.f32 %v360_v2, %v315_v9  ;;  %v519_v7 = vpop.permute.xlu0 %518  ;;  %v2100_v9 = vld [vmem:[%s2828_s17 + $0x7] ss:$8 sm:$0x3] }
  0xb9   : > { %v2381_v15 = vpop.eup %2380 }
  0xba   : > { %v2383_v30 = vpop.eup %2382  ;;  %v398_v21 = vmul.f32 %v2381_v15, %v2086_v13  ;;  %1121 = vperm.xlu1 %2328, %v2753_v0   ;;  %2360 = vset.pattern.permute.xlu0 %v2657_v19  ;;  %v477_v13 = vmul.f32 %v474_v60, %v471_v4  ;;  %v594_v15 = vrot.slane %v2100_v9, %v2831_v28 }
  0xbb   : > { %v399_v34 = vmul.f32 %v2383_v30, %v2087_v26  ;;  %1436 = vperm.xlu0 %2360, %v2753_v0  }
  0xbc   : > { %v404_v54 = vmul.f32 %v2870_v16, %v398_v21  ;;  %v513_v33 = vpop.permute.xlu1 %512  ;;  %v2103_v21 = vld [vmem:[%s2828_s17 + $0x10] ss:$8 sm:$0x3] }
  0xbd   : > { %v405_v35 = vmul.f32 %v2870_v16, %v399_v34 }
  0xbe   : > { %v406_v37 = vadd.f32 %v404_v54, %v361_v11  ;;  %2330 = vset.pattern.permute.xlu1 %v2646_v22  ;;  %v2659_v22 = vmov 31  }
  0xbf   : > { %v407_v17 = vadd.f32 %v405_v35, %v362_v14  ;;  %1142 = vperm.xlu1 %2330, %v2758_v1   ;;  %2363 = vset.pattern.permute.xlu0 %v2658_v18  ;;  %v516_v14 = vsub.f32 %v508_v6, %v513_v33  ;;  %v598_v35 = vrot.slane %v2100_v9, %v2833_v29 }
  0xc0   : > { %v2906_v38 = vpop.permute.xlu1 %536  ;;  %1571 = vperm.xlu0 %2363, %v2753_v0  }
  0xc2   : > { %v2385_v40 = vpop.eup %2384 }
  0xc3   : > { %v2387_v42 = vpop.eup %2386  ;;  %v443_v43 = vmul.f32 %v2385_v40, %v2089_v39  ;;  %1166 = vperm.xlu1 %2330, %v2753_v0  }
  0xc4   : > { %v444_v16 = vmul.f32 %v2387_v42, %v2090_v41  ;;  %2366 = vset.pattern.permute.xlu0 %v2659_v22  ;;  %v639_v41 = vrot.slane %v2103_v21, %v2831_v28 }
  0xc5   : > { %v449_v44 = vmul.f32 %v2881_v50, %v443_v43  ;;  %v558_v45 = vpop.permute.xlu1 %557  ;;  %1706 = vperm.xlu0 %2366, %v2753_v0  }
  0xc6   : > { %v450_v49 = vmul.f32 %v2881_v50, %v444_v16  ;;  %v560_v26 = vsub.f32 %v549_v8, %v558_v45  ;;  %v561_v30 = vsub.f32 %v553_v63, %v558_v45 }
  0xc7   : > { %v2914_v51 = vadd.f32 %v449_v44, %v406_v37  ;;  %2332 = vset.pattern.permute.xlu1 %v2647_v23  ;;  %v459_v23 = vrot.slane %v2091_v56, %v2831_v28  ;;  %v2952_v37 = vmul.f32 %v477_v13, %v477_v13  ;;  %v643_v44 = vrot.slane %v2103_v21, %v2833_v29 }
  0xc8   : > { %v2917_v52 = vadd.f32 %v450_v49, %v407_v17  ;;  %1187 = vperm.xlu1 %2332, %v2758_v1   ;;  %v522_v17 = vmul.f32 %v519_v7, %v516_v14 }
  0xc9   : > { %v2920_v53 = vpop.permute.xlu1 %581  ;;  %2369 = vset.pattern.permute.xlu0 %v2660_v20  ;;  %v470_v48 = vsub.f32 %v459_v23, %v2886_v5  ;;  %v564_v5 = vpop.permute.xlu0 %563 }
  0xca   : > { %1841 = vperm.xlu0 %2369, %v2753_v0   ;;  %v566_v43 = vmul.f32 %v564_v5, %v560_v26  ;;  %v567_v16 = vmul.f32 %v564_v5, %v561_v30  ;;  %v2964_v59 = vmul.f32 %v522_v17, %v522_v17 }
  0xcb   : > { %v476_v11 = vmul.f32 %v474_v60, %v470_v48 }
  0xcc   : > { %1211 = vperm.xlu1 %2332, %v2753_v0   ;;  %v504_v0 = vrot.slane %v2094_v47, %v2831_v28  ;;  %v483_v47 = vmul.f32 -0.5, %v2952_v37  ;;  %v2968_v4 = vmul.f32 %v566_v43, %v566_v43  ;;  %v2970_v6 = vmul.f32 %v567_v16, %v567_v16 }
  0xcd   : > { %v2949_v54 = vmul.f32 %v476_v11, %v476_v11  ;;  %v609_v39 = vpop.permute.xlu0 %608  ;;  %v528_v13 = vmul.f32 -0.5, %v2964_v59 }
  0xce   : > { %v603_v50 = vpop.permute.xlu1 %602  ;;  %2371 = vset.pattern.permute.xlu0 %v2661_v57  ;;  %v486_v11 = vmul.f32 1.442695, %v483_v47  ;;  %v572_v21 = vmul.f32 -0.5, %v2968_v4 }
  0xcf   : > { %v605_v40 = vsub.f32 %v594_v15, %v603_v50  ;;  %v482_v45 = vmul.f32 -0.5, %v2949_v54  ;;  %v606_v49 = vsub.f32 %v598_v35, %v603_v50  ;;  %v2109_v50 = vld [vmem:[%s2828_s17 + $0x12] ss:$8 sm:$0x3]  ;;  %v573_v35 = vmul.f32 -0.5, %v2970_v6 }
  0xd0   : > { %2334 = vset.pattern.permute.xlu1 %v2655_v32  ;;  %v515_v32 = vsub.f32 %v504_v0, %v513_v33  ;;  %v2106_v33 = vld [vmem:[%s2828_s17 + $0x11] ss:$8 sm:$0x3]  ;;  %v733_v26 = vrot.slane %v2109_v50, %v2833_v29  ;;  %v574_v47 = vmul.f32 1.442695, %v572_v21 }
  0xd1   : > { %1232 = vperm.xlu1 %2334, %v2758_v1   ;;  %v684_v23 = vrot.slane %v2106_v33, %v2831_v28  ;;  %v688_v60 = vrot.slane %v2106_v33, %v2833_v29  ;;  %v611_v0 = vmul.f32 %v609_v39, %v605_v40  ;;  %v612_v8 = vmul.f32 %v609_v39, %v606_v49 }
  0xd2   : > { %v2932_v61 = vpop.permute.xlu1 %626  ;;  %v531_v40 = vmul.f32 1.442695, %v528_v13 }
  0xd3   : > { %v2978_v15 = vmul.f32 %v611_v0, %v611_v0  ;;  %v2984_v39 = vmul.f32 %v612_v8, %v612_v8 }
  0xd5   : > { %2335 = vset.pattern.permute.xlu1 %v2656_v55  ;;  %v521_v55 = vmul.f32 %v519_v7, %v515_v32  ;;  %v484_v32 = vmul.f32 1.442695, %v482_v45 }
  0xd6   : > { %1277 = vperm.xlu1 %2335, %v2758_v1  }
  0xd7   : > { %v648_v2 = vpop.permute.xlu1 %647  ;;  %v2957_v42 = vmul.f32 %v521_v55, %v521_v55  ;;  %2388 = vpow2.f32 %v484_v32 }
  0xd8   : > { %v650_v48 = vsub.f32 %v639_v41, %v648_v2  ;;  %v651_v7 = vsub.f32 %v643_v44, %v648_v2  ;;  %v729_v2 = vrot.slane %v2109_v50, %v2831_v28  ;;  %2390 = vpow2.f32 %v486_v11 }
  0xd9   : > { %v527_v62 = vmul.f32 -0.5, %v2957_v42  ;;  %v617_v44 = vmul.f32 -0.5, %v2978_v15 }
  0xda   : > { %1283 = vperm.xlu1 %2335, %v2765_v3  }
  0xdb   : > { %v2947_v34 = vpop.permute.xlu1 %671  ;;  %v529_v30 = vmul.f32 1.442695, %v527_v62  ;;  %v619_v32 = vmul.f32 1.442695, %v617_v44 }
  0xdd   : > { %2392 = vpow2.f32 %v529_v30 }
  0xde   : > { %2337 = vset.pattern.permute.xlu1 %v2648_v25  ;;  %v654_v25 = vpop.permute.xlu0 %653  ;;  %2394 = vpow2.f32 %v531_v40 }
  0xdf   : > { %1328 = vperm.xlu1 %2337, %v2765_v3   ;;  %v656_v55 = vmul.f32 %v654_v25, %v650_v48  ;;  %v657_v17 = vmul.f32 %v654_v25, %v651_v7  ;;  %v576_v25 = vmul.f32 1.442695, %v573_v35  ;;  %2396 = vpow2.f32 %v574_v47 }
  0xe0   : > { %v693_v56 = vpop.permute.xlu1 %692 }
  0xe1   : > { %v695_v63 = vsub.f32 %v684_v23, %v693_v56  ;;  %v696_v14 = vsub.f32 %v688_v60, %v693_v56  ;;  %v2989_v45 = vmul.f32 %v656_v55, %v656_v55  ;;  %v2112_v23 = vld [vmem:[%s2828_s17 + $0x13] ss:$8 sm:$0x3]  ;;  %v2992_v60 = vmul.f32 %v657_v17, %v657_v17 }
  0xe2   : > { %v699_v5 = vpop.permute.xlu0 %698  ;;  %2398 = vpow2.f32 %v576_v25 }
  0xe3   : > { %2338 = vset.pattern.permute.xlu1 %v2649_v27  ;;  %v701_v33 = vmul.f32 %v699_v5, %v695_v63  ;;  %v702_v41 = vmul.f32 %v699_v5, %v696_v14  ;;  %v662_v8 = vmul.f32 -0.5, %v2989_v45  ;;  %v774_v63 = vrot.slane %v2112_v23, %v2831_v28 }
  0xe4   : > { %v2974_v9 = vpop.permute.xlu1 %716  ;;  %1367 = vperm.xlu1 %2338, %v2758_v1   ;;  %v663_v11 = vmul.f32 -0.5, %v2992_v60  ;;  %v778_v14 = vrot.slane %v2112_v23, %v2833_v29  ;;  %2400 = vpow2.f32 %v619_v32 }
  0xe5   : > { %v2995_v0 = vmul.f32 %v701_v33, %v701_v33  ;;  %v2997_v7 = vmul.f32 %v702_v41, %v702_v41  ;;  %v664_v30 = vmul.f32 1.442695, %v662_v8 }
  0xe6   : > { %v744_v16 = vpop.permute.xlu0 %743  ;;  %v666_v17 = vmul.f32 1.442695, %v663_v11 }
  0xe7   : > { %v707_v55 = vmul.f32 -0.5, %v2995_v0 }
  0xe8   : > { %2340 = vset.pattern.permute.xlu1 %v2657_v19  ;;  %v618_v19 = vmul.f32 -0.5, %v2984_v39 }
  0xe9   : > { %v738_v43 = vpop.permute.xlu1 %737  ;;  %1412 = vperm.xlu1 %2340, %v2758_v1  }
  0xea   : > { %v740_v49 = vsub.f32 %v729_v2, %v738_v43  ;;  %v741_v56 = vsub.f32 %v733_v26, %v738_v43  ;;  %v621_v5 = vmul.f32 1.442695, %v618_v19  ;;  %v708_v26 = vmul.f32 -0.5, %v2997_v7  ;;  %v789_v35 = vpop.permute.xlu0 %788  ;;  %v2115_v43 = vld [vmem:[%s2828_s17 + $0x14] ss:$8 sm:$0x3] }
  0xeb   : > { %v2092_v19 = vadd.f32 -1.0, %v2949_v54  ;;  %v819_v32 = vrot.slane %v2115_v43, %v2831_v28  ;;  %v2095_v54 = vadd.f32 -1.0, %v2957_v42 }
  0xec   : > { %v746_v48 = vmul.f32 %v744_v16, %v740_v49  ;;  %v747_v62 = vmul.f32 %v744_v16, %v741_v56  ;;  %2402 = vpow2.f32 %v621_v5  ;;  %v709_v16 = vmul.f32 1.442695, %v707_v55  ;;  %v2389_v49 = vpop.eup %2388 }
  0xed   : > { %v2999_v50 = vpop.permute.xlu1 %761  ;;  %1418 = vperm.xlu1 %2340, %v2765_v3   ;;  %v711_v56 = vmul.f32 1.442695, %v708_v26  ;;  %v2391_v25 = vpop.eup %2390  ;;  %2404 = vpow2.f32 %v664_v30  ;;  %v823_v5 = vrot.slane %v2115_v43, %v2833_v29  ;;  %v488_v55 = vmul.f32 %v2389_v49, %v2092_v19 }
  0xee   : > { %v3005_v13 = vmul.f32 %v746_v48, %v746_v48  ;;  %v3009_v2 = vmul.f32 %v747_v62, %v747_v62  ;;  %v2093_v48 = vadd.f32 -1.0, %v2952_v37  ;;  %2406 = vpow2.f32 %v666_v17  ;;  %v834_v43 = vpop.permute.xlu0 %833 }
  0xef   : > { %2408 = vpow2.f32 %v709_v16 }
  0xf0   : > { %v752_v33 = vmul.f32 -0.5, %v3005_v13  ;;  %v753_v44 = vmul.f32 -0.5, %v3009_v2  ;;  %v489_v26 = vmul.f32 %v2391_v25, %v2093_v48  ;;  %2410 = vpow2.f32 %v711_v56 }
  0xf1   : > { %2342 = vset.pattern.permute.xlu1 %v2650_v31  ;;  %v2099_v25 = vadd.f32 -1.0, %v2970_v6 }
  0xf2   : > { %v783_v21 = vpop.permute.xlu1 %782  ;;  %1463 = vperm.xlu1 %2342, %v2765_v3   ;;  %v754_v8 = vmul.f32 1.442695, %v752_v33  ;;  %v756_v37 = vmul.f32 1.442695, %v753_v44 }
  0xf3   : > { %v785_v40 = vsub.f32 %v774_v63, %v783_v21  ;;  %v786_v41 = vsub.f32 %v778_v14, %v783_v21  ;;  %v2393_v14 = vpop.eup %2392  ;;  %v2096_v21 = vadd.f32 -1.0, %v2964_v59  ;;  %v2118_v59 = vld [vmem:[%s2828_s17 + $0x15] ss:$8 sm:$0x3] }
  0xf4   : > { %v2395_v17 = vpop.eup %2394  ;;  %v533_v33 = vmul.f32 %v2393_v14, %v2095_v54  ;;  %2412 = vpow2.f32 %v754_v8  ;;  %v3041_v8 = vld [vmem:[%s2828_s17 + $0x16] ss:$8 sm:$0x3] }
  0xf5   : > { %v791_v23 = vmul.f32 %v789_v35, %v785_v40  ;;  %v792_v47 = vmul.f32 %v789_v35, %v786_v41  ;;  %v2098_v40 = vadd.f32 -1.0, %v2968_v4  ;;  %v2397_v16 = vpop.eup %2396  ;;  %2414 = vpow2.f32 %v756_v37 }
  0xf6   : > { %v3019_v62 = vpop.permute.xlu1 %806  ;;  %2343 = vset.pattern.permute.xlu1 %v2651_v36  ;;  %v495_v4 = vmul.f32 %v2896_v12, %v489_v26  ;;  %v534_v19 = vmul.f32 %v2395_v17, %v2096_v21  ;;  %v864_v37 = vrot.slane %v2118_v59, %v2831_v28  ;;  %v913_v17 = vrot.slane %v3041_v8, %v2833_v29 }
  0xf7   : > { %v3023_v63 = vmul.f32 %v791_v23, %v791_v23  ;;  %v3025_v11 = vmul.f32 %v792_v47, %v792_v47  ;;  %1502 = vperm.xlu1 %2343, %v2758_v1   ;;  %v2399_v23 = vpop.eup %2398  ;;  %v494_v47 = vmul.f32 %v2896_v12, %v488_v55  ;;  %v868_v12 = vrot.slane %v2118_v59, %v2833_v29 }
  0xf8   : > { %v2401_v14 = vpop.eup %2400  ;;  %v579_v6 = vmul.f32 %v2399_v23, %v2099_v25 }
  0xf9   : > { %v797_v30 = vmul.f32 -0.5, %v3023_v63  ;;  %v798_v35 = vmul.f32 -0.5, %v3025_v11  ;;  %v496_v21 = vadd.f32 %v494_v47, %v2914_v51  ;;  %v2105_v51 = vadd.f32 -1.0, %v2992_v60  ;;  %v3073_v60 = vld [vmem:[%s3631_s1] sm:$0xff] }
  0xfb   : > { %v799_v42 = vmul.f32 1.442695, %v797_v30  ;;  %v828_v41 = vpop.permute.xlu1 %827  ;;  %2345 = vset.pattern.permute.xlu1 %v2658_v18  ;;  %v801_v44 = vmul.f32 1.442695, %v798_v35  ;;  %v2403_v30 = vpop.eup %2402  ;;  %v497_v35 = vadd.f32 %v495_v4, %v2917_v52  ;;  %v2107_v4 = vadd.f32 -1.0, %v2995_v0 }
  0xfc   : > { %v830_v49 = vsub.f32 %v819_v32, %v828_v41  ;;  %v831_v56 = vsub.f32 %v823_v5, %v828_v41  ;;  %1547 = vperm.xlu1 %2345, %v2758_v1   ;;  %v539_v32 = vmul.f32 %v2906_v38, %v533_v33  ;;  %v2101_v1 = vadd.f32 -1.0, %v2978_v15 }
  0xfd   : > { %2416 = vpow2.f32 %v799_v42  ;;  %v578_v5 = vmul.f32 %v2397_v16, %v2098_v40  ;;  %v909_v15 = vrot.slane %v3041_v8, %v2831_v28  ;;  %v540_v33 = vmul.f32 %v2906_v38, %v534_v19 }
  0xfe   : > { %2418 = vpow2.f32 %v801_v44  ;;  %v836_v18 = vmul.f32 %v834_v43, %v830_v49  ;;  %v837_v48 = vmul.f32 %v834_v43, %v831_v56  ;;  %v2102_v40 = vadd.f32 -1.0, %v2984_v39  ;;  %v2405_v43 = vpop.eup %2404  ;;  %v879_v39 = vpop.permute.xlu0 %878 }
  0xff   : > { %v3045_v54 = vpop.permute.xlu1 %851  ;;  %v623_v42 = vmul.f32 %v2401_v14, %v2101_v1  ;;  %v2104_v16 = vadd.f32 -1.0, %v2989_v45  ;;  %v2407_v44 = vpop.eup %2406  ;;  %v584_v49 = vmul.f32 %v2920_v53, %v578_v5  ;;  %v585_v56 = vmul.f32 %v2920_v53, %v579_v6 }
 0x100   : > { %v3049_v55 = vmul.f32 %v836_v18, %v836_v18  ;;  %v3051_v26 = vmul.f32 %v837_v48, %v837_v48  ;;  %1553 = vperm.xlu1 %2345, %v2765_v3   ;;  %v541_v3 = vadd.f32 %v539_v32, %v496_v21  ;;  %v624_v59 = vmul.f32 %v2403_v30, %v2102_v40  ;;  %v2409_v47 = vpop.eup %2408 }
 0x101   : > { %v2411_v53 = vpop.eup %2410  ;;  %v629_v18 = vmul.f32 %v2932_v61, %v623_v42  ;;  %v668_v48 = vmul.f32 %v2405_v43, %v2104_v16  ;;  %v2108_v14 = vadd.f32 -1.0, %v2997_v7  ;;  %v669_v32 = vmul.f32 %v2407_v44, %v2105_v51 }
 0x102   : > { %v842_v41 = vmul.f32 -0.5, %v3049_v55  ;;  %v843_v52 = vmul.f32 -0.5, %v3051_v26  ;;  %v586_v5 = vadd.f32 %v584_v49, %v541_v3  ;;  %v630_v6 = vmul.f32 %v2932_v61, %v624_v59 }
 0x103   : > { %v2110_v30 = vadd.f32 -1.0, %v3005_v13  ;;  %v714_v42 = vmul.f32 %v2411_v53, %v2108_v14  ;;  %v2111_v61 = vadd.f32 -1.0, %v3009_v2  ;;  %v3092_v13 = vld [vmem:[%s3632_s2] sm:$0xff]  ;;  %v675_v3 = vmul.f32 %v2947_v34, %v669_v32 }
 0x104   : > { %v844_v38 = vmul.f32 1.442695, %v842_v41  ;;  %v873_v23 = vpop.permute.xlu1 %872  ;;  %2347 = vset.pattern.permute.xlu1 %v2652_v46  ;;  %v846_v25 = vmul.f32 1.442695, %v843_v52  ;;  %v713_v41 = vmul.f32 %v2409_v47, %v2107_v4  ;;  %v631_v52 = vadd.f32 %v629_v18, %v586_v5 }
 0x105   : > { %v875_v45 = vsub.f32 %v864_v37, %v873_v23  ;;  %v876_v19 = vsub.f32 %v868_v12, %v873_v23  ;;  %1598 = vperm.xlu1 %2347, %v3073_v60   ;;  %v2413_v37 = vpop.eup %2412  ;;  %v542_v12 = vadd.f32 %v540_v33, %v497_v35  ;;  %v674_v35 = vmul.f32 %v2947_v34, %v668_v48  ;;  %v924_v34 = vpop.permute.xlu0 %923 }
 0x106   : > { %2420 = vpow2.f32 %v844_v38  ;;  %v2415_v40 = vpop.eup %2414  ;;  %v758_v44 = vmul.f32 %v2413_v37, %v2110_v30  ;;  %v2113_v49 = vadd.f32 -1.0, %v3023_v63  ;;  %v2114_v23 = vadd.f32 -1.0, %v3025_v11 }
 0x107   : > { %2422 = vpow2.f32 %v846_v25  ;;  %v881_v0 = vmul.f32 %v879_v39, %v875_v45  ;;  %v882_v1 = vmul.f32 %v879_v39, %v876_v19  ;;  %v587_v51 = vadd.f32 %v585_v56, %v542_v12 }
 0x108   : > { %v3080_v21 = vpop.permute.xlu1 %896  ;;  %v759_v38 = vmul.f32 %v2415_v40, %v2111_v61  ;;  %v719_v39 = vmul.f32 %v2974_v9, %v713_v41  ;;  %v720_v47 = vmul.f32 %v2974_v9, %v714_v42  ;;  %v676_v18 = vadd.f32 %v674_v35, %v631_v52 }
 0x109   : > { %v3082_v43 = vmul.f32 %v881_v0, %v881_v0  ;;  %v3084_v7 = vmul.f32 %v882_v1, %v882_v1  ;;  %2348 = vset.pattern.permute.xlu1 %v2653_v58  ;;  %v632_v59 = vadd.f32 %v630_v6, %v587_v51  ;;  %v764_v9 = vmul.f32 %v2999_v50, %v758_v44  ;;  %v2124_v1 = vld [vmem:[%s2828_s17 + $0x17] ss:$8 sm:$0x3] }
 0x10a   : > { %v2417_v16 = vpop.eup %2416  ;;  %1637 = vperm.xlu1 %2348, %v3092_v13   ;;  %v765_v14 = vmul.f32 %v2999_v50, %v759_v38  ;;  %v2116_v8 = vadd.f32 -1.0, %v3049_v55  ;;  %v2117_v50 = vadd.f32 -1.0, %v3051_v26  ;;  %v954_v40 = vrot.slane %v2124_v1, %v2831_v28 }
 0x10b   : > { %v2419_v33 = vpop.eup %2418  ;;  %v887_v56 = vmul.f32 -0.5, %v3082_v43  ;;  %v888_v2 = vmul.f32 -0.5, %v3084_v7  ;;  %v803_v4 = vmul.f32 %v2417_v16, %v2113_v49  ;;  %v677_v48 = vadd.f32 %v675_v3, %v632_v59  ;;  %v969_v49 = vpop.permute.xlu0 %968 }
 0x10c   : > { %v804_v19 = vmul.f32 %v2419_v33, %v2114_v23  ;;  %v958_v41 = vrot.slane %v2124_v1, %v2833_v29 }
 0x10d   : > { %v889_v25 = vmul.f32 1.442695, %v887_v56  ;;  %v918_v45 = vpop.permute.xlu1 %917  ;;  %v891_v53 = vmul.f32 1.442695, %v888_v2  ;;  %v722_v37 = vadd.f32 %v720_v47, %v677_v48 }
 0x10e   : > { %v920_v63 = vsub.f32 %v909_v15, %v918_v45  ;;  %v921_v11 = vsub.f32 %v913_v17, %v918_v45  ;;  %2350 = vset.pattern.permute.xlu1 %v2659_v22  ;;  %v721_v15 = vadd.f32 %v719_v39, %v676_v18  ;;  %v809_v22 = vmul.f32 %v3019_v62, %v803_v4 }
 0x10f   : > { %2424 = vpow2.f32 %v889_v25  ;;  %1682 = vperm.xlu1 %2350, %v3092_v13   ;;  %v810_v12 = vmul.f32 %v3019_v62, %v804_v19  ;;  %v767_v16 = vadd.f32 %v765_v14, %v722_v37  ;;  %v2127_v25 = vld [vmem:[%s2828_s17 + $0x20] ss:$8 sm:$0x3] }
 0x110   : > { %2426 = vpow2.f32 %v891_v53  ;;  %v926_v32 = vmul.f32 %v924_v34, %v920_v63  ;;  %v927_v0 = vmul.f32 %v924_v34, %v921_v11  ;;  %v766_v42 = vadd.f32 %v764_v9, %v721_v15 }
 0x111   : > { %v3114_v17 = vpop.permute.xlu1 %941  ;;  %v812_v33 = vadd.f32 %v810_v12, %v767_v16  ;;  %v2119_v34 = vadd.f32 -1.0, %v3082_v43  ;;  %v2120_v63 = vadd.f32 -1.0, %v3084_v7  ;;  %v2662_v11 = vmov 33  }
 0x112   : > { %v3118_v5 = vmul.f32 %v926_v32, %v926_v32  ;;  %v3120_v6 = vmul.f32 %v927_v0, %v927_v0  ;;  %v811_v61 = vadd.f32 %v809_v22, %v766_v42  ;;  %v999_v18 = vrot.slane %v2127_v25, %v2831_v28  ;;  %v2130_v42 = vld [vmem:[%s2828_s17 + $0x21] ss:$8 sm:$0x3] }
 0x113   : > { %v2421_v30 = vpop.eup %2420  ;;  %1688 = vperm.xlu1 %2350, %v3073_v60   ;;  %v1003_v48 = vrot.slane %v2127_v25, %v2833_v29 }
 0x114   : > { %v2423_v55 = vpop.eup %2422  ;;  %v848_v51 = vmul.f32 %v2421_v30, %v2116_v8  ;;  %v932_v52 = vmul.f32 -0.5, %v3118_v5  ;;  %v933_v35 = vmul.f32 -0.5, %v3120_v6 }
 0x115   : > { %v849_v62 = vmul.f32 %v2423_v55, %v2117_v50  ;;  %v1014_v50 = vpop.permute.xlu0 %1013 }
 0x116   : > { %v854_v3 = vmul.f32 %v3045_v54, %v848_v51  ;;  %v934_v26 = vmul.f32 1.442695, %v932_v52  ;;  %v963_v44 = vpop.permute.xlu1 %962  ;;  %v936_v59 = vmul.f32 1.442695, %v933_v35  ;;  %v2122_v51 = vadd.f32 -1.0, %v3118_v5 }
 0x117   : > { %v855_v56 = vmul.f32 %v3045_v54, %v849_v62  ;;  %v965_v38 = vsub.f32 %v954_v40, %v963_v44  ;;  %v966_v23 = vsub.f32 %v958_v41, %v963_v44  ;;  %2353 = vset.pattern.permute.xlu1 %v2654_v10  ;;  %v2123_v35 = vadd.f32 -1.0, %v3120_v6 }
 0x118   : > { %v856_v2 = vadd.f32 %v854_v3, %v811_v61  ;;  %2428 = vpow2.f32 %v934_v26  ;;  %1733 = vperm.xlu1 %2353, %v3073_v60   ;;  %v1044_v61 = vrot.slane %v2130_v42, %v2831_v28 }
 0x119   : > { %v857_v39 = vadd.f32 %v855_v56, %v812_v33  ;;  %2430 = vpow2.f32 %v936_v59  ;;  %v971_v47 = vmul.f32 %v969_v49, %v965_v38  ;;  %v972_v4 = vmul.f32 %v969_v49, %v966_v23 }
 0x11a   : > { %v3133_v45 = vpop.permute.xlu1 %986  ;;  %v1048_v33 = vrot.slane %v2130_v42, %v2833_v29 }
 0x11b   : > { %v973_v19 = vmul.f32 %v971_v47, %v971_v47  ;;  %v3136_v54 = vmul.f32 %v972_v4, %v972_v4  ;;  %v1059_v47 = vpop.permute.xlu0 %1058 }
 0x11c   : > { %v2425_v53 = vpop.eup %2424  ;;  %2354 = vset.pattern.permute.xlu1 %v2662_v11 }
 0x11d   : > { %v2427_v9 = vpop.eup %2426  ;;  %v893_v14 = vmul.f32 %v2425_v53, %v2119_v34  ;;  %v977_v32 = vmul.f32 -0.5, %v973_v19  ;;  %1772 = vperm.xlu1 %2354, %v3092_v13   ;;  %v978_v43 = vmul.f32 -0.5, %v3136_v54  ;;  %v2133_v53 = vld [vmem:[%s2828_s17 + $0x22] ss:$8 sm:$0x3] }
 0x11e   : > { %v894_v0 = vmul.f32 %v2427_v9, %v2120_v63 }
 0x11f   : > { %v899_v1 = vmul.f32 %v3080_v21, %v893_v14  ;;  %v979_v15 = vmul.f32 1.442695, %v977_v32  ;;  %v1008_v7 = vpop.permute.xlu1 %1007  ;;  %v981_v8 = vmul.f32 1.442695, %v978_v43  ;;  %v1089_v32 = vrot.slane %v2133_v53, %v2831_v28 }
 0x120   : > { %v900_v37 = vmul.f32 %v3080_v21, %v894_v0  ;;  %v1010_v22 = vsub.f32 %v999_v18, %v1008_v7  ;;  %v1011_v12 = vsub.f32 %v1003_v48, %v1008_v7  ;;  %v2125_v18 = vadd.f32 -1.0, %v973_v19 }
 0x121   : > { %v901_v30 = vadd.f32 %v899_v1, %v856_v2  ;;  %2432 = vpow2.f32 %v979_v15  ;;  %1778 = vperm.xlu1 %2354, %v3073_v60   ;;  %v1093_v0 = vrot.slane %v2133_v53, %v2833_v29  ;;  %v2139_v53 = vld [vmem:[%s2828_s17 + $0x24] ss:$8 sm:$0x3] }
 0x122   : > { %v902_v40 = vadd.f32 %v900_v37, %v857_v39  ;;  %2434 = vpow2.f32 %v981_v8  ;;  %v1016_v41 = vmul.f32 %v1014_v50, %v1010_v22  ;;  %v1017_v55 = vmul.f32 %v1014_v50, %v1011_v12 }
 0x123   : > { %v3148_v16 = vpop.permute.xlu1 %1031 }
 0x124   : > { %v1018_v52 = vmul.f32 %v1016_v41, %v1016_v41  ;;  %v3151_v62 = vmul.f32 %v1017_v55, %v1017_v55  ;;  %v1104_v41 = vpop.permute.xlu0 %1103 }
 0x125   : > { %v2429_v21 = vpop.eup %2428  ;;  %2355 = vset.pattern.permute.xlu1 %v2660_v20 }
 0x126   : > { %v2431_v3 = vpop.eup %2430  ;;  %v938_v26 = vmul.f32 %v2429_v21, %v2122_v51  ;;  %v1022_v44 = vmul.f32 -0.5, %v1018_v52  ;;  %v1023_v49 = vmul.f32 -0.5, %v3151_v62  ;;  %1817 = vperm.xlu1 %2355, %v3092_v13   ;;  %v2136_v51 = vld [vmem:[%s2828_s17 + $0x23] ss:$8 sm:$0x3] }
 0x127   : > { %v939_v5 = vmul.f32 %v2431_v3, %v2123_v35  ;;  %v2128_v35 = vadd.f32 -1.0, %v1018_v52  ;;  %v2129_v3 = vadd.f32 -1.0, %v3151_v62  ;;  %v3192_v52 = vld [vmem:[%s3633_s3] sm:$0xff] }
 0x128   : > { %v944_v56 = vmul.f32 %v3114_v17, %v938_v26  ;;  %v1024_v59 = vmul.f32 1.442695, %v1022_v44  ;;  %v1026_v38 = vmul.f32 1.442695, %v1023_v49  ;;  %v1053_v6 = vpop.permute.xlu1 %1052  ;;  %v1134_v26 = vrot.slane %v2136_v51, %v2831_v28 }
 0x129   : > { %v945_v20 = vmul.f32 %v3114_v17, %v939_v5  ;;  %v1055_v23 = vsub.f32 %v1044_v61, %v1053_v6  ;;  %v1056_v2 = vsub.f32 %v1048_v33, %v1053_v6  ;;  %v2126_v17 = vadd.f32 -1.0, %v3136_v54 }
 0x12a   : > { %v946_v39 = vadd.f32 %v944_v56, %v901_v30  ;;  %2436 = vpow2.f32 %v1024_v59  ;;  %1823 = vperm.xlu1 %2355, %v3073_v60   ;;  %v1149_v59 = vpop.permute.xlu0 %1148 }
 0x12b   : > { %v947_v4 = vadd.f32 %v945_v20, %v902_v40  ;;  %2438 = vpow2.f32 %v1026_v38  ;;  %v1061_v25 = vmul.f32 %v1059_v47, %v1055_v23  ;;  %v1062_v34 = vmul.f32 %v1059_v47, %v1056_v2 }
 0x12c   : > { %v3163_v63 = vpop.permute.xlu1 %1076 }
 0x12d   : > { %v1063_v48 = vmul.f32 %v1061_v25, %v1061_v25  ;;  %v3165_v9 = vmul.f32 %v1062_v34, %v1062_v34 }
 0x12e   : > { %v2433_v14 = vpop.eup %2432  ;;  %2357 = vset.pattern.permute.xlu1 %v2661_v57 }
 0x12f   : > { %v2435_v43 = vpop.eup %2434  ;;  %v983_v1 = vmul.f32 %v2433_v14, %v2125_v18  ;;  %v1067_v15 = vmul.f32 -0.5, %v1063_v48  ;;  %v1068_v7 = vmul.f32 -0.5, %v3165_v9  ;;  %1862 = vperm.xlu1 %2357, %v3092_v13   ;;  %v2131_v14 = vadd.f32 -1.0, %v1063_v48 }
 0x130   : > { %v984_v19 = vmul.f32 %v2435_v43, %v2126_v17  ;;  %v1194_v17 = vpop.permute.xlu0 %1193  ;;  %v2132_v43 = vadd.f32 -1.0, %v3165_v9 }
 0x131   : > { %v989_v37 = vmul.f32 %v3133_v45, %v983_v1  ;;  %v1069_v8 = vmul.f32 1.442695, %v1067_v15  ;;  %v1071_v22 = vmul.f32 1.442695, %v1068_v7  ;;  %v1098_v54 = vpop.permute.xlu1 %1097  ;;  %v1179_v1 = vrot.slane %v2139_v53, %v2831_v28 }
 0x132   : > { %v990_v12 = vmul.f32 %v3133_v45, %v984_v19  ;;  %v1100_v30 = vsub.f32 %v1089_v32, %v1098_v54  ;;  %v1101_v50 = vsub.f32 %v1093_v0, %v1098_v54 }
 0x133   : > { %v991_v40 = vadd.f32 %v989_v37, %v946_v39  ;;  %2440 = vpow2.f32 %v1069_v8  ;;  %1868 = vperm.xlu1 %2357, %v3073_v60   ;;  %v1138_v60 = vrot.slane %v2136_v51, %v2833_v29 }
 0x134   : > { %v992_v55 = vadd.f32 %v990_v12, %v947_v4  ;;  %2442 = vpow2.f32 %v1071_v22  ;;  %v1106_v42 = vmul.f32 %v1104_v41, %v1100_v30  ;;  %v1107_v13 = vmul.f32 %v1104_v41, %v1101_v50  ;;  %v3209_v41 = vpop.permute.xlu0 %1322 }
 0x135   : > { %v3177_v21 = vpop.permute.xlu1 %1121 }
 0x136   : > { %v3179_v61 = vmul.f32 %v1106_v42, %v1106_v42  ;;  %v3181_v33 = vmul.f32 %v1107_v13, %v1107_v13 }
 0x137   : > { %v2437_v45 = vpop.eup %2436  ;;  %2359 = vset.pattern.permute.xlu1 %v2649_v27 }
 0x138   : > { %v2439_v44 = vpop.eup %2438  ;;  %v1028_v49 = vmul.f32 %v2437_v45, %v2128_v35  ;;  %v1112_v5 = vmul.f32 -0.5, %v3179_v61  ;;  %v1113_v56 = vmul.f32 -0.5, %v3181_v33  ;;  %1391 = vperm.xlu1 %2359, %v3192_v52   ;;  %v2134_v51 = vadd.f32 -1.0, %v3179_v61 }
 0x139   : > { %v1029_v62 = vmul.f32 %v2439_v44, %v2129_v3  ;;  %v2135_v3 = vadd.f32 -1.0, %v3181_v33 }
 0x13a   : > { %v1034_v27 = vmul.f32 %v3148_v16, %v1028_v49  ;;  %v1114_v38 = vmul.f32 1.442695, %v1112_v5  ;;  %v1116_v6 = vmul.f32 1.442695, %v1113_v56  ;;  %v1143_v20 = vpop.permute.xlu1 %1142  ;;  %v3215_v56 = vpop.permute.xlu0 %1373 }
 0x13b   : > { %v1035_v23 = vmul.f32 %v3148_v16, %v1029_v62  ;;  %v1145_v2 = vsub.f32 %v1134_v26, %v1143_v20  ;;  %v1146_v39 = vsub.f32 %v1138_v60, %v1143_v20 }
 0x13c   : > { %v1036_v47 = vadd.f32 %v1034_v27, %v991_v40  ;;  %2444 = vpow2.f32 %v1114_v38  ;;  %2361 = vset.pattern.permute.xlu1 %v2650_v31  ;;  %v1183_v31 = vrot.slane %v2139_v53, %v2833_v29 }
 0x13d   : > { %v1037_v4 = vadd.f32 %v1035_v23, %v992_v55  ;;  %2446 = vpow2.f32 %v1116_v6  ;;  %v1151_v25 = vmul.f32 %v1149_v59, %v1145_v2  ;;  %v1152_v34 = vmul.f32 %v1149_v59, %v1146_v39  ;;  %1481 = vperm.xlu1 %2361, %v3192_v52  }
 0x13e   : > { %v3200_v18 = vpop.permute.xlu1 %1166  ;;  %v3222_v6 = vpop.permute.xlu0 %1457 }
 0x13f   : > { %v1153_v32 = vmul.f32 %v1151_v25, %v1151_v25  ;;  %v1154_v0 = vmul.f32 %v1152_v34, %v1152_v34 }
 0x140   : > { %v2441_v16 = vpop.eup %2440 }
 0x141   : > { %v2443_v15 = vpop.eup %2442  ;;  %v1073_v7 = vmul.f32 %v2441_v16, %v2131_v14  ;;  %v1157_v19 = vmul.f32 -0.5, %v1153_v32  ;;  %v1158_v37 = vmul.f32 -0.5, %v1154_v0  ;;  %2362 = vset.pattern.permute.xlu1 %v2651_v36  ;;  %v2137_v20 = vadd.f32 -1.0, %v1153_v32 }
 0x142   : > { %v1074_v8 = vmul.f32 %v2443_v15, %v2132_v43  ;;  %1526 = vperm.xlu1 %2362, %v3192_v52   ;;  %v2138_v2 = vadd.f32 -1.0, %v1154_v0  ;;  %v3229_v53 = vpop.permute.xlu0 %1508 }
 0x143   : > { %v1079_v48 = vmul.f32 %v3163_v63, %v1073_v7  ;;  %v1159_v22 = vmul.f32 1.442695, %v1157_v19  ;;  %v1161_v54 = vmul.f32 1.442695, %v1158_v37  ;;  %v1188_v12 = vpop.permute.xlu1 %1187 }
 0x144   : > { %v1080_v9 = vmul.f32 %v3163_v63, %v1074_v8  ;;  %v1190_v30 = vsub.f32 %v1179_v1, %v1188_v12  ;;  %v1191_v50 = vsub.f32 %v1183_v31, %v1188_v12 }
 0x145   : > { %v1081_v40 = vadd.f32 %v1079_v48, %v1036_v47  ;;  %2448 = vpow2.f32 %v1159_v22  ;;  %v2142_v48 = vld [vmem:[%s2828_s17 + $0x25] ss:$8 sm:$0x3] }
 0x146   : > { %v1082_v55 = vadd.f32 %v1080_v9, %v1037_v4  ;;  %2450 = vpow2.f32 %v1161_v54  ;;  %v1196_v42 = vmul.f32 %v1194_v17, %v1190_v30  ;;  %v1197_v36 = vmul.f32 %v1194_v17, %v1191_v50  ;;  %2364 = vset.pattern.permute.xlu1 %v2652_v46  ;;  %v3233_v1 = vpop.permute.xlu0 %1592 }
 0x147   : > { %v1212_v13 = vpop.permute.xlu1 %1211  ;;  %1616 = vperm.xlu1 %2364, %v3192_v52   ;;  %v1224_v54 = vrot.slane %v2142_v48, %v2831_v28  ;;  %v1228_v12 = vrot.slane %v2142_v48, %v2833_v29 }
 0x148   : > { %v1198_v35 = vmul.f32 %v1196_v42, %v1196_v42  ;;  %v1199_v45 = vmul.f32 %v1197_v36, %v1197_v36 }
 0x149   : > { %v2445_v63 = vpop.eup %2444 }
 0x14a   : > { %v2447_v26 = vpop.eup %2446  ;;  %v1118_v60 = vmul.f32 %v2445_v63, %v2134_v51  ;;  %v1202_v44 = vmul.f32 -0.5, %v1198_v35  ;;  %v1203_v49 = vmul.f32 -0.5, %v1199_v45  ;;  %v2140_v17 = vadd.f32 -1.0, %v1198_v35  ;;  %v2148_v51 = vld [vmem:[%s2828_s17 + $0x27] ss:$8 sm:$0x3] }
 0x14b   : > { %v1119_v5 = vmul.f32 %v2447_v26, %v2135_v3  ;;  %2365 = vset.pattern.permute.xlu1 %v2653_v58  ;;  %v2141_v16 = vadd.f32 -1.0, %v1199_v45  ;;  %v1314_v63 = vrot.slane %v2148_v51, %v2831_v28 }
 0x14c   : > { %v1124_v46 = vmul.f32 %v3177_v21, %v1118_v60  ;;  %v1204_v62 = vmul.f32 1.442695, %v1202_v44  ;;  %v1206_v59 = vmul.f32 1.442695, %v1203_v49  ;;  %v1233_v27 = vpop.permute.xlu1 %1232  ;;  %1661 = vperm.xlu1 %2365, %v3192_v52   ;;  %v1318_v60 = vrot.slane %v2148_v51, %v2833_v29 }
 0x14d   : > { %v1125_v61 = vmul.f32 %v3177_v21, %v1119_v5  ;;  %v1235_v30 = vsub.f32 %v1224_v54, %v1233_v27  ;;  %v1236_v50 = vsub.f32 %v1228_v12, %v1233_v27 }
 0x14e   : > { %v1126_v38 = vadd.f32 %v1124_v46, %v1081_v40  ;;  %2452 = vpow2.f32 %v1204_v62  ;;  %v1325_v62 = vsub.f32 %v1314_v63, %v3209_v41  ;;  %v3308_v63 = vld [vmem:[%s2828_s17 + $0x34] ss:$8 sm:$0x3] }
 0x14f   : > { %v1127_v33 = vadd.f32 %v1125_v61, %v1082_v55  ;;  %2454 = vpow2.f32 %v1206_v59  ;;  %v2145_v55 = vld [vmem:[%s2828_s17 + $0x26] ss:$8 sm:$0x3]  ;;  %v1326_v61 = vsub.f32 %v1318_v60, %v3209_v41 }
 0x150   : > { %2367 = vset.pattern.permute.xlu1 %v2654_v10  ;;  %v1269_v36 = vrot.slane %v2145_v55, %v2831_v28  ;;  %v1273_v45 = vrot.slane %v2145_v55, %v2833_v29 }
 0x151   : > { %v1278_v23 = vpop.permute.xlu1 %1277  ;;  %1751 = vperm.xlu1 %2367, %v3192_v52  }
 0x152   : > { %v2449_v58 = vpop.eup %2448  ;;  %v1280_v26 = vsub.f32 %v1269_v36, %v1278_v23  ;;  %v1281_v5 = vsub.f32 %v1273_v45, %v1278_v23 }
 0x153   : > { %v2451_v39 = vpop.eup %2450  ;;  %v1163_v47 = vmul.f32 %v2449_v58, %v2137_v20  ;;  %v2151_v58 = vld [vmem:[%s2828_s17 + $0x30] ss:$8 sm:$0x3] }
 0x154   : > { %v1164_v4 = vmul.f32 %v2451_v39, %v2138_v2 }
 0x155   : > { %v1169_v25 = vmul.f32 %v3200_v18, %v1163_v47  ;;  %2368 = vset.pattern.permute.xlu1 %v2662_v11  ;;  %v1284_v21 = vpop.permute.xlu1 %1283 }
 0x156   : > { %v1170_v34 = vmul.f32 %v3200_v18, %v1164_v4  ;;  %1796 = vperm.xlu1 %2368, %v3192_v52   ;;  %v1286_v46 = vmul.f32 %v1284_v21, %v1280_v26  ;;  %v1287_v27 = vmul.f32 %v1284_v21, %v1281_v5  ;;  %v1363_v21 = vrot.slane %v2151_v58, %v2833_v29 }
 0x157   : > { %v1171_v10 = vadd.f32 %v1169_v25, %v1126_v38  ;;  %v1359_v25 = vrot.slane %v2151_v58, %v2831_v28 }
 0x158   : > { %v1172_v14 = vadd.f32 %v1170_v34, %v1127_v33  ;;  %v3272_v20 = vmul.f32 %v1286_v46, %v1286_v46  ;;  %v3275_v39 = vmul.f32 %v1287_v27, %v1287_v27 }
 0x15a   : > { %2370 = vset.pattern.permute.xlu1 %v2661_v57  ;;  %v1329_v32 = vpop.permute.xlu1 %1328  ;;  %v3239_v57 = vpop.permute.xlu0 %1643  ;;  %v1292_v41 = vmul.f32 -0.5, %v3272_v20  ;;  %v2146_v24 = vadd.f32 -1.0, %v3272_v20 }
 0x15b   : > { %v2453_v0 = vpop.eup %2452  ;;  %1886 = vperm.xlu1 %2370, %v3192_v52   ;;  %v1331_v23 = vmul.f32 %v1329_v32, %v1325_v62  ;;  %v1332_v4 = vmul.f32 %v1329_v32, %v1326_v61 }
 0x15c   : > { %v2455_v43 = vpop.eup %2454  ;;  %v1208_v11 = vmul.f32 %v2453_v0, %v2140_v17  ;;  %v1294_v32 = vmul.f32 1.442695, %v1292_v41 }
 0x15d   : > { %v1209_v18 = vmul.f32 %v2455_v43, %v2141_v16  ;;  %v3285_v17 = vmul.f32 %v1332_v4, %v1332_v4  ;;  %v2154_v16 = vld [vmem:[%s2828_s17 + $0x31] ss:$8 sm:$0x3] }
 0x15e   : > { %v1214_v31 = vmul.f32 %v1212_v13, %v1208_v11  ;;  %v3246_v22 = vpop.permute.xlu0 %1727  ;;  %v2157_v11 = vld [vmem:[%s2828_s17 + $0x32] ss:$8 sm:$0x3]  ;;  %v1404_v12 = vrot.slane %v2154_v16, %v2831_v28  ;;  %v1408_v60 = vrot.slane %v2154_v16, %v2833_v29 }
 0x15f   : > { %v1215_v15 = vmul.f32 %v1212_v13, %v1209_v18  ;;  %v1368_v7 = vpop.permute.xlu1 %1367  ;;  %v2166_v18 = vld [vmem:[%s2828_s17 + $0x35] ss:$8 sm:$0x3] }
 0x160   : > { %v3235_v19 = vadd.f32 %v1214_v31, %v1171_v10  ;;  %v1293_v10 = vmul.f32 -0.5, %v3275_v39  ;;  %v1370_v0 = vsub.f32 %v1359_v25, %v1368_v7  ;;  %v1371_v43 = vsub.f32 %v1363_v21, %v1368_v7 }
 0x161   : > { %v3237_v37 = vadd.f32 %v1215_v15, %v1172_v14  ;;  %v3283_v14 = vmul.f32 %v1331_v23, %v1331_v23  ;;  %v2175_v15 = vld [vmem:[%s2828_s17 + $0x40] ss:$8 sm:$0x3]  ;;  %v1453_v7 = vrot.slane %v2157_v11, %v2833_v29  ;;  %v1584_v36 = vrot.slane %v2166_v18, %v2831_v28 }
 0x162   : > { %v1239_v40 = vpop.permute.xlu0 %1238  ;;  %v1296_v48 = vmul.f32 1.442695, %v1293_v10  ;;  %v1377_v55 = vmul.f32 %v3215_v56, %v1371_v43  ;;  %v1588_v51 = vrot.slane %v2166_v18, %v2833_v29  ;;  %v1723_v45 = vrot.slane %v2175_v15, %v2833_v29  ;;  %v3340_v10 = vld [vmem:[%s2828_s17 + $0x41] ss:$8 sm:$0x3] }
 0x163   : > { %v1241_v42 = vmul.f32 %v1239_v40, %v1235_v30  ;;  %v1242_v35 = vmul.f32 %v1239_v40, %v1236_v50  ;;  %v1337_v54 = vmul.f32 -0.5, %v3283_v14  ;;  %v1338_v30 = vmul.f32 -0.5, %v3285_v17 }
 0x164   : > { %v3241_v8 = vpop.permute.xlu1 %1412  ;;  %v1376_v50 = vmul.f32 %v3215_v56, %v1370_v0  ;;  %v1449_v40 = vrot.slane %v2157_v11, %v2831_v28  ;;  %v3313_v56 = vld [vmem:[%s2828_s17 + $0x36] ss:$8 sm:$0x3]  ;;  %v3326_v58 = vmul.f32 %v1377_v55, %v1377_v55  ;;  %v1539_v23 = vrot.slane %v3308_v63, %v2831_v28 }
 0x165   : > { %v3259_v3 = vmul.f32 %v1241_v42, %v1241_v42  ;;  %v3262_v44 = vmul.f32 %v1242_v35, %v1242_v35  ;;  %v3301_v42 = vld [vmem:[%s2828_s17 + $0x33] ss:$8 sm:$0x3]  ;;  %v1719_v35 = vrot.slane %v2175_v15, %v2831_v28  ;;  %v1339_v26 = vmul.f32 1.442695, %v1337_v54 }
 0x166   : > { %v1415_v5 = vsub.f32 %v1404_v12, %v3241_v8  ;;  %v1341_v62 = vmul.f32 1.442695, %v1338_v30  ;;  %v1494_v27 = vrot.slane %v3301_v42, %v2831_v28  ;;  %v1498_v61 = vrot.slane %v3301_v42, %v2833_v29  ;;  %v3371_v42 = vld [vmem:[%s2828_s17 + $0x43] ss:$8 sm:$0x3] }
 0x167   : > { %v1247_v59 = vmul.f32 -0.5, %v3259_v3  ;;  %v1248_v38 = vmul.f32 -0.5, %v3262_v44  ;;  %v1460_v4 = vsub.f32 %v1449_v40, %v3222_v6  ;;  %v1461_v25 = vsub.f32 %v1453_v7, %v3222_v6 }
 0x168   : > { %v3244_v52 = vpop.permute.xlu1 %1418  ;;  %v1629_v41 = vrot.slane %v3313_v56, %v2831_v28  ;;  %v1633_v21 = vrot.slane %v3313_v56, %v2833_v29  ;;  %v1416_v0 = vsub.f32 %v1408_v60, %v3241_v8  ;;  %v3350_v11 = vsub.f32 %v1584_v36, %v3233_v1  ;;  %v3357_v8 = vld [vmem:[%s2828_s17 + $0x42] ss:$8 sm:$0x3] }
 0x169   : > { %v1249_v2 = vmul.f32 1.442695, %v1247_v59  ;;  %v1251_v47 = vmul.f32 1.442695, %v1248_v38  ;;  %v3317_v59 = vmul.f32 %v1376_v50, %v1376_v50  ;;  %v3353_v18 = vsub.f32 %v1588_v51, %v3233_v1 }
 0x16a   : > { %v3324_v38 = vld [vmem:[%s2828_s17 + $0x37] ss:$8 sm:$0x3]  ;;  %v1383_v54 = vmul.f32 -0.5, %v3326_v58  ;;  %v1422_v12 = vmul.f32 %v3244_v52, %v1416_v0  ;;  %v1764_v50 = vrot.slane %v3340_v10, %v2831_v28  ;;  %v3364_v40 = vsub.f32 %v1719_v35, %v3246_v22  ;;  %s1928_s17 = scalar_lea.sflag [#allocation3], %s3565_s9 }
 0x16b   : > { %2456 = vpow2.f32 %v1249_v2  ;;  %v1421_v2 = vmul.f32 %v3244_v52, %v1415_v5  ;;  %v1674_v16 = vrot.slane %v3324_v38, %v2831_v28  ;;  %v1382_v15 = vmul.f32 -0.5, %v3317_v59 }
 0x16c   : > { %2458 = vpow2.f32 %v1251_v47  ;;  %v1543_v47 = vrot.slane %v3308_v63, %v2833_v29  ;;  %v2143_v1 = vadd.f32 -1.0, %v3259_v3  ;;  %v2144_v7 = vadd.f32 -1.0, %v3262_v44 }
 0x16d   : > { %v3250_v9 = vpop.permute.xlu1 %1463  ;;  %2460 = vpow2.f32 %v1294_v32  ;;  %v1678_v32 = vrot.slane %v3324_v38, %v2833_v29  ;;  %v1423_v30 = vmul.f32 %v1421_v2, %v1421_v2  ;;  %v1768_v55 = vrot.slane %v3340_v10, %v2833_v29  ;;  %v1257_v2 = vpop.permute.xlu0 %1256 }
 0x16e   : > { %2462 = vpow2.f32 %v1296_v48  ;;  %v3374_v36 = vsub.f32 %v1723_v45, %v3246_v22  ;;  %v1466_v52 = vmul.f32 %v3250_v9, %v1460_v4  ;;  %v1424_v0 = vmul.f32 %v1422_v12, %v1422_v12 }
 0x16f   : > { %2464 = vpow2.f32 %v1339_v26  ;;  %v1384_v26 = vmul.f32 1.442695, %v1382_v15  ;;  %v1427_v22 = vmul.f32 -0.5, %v1423_v30  ;;  %v1467_v51 = vmul.f32 %v3250_v9, %v1461_v25 }
 0x170   : > { %2466 = vpow2.f32 %v1341_v62  ;;  %v1386_v62 = vmul.f32 1.442695, %v1383_v54  ;;  %v2150_v54 = vadd.f32 -1.0, %v3285_v17  ;;  %v1468_v12 = vmul.f32 %v1466_v52, %v1466_v52 }
 0x171   : > { %2468 = vpow2.f32 %v1384_v26  ;;  %v1428_v9 = vmul.f32 -0.5, %v1424_v0  ;;  %v1429_v25 = vmul.f32 1.442695, %v1427_v22  ;;  %v1302_v35 = vpop.permute.xlu0 %1301  ;;  %v3403_v17 = vadd.f32 -1.0, %v3317_v59 }
 0x172   : > { %v3254_v13 = vpop.permute.xlu1 %1502  ;;  %2470 = vpow2.f32 %v1386_v62  ;;  %v1472_v52 = vmul.f32 -0.5, %v1468_v12 }
 0x173   : > { %v1505_v44 = vsub.f32 %v1494_v27, %v3254_v13  ;;  %v1506_v15 = vsub.f32 %v1498_v61, %v3254_v13  ;;  %v2147_v27 = vadd.f32 -1.0, %v3275_v39  ;;  %2472 = vpow2.f32 %v1429_v25 }
 0x174   : > { %v1431_v62 = vmul.f32 1.442695, %v1428_v9 }
 0x175   : > { %v1511_v20 = vmul.f32 %v3229_v53, %v1505_v44  ;;  %v1512_v39 = vmul.f32 %v3229_v53, %v1506_v15 }
 0x176   : > { %2474 = vpow2.f32 %v1431_v62 }
 0x177   : > { %v3264_v49 = vpop.permute.xlu1 %1547  ;;  %v3414_v44 = vmul.f32 %v1511_v20, %v1511_v20 }
 0x178   : > { %v2457_v6 = vpop.eup %2456 }
 0x179   : > { %v2459_v48 = vpop.eup %2458  ;;  %v1253_v3 = vmul.f32 %v2457_v6, %v2143_v1  ;;  %v1469_v6 = vmul.f32 %v1467_v51, %v1467_v51  ;;  %v3410_v51 = vadd.f32 -1.0, %v3326_v58  ;;  %v3422_v58 = vadd.f32 -1.0, %v1424_v0 }
 0x17a   : > { %v1254_v60 = vmul.f32 %v2459_v48, %v2144_v7  ;;  %v2461_v4 = vpop.eup %2460  ;;  %v2149_v48 = vadd.f32 -1.0, %v3283_v14  ;;  %v1550_v14 = vsub.f32 %v1539_v23, %v3264_v49 }
 0x17b   : > { %v3270_v33 = vpop.permute.xlu1 %1553  ;;  %v2463_v1 = vpop.eup %2462  ;;  %v1259_v7 = vmul.f32 %v1257_v2, %v1253_v3  ;;  %v1298_v13 = vmul.f32 %v2461_v4, %v2146_v24  ;;  %v1551_v24 = vsub.f32 %v1543_v47, %v3264_v49  ;;  %v3420_v49 = vadd.f32 -1.0, %v1423_v30 }
 0x17c   : > { %v1260_v45 = vmul.f32 %v1257_v2, %v1254_v60  ;;  %v1299_v26 = vmul.f32 %v2463_v1, %v2147_v27  ;;  %v2465_v3 = vpop.eup %2464  ;;  %v1556_v59 = vmul.f32 %v3270_v33, %v1550_v14  ;;  %v1473_v47 = vmul.f32 -0.5, %v1469_v6 }
 0x17d   : > { %v1261_v53 = vadd.f32 %v1259_v7, %v3235_v19  ;;  %v2467_v23 = vpop.eup %2466  ;;  %v1304_v2 = vmul.f32 %v1302_v35, %v1298_v13  ;;  %v1557_v22 = vmul.f32 %v3270_v33, %v1551_v24  ;;  %v3424_v19 = vmul.f32 %v1512_v39, %v1512_v39  ;;  %v1347_v33 = vpop.permute.xlu0 %1346 }
 0x17e   : > { %v1262_v60 = vadd.f32 %v1260_v45, %v3237_v37  ;;  %v1474_v37 = vmul.f32 1.442695, %v1472_v52  ;;  %v1305_v45 = vmul.f32 %v1302_v35, %v1299_v26  ;;  %v1343_v4 = vmul.f32 %v2465_v3, %v2149_v48 }
 0x17f   : > { %v1517_v27 = vmul.f32 -0.5, %v3414_v44  ;;  %v1344_v1 = vmul.f32 %v2467_v23, %v2150_v54  ;;  %v3431_v7 = vmul.f32 %v1556_v59, %v1556_v59  ;;  %v1306_v0 = vadd.f32 %v1304_v2, %v1261_v53 }
 0x180   : > { %v3280_v34 = vpop.permute.xlu1 %1598  ;;  %v3435_v20 = vmul.f32 %v1557_v22, %v1557_v22  ;;  %v3439_v48 = vadd.f32 -1.0, %v1468_v12  ;;  %v1476_v9 = vmul.f32 1.442695, %v1473_v47  ;;  %v3446_v13 = vadd.f32 -1.0, %v1469_v6  ;;  %v2469_v12 = vpop.eup %2468 }
 0x181   : > { %v1601_v30 = vmul.f32 %v3280_v34, %v3350_v11  ;;  %v1602_v35 = vmul.f32 %v3280_v34, %v3353_v18  ;;  %2476 = vpow2.f32 %v1474_v37  ;;  %v1349_v11 = vmul.f32 %v1347_v33, %v1343_v4 }
 0x182   : > { %v1519_v14 = vmul.f32 1.442695, %v1517_v27  ;;  %v1350_v52 = vmul.f32 %v1347_v33, %v1344_v1  ;;  %v1562_v34 = vmul.f32 -0.5, %v3431_v7  ;;  %v1563_v26 = vmul.f32 -0.5, %v3435_v20 }
 0x183   : > { %v3450_v18 = vmul.f32 %v1601_v30, %v1601_v30  ;;  %v3453_v24 = vmul.f32 %v1602_v35, %v1602_v35  ;;  %2478 = vpow2.f32 %v1476_v9  ;;  %v1307_v6 = vadd.f32 %v1305_v45, %v1262_v60 }
 0x184   : > { %v3464_v23 = vadd.f32 %v1349_v11, %v1306_v0  ;;  %v1564_v47 = vmul.f32 1.442695, %v1562_v34  ;;  %v1388_v38 = vmul.f32 %v2469_v12, %v3403_v17  ;;  %2480 = vpow2.f32 %v1519_v14 }
 0x185   : > { %v3290_v31 = vpop.permute.xlu1 %1637  ;;  %v3470_v22 = vadd.f32 %v1350_v52, %v1307_v6  ;;  %v3481_v4 = vadd.f32 -1.0, %v3414_v44  ;;  %v1437_v52 = vpop.permute.xlu0 %1436  ;;  %v2162_v12 = vadd.f32 -1.0, %v3424_v19 }
 0x186   : > { %v1640_v15 = vsub.f32 %v1629_v41, %v3290_v31  ;;  %v1518_v41 = vmul.f32 -0.5, %v3424_v19  ;;  %v1641_v54 = vsub.f32 %v1633_v21, %v3290_v31  ;;  %v2471_v21 = vpop.eup %2470 }
 0x187   : > { %v1389_v60 = vmul.f32 %v2471_v21, %v3410_v51  ;;  %v2473_v37 = vpop.eup %2472 }
 0x188   : > { %v1646_v39 = vmul.f32 %v3239_v57, %v1640_v15  ;;  %v1521_v3 = vmul.f32 1.442695, %v1518_v41  ;;  %v1647_v53 = vmul.f32 %v3239_v57, %v1641_v54  ;;  %v1608_v57 = vmul.f32 -0.5, %v3453_v24  ;;  %v2475_v9 = vpop.eup %2474 }
 0x189   : > { %v1433_v0 = vmul.f32 %v2473_v37, %v3420_v49 }
 0x18a   : > { %v3315_v46 = vpop.permute.xlu1 %1682  ;;  %v3466_v62 = vmul.f32 %v1646_v39, %v1646_v39  ;;  %2482 = vpow2.f32 %v1521_v3  ;;  %v3476_v45 = vmul.f32 %v1647_v53, %v1647_v53  ;;  %v1611_v30 = vmul.f32 1.442695, %v1608_v57 }
 0x18b   : > { %v1685_v31 = vsub.f32 %v1674_v16, %v3315_v46  ;;  %v1686_v56 = vsub.f32 %v1678_v32, %v3315_v46  ;;  %v1607_v46 = vmul.f32 -0.5, %v3450_v18  ;;  %v1566_v32 = vmul.f32 1.442695, %v1563_v26 }
 0x18c   : > { %v1652_v15 = vmul.f32 -0.5, %v3466_v62  ;;  %2484 = vpow2.f32 %v1564_v47  ;;  %v1434_v26 = vmul.f32 %v2475_v9, %v3422_v58 }
 0x18d   : > { %v1609_v1 = vmul.f32 1.442695, %v1607_v46  ;;  %2486 = vpow2.f32 %v1566_v32 }
 0x18e   : > { %v3347_v43 = vpop.permute.xlu1 %1688  ;;  %v1654_v11 = vmul.f32 1.442695, %v1652_v15  ;;  %v2477_v14 = vpop.eup %2476 }
 0x18f   : > { %v1691_v2 = vmul.f32 %v3347_v43, %v1685_v31  ;;  %v1692_v16 = vmul.f32 %v3347_v43, %v1686_v56  ;;  %2488 = vpow2.f32 %v1609_v1 }
 0x190   : > { %2490 = vpow2.f32 %v1611_v30  ;;  %v2479_v53 = vpop.eup %2478 }
 0x191   : > { %v3484_v27 = vmul.f32 %v1691_v2, %v1691_v2  ;;  %v3486_v17 = vmul.f32 %v1692_v16, %v1692_v16  ;;  %v1439_v2 = vmul.f32 %v1437_v52, %v1433_v0  ;;  %2492 = vpow2.f32 %v1654_v11 }
 0x192   : > { %v1440_v0 = vmul.f32 %v1437_v52, %v1434_v26  ;;  %v2165_v52 = vadd.f32 -1.0, %v3435_v20 }
 0x193   : > { %v3382_v5 = vpop.permute.xlu1 %1733  ;;  %v1697_v10 = vmul.f32 -0.5, %v3484_v27 }
 0x194   : > { %v1736_v43 = vmul.f32 %v3382_v5, %v3364_v40  ;;  %v1737_v40 = vmul.f32 %v3382_v5, %v3374_v36  ;;  %v3639_v36 = vrot.slane %v3357_v8, %v2831_v28 }
 0x195   : > { %v1699_v16 = vmul.f32 1.442695, %v1697_v10 }
 0x196   : > { %v3501_v41 = vmul.f32 %v1736_v43, %v1736_v43  ;;  %v3512_v34 = vmul.f32 %v1737_v40, %v1737_v40 }
 0x198   : > { %v3395_v61 = vpop.permute.xlu1 %1772  ;;  %v1742_v6 = vmul.f32 -0.5, %v3501_v41  ;;  %v1743_v47 = vmul.f32 -0.5, %v3512_v34 }
 0x199   : > { %v1775_v51 = vsub.f32 %v1764_v50, %v3395_v61  ;;  %v1776_v44 = vsub.f32 %v1768_v55, %v3395_v61  ;;  %v1653_v50 = vmul.f32 -0.5, %v3476_v45  ;;  %v1698_v55 = vmul.f32 -0.5, %v3486_v17 }
 0x19a   : > { %v3640_v61 = vrot.slane %v3357_v8, %v2833_v29  ;;  %v1744_v1 = vmul.f32 1.442695, %v1742_v6 }
 0x19b   : > { %v1656_v21 = vmul.f32 1.442695, %v1653_v50  ;;  %v1701_v19 = vmul.f32 1.442695, %v1698_v55 }
 0x19c   : > { %v3418_v63 = vpop.permute.xlu1 %1778 }
 0x19d   : > { %v1781_v35 = vmul.f32 %v3418_v63, %v1775_v51  ;;  %v1782_v54 = vmul.f32 %v3418_v63, %v1776_v44  ;;  %v2481_v51 = vpop.eup %2480  ;;  %2494 = vpow2.f32 %v1656_v21 }
 0x19e   : > { %v2483_v30 = vpop.eup %2482  ;;  %2496 = vpow2.f32 %v1699_v16 }
 0x19f   : > { %v3516_v31 = vmul.f32 %v1781_v35, %v1781_v35  ;;  %v3519_v8 = vmul.f32 %v1782_v54, %v1782_v54  ;;  %2498 = vpow2.f32 %v1701_v19 }
 0x1a0   : > { %2500 = vpow2.f32 %v1744_v1 }
 0x1a1   : > { %v1818_v25 = vpop.permute.xlu1 %1817  ;;  %v1787_v37 = vmul.f32 -0.5, %v3516_v31  ;;  %v1788_v40 = vmul.f32 -0.5, %v3519_v8 }
 0x1a2   : > { %v1820_v5 = vsub.f32 %v3639_v36, %v1818_v25  ;;  %v1821_v49 = vsub.f32 %v3640_v61, %v1818_v25  ;;  %v3641_v25 = vrot.slane %v3371_v42, %v2831_v28  ;;  %v1478_v36 = vmul.f32 %v2477_v14, %v3439_v48 }
 0x1a3   : > { %v1523_v14 = vmul.f32 %v2481_v51, %v3481_v4  ;;  %v2168_v4 = vadd.f32 -1.0, %v3453_v24 }
 0x1a5   : > { %v1824_v59 = vpop.permute.xlu1 %1823 }
 0x1a6   : > { %v1826_v63 = vmul.f32 %v1824_v59, %v1820_v5  ;;  %v1827_v56 = vmul.f32 %v1824_v59, %v1821_v49  ;;  %v3642_v59 = vrot.slane %v3371_v42, %v2833_v29  ;;  %v1479_v5 = vmul.f32 %v2479_v53, %v3446_v13 }
 0x1a8   : > { %v3525_v58 = vmul.f32 %v1826_v63, %v1826_v63  ;;  %v3531_v43 = vmul.f32 %v1827_v56, %v1827_v56 }
 0x1aa   : > { %v1863_v33 = vpop.permute.xlu1 %1862  ;;  %v1832_v35 = vmul.f32 -0.5, %v3525_v58  ;;  %v1833_v50 = vmul.f32 -0.5, %v3531_v43 }
 0x1ab   : > { %v1865_v3 = vsub.f32 %v3641_v25, %v1863_v33  ;;  %v1866_v46 = vsub.f32 %v3642_v59, %v1863_v33  ;;  %v1746_v33 = vmul.f32 1.442695, %v1743_v47  ;;  %v2167_v47 = vadd.f32 -1.0, %v3450_v18  ;;  %v1572_v59 = vpop.permute.xlu0 %1571 }
 0x1ac   : > { %v1834_v63 = vmul.f32 1.442695, %v1832_v35  ;;  %v1836_v13 = vmul.f32 1.442695, %v1833_v50  ;;  %v2171_v18 = vadd.f32 -1.0, %v3476_v45  ;;  %v2173_v35 = vadd.f32 -1.0, %v3484_v27 }
 0x1ad   : > { %2502 = vpow2.f32 %v1746_v33  ;;  %v2177_v27 = vadd.f32 -1.0, %v3512_v34 }
 0x1ae   : > { %v1869_v39 = vpop.permute.xlu1 %1868 }
 0x1af   : > { %v1871_v32 = vmul.f32 %v1869_v39, %v1865_v3  ;;  %v1872_v44 = vmul.f32 %v1869_v39, %v1866_v46 }
 0x1b1   : > { %v3537_v9 = vmul.f32 %v1871_v32, %v1871_v32  ;;  %v3543_v10 = vmul.f32 %v1872_v44, %v1872_v44 }
 0x1b3   : > { %v1392_v57 = vpop.permute.xlu1 %1391  ;;  %v1877_v26 = vmul.f32 -0.5, %v3537_v9  ;;  %v1878_v25 = vmul.f32 -0.5, %v3543_v10 }
 0x1b4   : > { %v1394_v28 = vmul.f32 %v1392_v57, %v1388_v38  ;;  %v1395_v15 = vmul.f32 %v1392_v57, %v1389_v60  ;;  %v2485_v38 = vpop.eup %2484  ;;  %v1789_v60 = vmul.f32 1.442695, %v1787_v37 }
 0x1b5   : > { %v2487_v11 = vpop.eup %2486  ;;  %v1879_v46 = vmul.f32 1.442695, %v1877_v26  ;;  %v1881_v57 = vmul.f32 1.442695, %v1878_v25  ;;  %v2180_v25 = vadd.f32 -1.0, %v3519_v8 }
 0x1b6   : > { %v1396_v29 = vadd.f32 %v1394_v28, %v3464_v23  ;;  %v1397_v42 = vadd.f32 %v1395_v15, %v3470_v22  ;;  %v2164_v23 = vadd.f32 -1.0, %v3431_v7  ;;  %v1791_v22 = vmul.f32 1.442695, %v1788_v40  ;;  %v2489_v48 = vpop.eup %2488 }
 0x1b7   : > { %2504 = vpow2.f32 %v1789_v60  ;;  %v1524_v7 = vmul.f32 %v2483_v30, %v2162_v12  ;;  %v2491_v56 = vpop.eup %2490  ;;  %v1569_v6 = vmul.f32 %v2487_v11, %v2165_v52  ;;  %v1613_v1 = vmul.f32 %v2489_v48, %v2167_v47 }
 0x1b8   : > { %v1482_v54 = vpop.permute.xlu1 %1481  ;;  %v1441_v55 = vadd.f32 %v1439_v2, %v1396_v29  ;;  %v1442_v61 = vadd.f32 %v1440_v0, %v1397_v42  ;;  %v1568_v21 = vmul.f32 %v2485_v38, %v2164_v23  ;;  %2506 = vpow2.f32 %v1791_v22  ;;  %v2493_v19 = vpop.eup %2492 }
 0x1b9   : > { %v1484_v49 = vmul.f32 %v1482_v54, %v1478_v36  ;;  %v1485_v39 = vmul.f32 %v1482_v54, %v1479_v5  ;;  %2508 = vpow2.f32 %v1834_v63  ;;  %v2495_v37 = vpop.eup %2494  ;;  %v1575_v15 = vmul.f32 %v1572_v59, %v1569_v6 }
 0x1ba   : > { %2510 = vpow2.f32 %v1836_v13  ;;  %v1574_v28 = vmul.f32 %v1572_v59, %v1568_v21  ;;  %v1614_v40 = vmul.f32 %v2491_v56, %v2168_v4  ;;  %v2497_v44 = vpop.eup %2496  ;;  %v2170_v30 = vadd.f32 -1.0, %v3466_v62 }
 0x1bb   : > { %v1486_v53 = vadd.f32 %v1484_v49, %v1441_v55  ;;  %v1487_v2 = vadd.f32 %v1485_v39, %v1442_v61  ;;  %2512 = vpow2.f32 %v1879_v46  ;;  %v2499_v0 = vpop.eup %2498  ;;  %v2174_v38 = vadd.f32 -1.0, %v3486_v17  ;;  %v1707_v49 = vpop.permute.xlu0 %1706 }
 0x1bc   : > { %2514 = vpow2.f32 %v1881_v57  ;;  %v2501_v60 = vpop.eup %2500  ;;  %v1658_v50 = vmul.f32 %v2493_v19, %v2170_v30  ;;  %v1659_v54 = vmul.f32 %v2495_v37, %v2171_v18  ;;  %v1703_v36 = vmul.f32 %v2497_v44, %v2173_v35 }
 0x1bd   : > { %v1527_v3 = vpop.permute.xlu1 %1526  ;;  %v1704_v5 = vmul.f32 %v2499_v0, %v2174_v38  ;;  %v2503_v23 = vpop.eup %2502  ;;  %v2176_v52 = vadd.f32 -1.0, %v3501_v41  ;;  %v2179_v6 = vadd.f32 -1.0, %v3516_v31 }
 0x1be   : > { %v1529_v20 = vmul.f32 %v1527_v3, %v1523_v14  ;;  %v1530_v16 = vmul.f32 %v1527_v3, %v1524_v7  ;;  %v1709_v48 = vmul.f32 %v1707_v49, %v1703_v36  ;;  %v1749_v56 = vmul.f32 %v2503_v23, %v2177_v27 }
 0x1bf   : > { %v1710_v13 = vmul.f32 %v1707_v49, %v1704_v5  ;;  %v1748_v7 = vmul.f32 %v2501_v60, %v2176_v52  ;;  %v2182_v3 = vadd.f32 -1.0, %v3525_v58  ;;  %v1842_v31 = vpop.permute.xlu0 %1841 }
 0x1c0   : > { %v1531_v12 = vadd.f32 %v1529_v20, %v1486_v53  ;;  %v1532_v32 = vadd.f32 %v1530_v16, %v1487_v2  ;;  %v2183_v53 = vadd.f32 -1.0, %v3531_v43  ;;  %v3643_v16 = vlaneseq }
 0x1c2   : > { %v1617_v51 = vpop.permute.xlu1 %1616  ;;  %v1576_v29 = vadd.f32 %v1574_v28, %v1531_v12  ;;  %v1577_v42 = vadd.f32 %v1575_v15, %v1532_v32  ;;  %v3562_v19 = vand.u32 127, %v3643_v16  ;;  %v2185_v28 = vadd.f32 -1.0, %v3537_v9 }
 0x1c3   : > { %v1619_v24 = vmul.f32 %v1617_v51, %v1613_v1  ;;  %v1620_v33 = vmul.f32 %v1617_v51, %v1614_v40  ;;  %v2186_v15 = vadd.f32 -1.0, %v3543_v10 }
 0x1c4   : > { %v2505_v61 = vpop.eup %2504  ;;  %v1899_v51 = vadd.s32 128, %v3562_v19 }
 0x1c5   : > { %v1621_v62 = vadd.f32 %v1619_v24, %v1576_v29  ;;  %v1622_v22 = vadd.f32 %v1620_v33, %v1577_v42  ;;  %v2507_v39 = vpop.eup %2506  ;;  %v1793_v4 = vmul.f32 %v2505_v61, %v2179_v6 }
 0x1c6   : > { %v2509_v26 = vpop.eup %2508  ;;  %v1794_v12 = vmul.f32 %v2507_v39, %v2180_v25  ;;  %vm1904_vm0 = vcmp.lt.s32.totalorder %v1899_v51, 196 }
 0x1c7   : > { %v1662_v11 = vpop.permute.xlu1 %1661  ;;  %v2511_v21 = vpop.eup %2510  ;;  %v1838_v59 = vmul.f32 %v2509_v26, %v2182_v3 }
 0x1c8   : > { %v1664_v45 = vmul.f32 %v1662_v11, %v1658_v50  ;;  %v1665_v55 = vmul.f32 %v1662_v11, %v1659_v54  ;;  %v2513_v47 = vpop.eup %2512  ;;  %v1839_v46 = vmul.f32 %v2511_v21, %v2183_v53 }
 0x1c9   : > { %v2515_v8 = vpop.eup %2514  ;;  %v1844_v1 = vmul.f32 %v1842_v31, %v1838_v59  ;;  %v1883_v18 = vmul.f32 %v2513_v47, %v2185_v28 }
 0x1ca   : > { %v1666_v17 = vadd.f32 %v1664_v45, %v1621_v62  ;;  %v1667_v63 = vadd.f32 %v1665_v55, %v1622_v22  ;;  %v1845_v40 = vmul.f32 %v1842_v31, %v1839_v46  ;;  %v1884_v0 = vmul.f32 %v2515_v8, %v2186_v15 }
 0x1cc   : > { %v1752_v14 = vpop.permute.xlu1 %1751  ;;  %v1711_v41 = vadd.f32 %v1709_v48, %v1666_v17  ;;  %v1712_v2 = vadd.f32 %v1710_v13, %v1667_v63 }
 0x1cd   : > { %v1754_v34 = vmul.f32 %v1752_v14, %v1748_v7  ;;  %v1755_v20 = vmul.f32 %v1752_v14, %v1749_v56 }
 0x1cf   : > { %v1756_v57 = vadd.f32 %v1754_v34, %v1711_v41  ;;  %v1757_v58 = vadd.f32 %v1755_v20, %v1712_v2 }
 0x1d1   : > { %v1797_v32 = vpop.permute.xlu1 %1796 }
 0x1d2   : > { %v1799_v37 = vmul.f32 %v1797_v32, %v1793_v4  ;;  %v1800_v43 = vmul.f32 %v1797_v32, %v1794_v12 }
 0x1d4   : > { %v1801_v44 = vadd.f32 %v1799_v37, %v1756_v57  ;;  %v1802_v30 = vadd.f32 %v1800_v43, %v1757_v58 }
 0x1d6   : > { %v1887_v29 = vpop.permute.xlu1 %1886  ;;  %v1846_v42 = vadd.f32 %v1844_v1, %v1801_v44  ;;  %v1847_v24 = vadd.f32 %v1845_v40, %v1802_v30 }
 0x1d7   : > { %v1889_v33 = vmul.f32 %v1887_v29, %v1883_v18  ;;  %v1890_v35 = vmul.f32 %v1887_v29, %v1884_v0 }
 0x1d9   : > { %v1891_v9 = vadd.f32 %v1889_v33, %v1846_v42  ;;  %v1892_v38 = vadd.f32 %v1890_v35, %v1847_v24 }
 0x1db   : > { %v1910_v10 = vsel %vm1904_vm0, %v1892_v38, 0.0  ;;  %1893 = vst [vmem:[%s248_s11] sm:$0xff] %v1891_v9  ;;  %1895 = vst.msk [vmem:[%s248_s11 + $0x8] sm:$0xff] %vm1894_vm1, %v1892_v38  ;;  %v1915_v36 = vmul.f32 %v1891_v9, %v1891_v9 }
 0x1dc   : > { %v1911_v60 = vsel %vm1894_vm1, %v1910_v10, 0.0  ;;  %v1916_v50 = vmul.f32 %v1910_v10, %v1910_v10 }
 0x1dd   : > { %v1912_v54 = vadd.f32 %v1911_v60, %v1891_v9 }
 0x1de   : > { %v1917_v5 = vsel %vm1894_vm1, %v1916_v50, 0.0 }
 0x1df   : > { %1913 = vadd.xlane.f32.xlu1 %v1912_v54  ;;  %v1918_v11 = vadd.f32 %v1917_v5, %v1915_v36 }
 0x1e1   : > { %1919 = vadd.xlane.f32.xlu0 %v1918_v11 }
 0x1e2   : > { %2532 = shalt.err (!%p2529_p5)
}
 0x1e3   : > { %s2533_s7 = scalar_lea.hbm %s1947_s15, 256  ;;  %s2537_s11 = scalar_lea.hbm %s3634_s4, 512 }
 0x1e4   : > { %p2534_p6 = scmp.ne.s32.totalorder %s1947_s15, %s2533_s7  ;;  %p2538_p10 = scmp.lt.s32.totalorder %s1947_s15, %s3634_s4 }
 0x1e5   : > { %p2539_p11 = scmp.lt.s32.totalorder %s2537_s11, %s2533_s7 }
 0x1e6   : > { %p2535_p7 = pnand %p2534_p6, %p2735_p4 }
 0x1e7   : > { %p2540_p12 = por %p2539_p11, %p2538_p10 }
 0x1e8   : > { %p2536_p9 = pneg %p2535_p7 }
 0x1ea   : > { %p2541_p13 = pnand %p2540_p12, %p2536_p9 }
 0x1ec   : > { %2544 = shalt.err (!%p2541_p13)
}
 0x1ed   : > { %2196 = dma.vmem_to_hbm [thread:$0]  (%p2735_p4), %s1950_s16, 256, %s1947_s15, %s1928_s17   ;;  %vm1921_vm2 = vcmp.eq.s32.totalorder %v3562_v19, 0  ;;  %vm1923_vm3 = vcmp.eq.s32.totalorder %v3562_v19, 1 }
 0x1ee   : > { %s2078_s14 = sshll.u32 %s3565_s9, 3  ;;  %s2191_s24 = sshll.u32 %s2617_s21, 7 }
 0x1ef   : > { %s255_s25 = scalar_lea.vmem [#allocation4], %s2078_s14  ;;  %s1961_s8 = scalar_lea.hbm %s3635_s5, %s2191_s24 }
 0x1f0   : > { %s1963_s27 = sshll.u32 %s255_s25, 4  ;;  %s1933_s15 = scalar_lea.sflag [#allocation5], %s3565_s9  ;;  %s1964_s27 = int_to_ptr.vmem [resolvable:$true] %s1963_s27 }
 0x1f1   : > { %s2545_s16 = scalar_lea.vmem %s1964_s27, 128  ;;  %s2664_s17 = smov [#allocation4]  }
 0x1f2   : > { %p2546_p0 = scmp.ne.s32.totalorder %s1964_s27, %s2545_s16  ;;  %s2549_s21 = sshll.u32 %s2664_s17, 4  ;;  %s2550_s21 = int_to_ptr.vmem [resolvable:$false] %s2549_s21 }
 0x1f3   : > { %s2551_s10 = scalar_lea.vmem %s2550_s21, 256  ;;  %p2552_p3 = scmp.lt.s32.totalorder %s1964_s27, %s2550_s21 }
 0x1f4   : > { %p2547_p1 = pnand %p2546_p0, %p2735_p4  ;;  %p2553_p5 = scmp.lt.s32.totalorder %s2551_s10, %s2545_s16 }
 0x1f6   : > { %p2548_p2 = pneg %p2547_p1  ;;  %p2554_p6 = por %p2553_p5, %p2552_p3 }
 0x1f8   : > { %p2555_p7 = pnand %p2554_p6, %p2548_p2 }
 0x268   : > { %v1914_v23 = vpop.xlane.xlu1 %1913 }
 0x269   : > { %v1922_v22 = vsel %vm1921_vm2, %v1914_v23, 0.0 }
 0x26a   : > { %v1920_v62 = vpop.xlane.xlu0 %1919 }
 0x26b   : > { %v1924_v45 = vsel %vm1923_vm3, %v1920_v62, 0.0 }
 0x26c   : > { %v1925_v55 = vadd.f32 %v1924_v45, %v1922_v22 }
 0x26e   : > { %1926 = vst [vmem:[%s255_s25] sm:$0xff] %v1925_v55 }
 0x26f   : > { %2558 = shalt.err (!%p2555_p7)
}
 0x270   : > { %s2559_s11 = scalar_lea.hbm %s1961_s8, 128  ;;  %s2563_s13 = scalar_lea.hbm %s3635_s5, 256 }
 0x271   : > { %p2560_p9 = scmp.ne.s32.totalorder %s1961_s8, %s2559_s11  ;;  %p2564_p12 = scmp.lt.s32.totalorder %s1961_s8, %s3635_s5 }
 0x272   : > { %p2565_p13 = scmp.lt.s32.totalorder %s2563_s13, %s2559_s11 }
 0x273   : > { %p2561_p10 = pnand %p2560_p9, %p2735_p4 }
 0x274   : > { %p2566_p0 = por %p2565_p13, %p2564_p12 }
 0x275   : > { %p2562_p11 = pneg %p2561_p10 }
 0x277   : > { %p2567_p1 = pnand %p2566_p0, %p2562_p11 }
 0x279   : > { %2570 = shalt.err (!%p2567_p1)
}
 0x27a   : > { %2197 = dma.vmem_to_hbm [thread:$0]  (%p2735_p4), %s1964_s27, 128, %s1961_s8, %s1933_s15  }
 0x27b PF: > { %p2207_p2 = scmp.ge.s32.totalorder %s2625_s23, 2  ;;  %s1975_s25 = sand.u32 1, %s2605_s18  }
 0x27c   : > { %s1976_s29 = scalar_lea.sflag [#allocation3], %s1975_s25 }
 0x27d   : > { %p2201_p3 = pnand %p2207_p2, %p2742_p8 }
 0x27f   : > { %p2202_p5 = pneg %p2201_p3 }
 0x281   : > { %2596 = dma.done.wait (%p2202_p5), %s1976_s29, 256  }
 0x282   : > { %2598 = vsyncadd (%p2202_p5), %s1976_s29, 4294967040  ;;  %s1985_s7 = scalar_lea.sflag [#allocation5], %s1975_s25 }
 0x283   : > { %2600 = dma.done.wait (%p2202_p5), %s1985_s7, 128  }
 0x284   : > { %2602 = vsyncadd (%p2202_p5), %s1985_s7, 4294967168  ;;  %s22_s23 = sadd.s32 1, %s2625_s23   ;;  %s3644_s18 = smov %s2609_s19 }
 0x285   : > { %p19_p6 = scmp.ge.s32.totalorder %s22_s23, 4   ;;  %s3645_s19 = smov %s2613_s20 }
 0x286   : > { %s3646_s20 = smov %s2748_s6  ;;  %s3647_s21 = smov %s2621_s22 }
 0x287   : > { %s3648_s22 = smov %s3650_s26  ;;  %21 = sbr.rel (!%p19_p6) target bundleno = 6 (0x6), region = 123 }
 0x28c   :  { %1990 = vsyncpa [#allocation3], 1 }
 0x28d   :  { %1992 = vsyncpa [#allocation3 + $0x1], 1 }
 0x28e   :  { %1993 = vsyncpa [#allocation5], 1 }
 0x28f   :  { %1995 = vsyncpa [#allocation5 + $0x1], 1 }

</bundles_post_ra>
